<compile_context>
chip_gen: v5e
topology: v5e:2x2
jax: 0.10.0
libtpu: 0.0.40
codegen_flags: <defaults>
</compile_context>

<pallas_src>
import functools
import math

import jax
import jax.numpy as jnp
from jax.experimental import pallas as pl
from jax.experimental.pallas import tpu as pltpu

_GAP = 128  # zero halo / inter-level gap (lanes) in the flat activation scratch


def _scratch_layout(dims):
    """Per-level base offsets inside the zero-padded flat activation scratch."""
    bases, off = [], _GAP
    for (_, w) in dims:
        assert w + 1 <= _GAP, "gap must cover one row of halo reads"
        bases.append(off)
        off += dims[len(bases) - 1][0] * w + _GAP
    return bases, off


# ----------------------------------------------------------------------------
# Fused FCOS head kernel: one grid step = one batch element, all levels.
# ----------------------------------------------------------------------------
def _fcos_head_kernel(*refs, dims, n_share, n_cls, n_box, yield_bt):
    L = len(dims)
    HWs = [h * w for (h, w) in dims]
    bases, _ = _scratch_layout(dims)

    x_refs = refs[:L]
    (scale_ref, tw_ref, tb_ref, cw_ref, cb_ref, rw_ref, rb_ref) = refs[L:L + 7]
    outs = refs[L + 7:]
    if yield_bt:
        cls_ref, reg_ref, bt_ref, act_ref = outs
    else:
        cls_ref, reg_ref, act_ref = outs
        bt_ref = None

    # Horizontal-edge masks over the compact lane layout, built in-kernel.
    m_left_parts, m_right_parts = [], []
    for (h, w) in dims:
        hw = h * w
        it = jax.lax.broadcasted_iota(jnp.int32, (1, hw), 1)
        col = (it & (w - 1)) if (w & (w - 1)) == 0 else (it % w)
        m_left_parts.append(jnp.where(col != 0, 1.0, 0.0).astype(jnp.float32))
        m_right_parts.append(jnp.where(col != w - 1, 1.0, 0.0).astype(jnp.float32))
    m_left = (jnp.concatenate(m_left_parts, axis=1) if L > 1 else m_left_parts[0])
    m_right = (jnp.concatenate(m_right_parts, axis=1) if L > 1 else m_right_parts[0])

    # Zero halos/gaps. The whole scratch is only a handful of vregs, so a
    # full clear per grid step is cheaper than partial-clear bookkeeping.
    act_ref[...] = jnp.zeros_like(act_ref)

    def conv3x3(a, w, b, relu):
        """a: (C, TOT) f32 compact activation; w: (Cout, 9C) bf16; b: (Cout,1) f32."""
        # Scatter the compact activation into the zero-gapped scratch; the
        # zero gaps/halos implement padding=1 (vertically and between levels).
        s = 0
        for l in range(L):
            hw = HWs[l]
            act_ref[:, bases[l]:bases[l] + hw] = a[:, s:s + hw]
            s += hw
        # im2col patch built in registers (no VMEM patch round-trip).
        taps = []
        for dy in (-1, 0, 1):
            for dx in (-1, 0, 1):
                parts = []
                for l in range(L):
                    wid = dims[l][1]
                    hw = HWs[l]
                    off = dy * wid + dx
                    parts.append(act_ref[:, bases[l] + off:bases[l] + off + hw])
                sl = jnp.concatenate(parts, axis=1) if L > 1 else parts[0]
                if dx == -1:
                    sl = sl * m_left
                elif dx == 1:
                    sl = sl * m_right
                taps.append(sl)
        patch = jnp.concatenate(taps, axis=0).astype(jnp.bfloat16)   # (9C, TOT)
        out = jnp.dot(w, patch, preferred_element_type=jnp.float32) + b
        if relu:
            out = jnp.maximum(out, 0.0)
        return out

    a = (jnp.concatenate([x_refs[l][0] for l in range(L)], axis=1)
         if L > 1 else x_refs[0][0])                       # (C, TOT)
    for i in range(n_share):                               # share tower
        a = conv3x3(a, tw_ref[i], tb_ref[i], True)
    shared = a

    a = shared                                             # cls tower
    for i in range(n_share, n_share + n_cls):
        a = conv3x3(a, tw_ref[i], tb_ref[i], True)
    cls_t = a

    a = shared                                             # bbox tower
    for i in range(n_share + n_cls, n_share + n_cls + n_box):
        a = conv3x3(a, tw_ref[i], tb_ref[i], True)
    box_t = a
    if yield_bt:
        bt_ref[0] = box_t

    cls_ref[0] = conv3x3(cls_t, cw_ref[...], cb_ref[...], False)       # (NC, TOT)

    # bbox_pred + ctrness fused as one Cout=5 conv; Scale applied per-lane,
    # then ReLU on the bbox rows only (matches relu(scale*(Wx+b))).
    reg_all = conv3x3(box_t, rw_ref[...], rb_ref[...], False)          # (5, TOT)
    bbox = jnp.maximum(reg_all[0:4, :] * scale_ref[...], 0.0)
    reg_ref[0] = jnp.concatenate([bbox, reg_all[4:5, :]], axis=0)


@functools.partial(jax.jit,
                   static_argnames=("dims", "n_share", "n_cls", "n_box", "yield_bt"))
def _fcos_forward(feats, scale_vec, tower_w, tower_b, cls_w, cls_b, reg_w, reg_b,
                  *, dims, n_share, n_cls, n_box, yield_bt):
    L = len(dims)
    N, C = feats[0].shape[0], feats[0].shape[1]
    HWs = [h * w for (h, w) in dims]
    TOT = sum(HWs)
    _, width = _scratch_layout(dims)
    NC = cls_w.shape[0]
    T = tower_w.shape[0]

    feats_flat = [f.reshape(N, C, hw).astype(jnp.float32)
                  for f, hw in zip(feats, HWs)]
    scale_lane = jnp.concatenate(
        [jnp.broadcast_to(scale_vec[l], (1, hw)) for l, hw in enumerate(HWs)],
        axis=1).astype(jnp.float32)

    kernel = functools.partial(_fcos_head_kernel, dims=dims, n_share=n_share,
                               n_cls=n_cls, n_box=n_box, yield_bt=yield_bt)

    out_shape = [jax.ShapeDtypeStruct((N, NC, TOT), jnp.float32),
                 jax.ShapeDtypeStruct((N, 5, TOT), jnp.float32)]
    out_specs = [pl.BlockSpec((1, NC, TOT), lambda n: (n, 0, 0)),
                 pl.BlockSpec((1, 5, TOT), lambda n: (n, 0, 0))]
    if yield_bt:
        out_shape.append(jax.ShapeDtypeStruct((N, C, TOT), jnp.float32))
        out_specs.append(pl.BlockSpec((1, C, TOT), lambda n: (n, 0, 0)))

    in_specs = ([pl.BlockSpec((1, C, hw), lambda n: (n, 0, 0)) for hw in HWs] +
                [pl.BlockSpec((1, TOT), lambda n: (0, 0)),        # scale lanes
                 pl.BlockSpec((T, C, 9 * C), lambda n: (0, 0, 0)),  # tower W
                 pl.BlockSpec((T, C, 1), lambda n: (0, 0, 0)),      # tower b
                 pl.BlockSpec((NC, 9 * C), lambda n: (0, 0)),       # cls W
                 pl.BlockSpec((NC, 1), lambda n: (0, 0)),           # cls b
                 pl.BlockSpec((5, 9 * C), lambda n: (0, 0)),        # bbox+ctr W
                 pl.BlockSpec((5, 1), lambda n: (0, 0))])           # bbox+ctr b

    outs = pl.pallas_call(
        kernel,
        out_shape=tuple(out_shape),
        grid=(N,),
        in_specs=in_specs,
        out_specs=tuple(out_specs),
        scratch_shapes=[pltpu.VMEM((C, width), jnp.float32)],
        compiler_params=pltpu.CompilerParams(
            dimension_semantics=("parallel",)),
    )(*feats_flat,
      scale_lane,
      tower_w.astype(jnp.bfloat16), tower_b,
      cls_w.astype(jnp.bfloat16), cls_b,
      reg_w.astype(jnp.bfloat16), reg_b)

    cls_slab, reg_slab = outs[0], outs[1]
    bt_slab = outs[2] if yield_bt else None

    logits, bbox_reg, ctrness, bbox_towers = [], [], [], []
    s = 0
    for (h, w), hw in zip(dims, HWs):
        logits.append(cls_slab[:, :, s:s + hw].reshape(N, NC, h, w))
        bbox_reg.append(reg_slab[:, 0:4, s:s + hw].reshape(N, 4, h, w))
        ctrness.append(reg_slab[:, 4:5, s:s + hw].reshape(N, 1, h, w))
        if yield_bt:
            bbox_towers.append(bt_slab[:, :, s:s + hw].reshape(N, C, h, w))
        s += hw
    return logits, bbox_reg, ctrness, bbox_towers


# ----------------------------------------------------------------------------
# FCOSHead: deterministic parameter construction + forward
# ----------------------------------------------------------------------------
def _conv_wb(key, cin, cout, bias_value=0.0):
    # torch init: normal_(weight, std=0.01); constant_(bias, 0 / prior bias).
    w = 0.01 * jax.random.normal(key, (cout, cin, 3, 3), dtype=jnp.float32)
    b = jnp.full((cout,), bias_value, dtype=jnp.float32)
    return w, b


def _flatten_w(w):
    # (Cout, Cin, 3, 3) -> (Cout, 9*Cin); column = (ky*3+kx)*Cin + cin,
    # matching the tap/channel order of the in-kernel im2col patch.
    cout, cin = w.shape[0], w.shape[1]
    return jnp.transpose(w, (0, 2, 3, 1)).reshape(cout, 9 * cin)


class FCOSHeadPallas:
    def __init__(self, key, *, in_channels=8, num_classes=8,
                 num_cls_convs=2, num_box_convs=2, num_share_convs=1,
                 num_levels=2, use_scale=True, prior_prob=0.01):
        self.in_channels = in_channels
        self.num_classes = num_classes
        self.num_levels = num_levels
        self.n_share = num_share_convs
        self.n_cls = num_cls_convs
        self.n_box = num_box_convs

        n_tower = num_share_convs + num_cls_convs + num_box_convs
        keys = jax.random.split(key, n_tower + 3)
        tower = [_conv_wb(keys[i], in_channels, in_channels)
                 for i in range(n_tower)]               # [share..., cls..., box...]
        self.tower_w4 = [w for w, _ in tower]
        self.tower_bv = [b for _, b in tower]
        self.tower_w = jnp.stack([_flatten_w(w) for w in self.tower_w4])  # (T,C,9C)
        self.tower_b = jnp.stack([b.reshape(in_channels, 1)
                                  for b in self.tower_bv])                # (T,C,1)

        self.cls_w4, self.cls_bv = _conv_wb(
            keys[n_tower], in_channels, num_classes,
            bias_value=-math.log((1.0 - prior_prob) / prior_prob))
        self.cls_w = _flatten_w(self.cls_w4)
        self.cls_b = self.cls_bv.reshape(num_classes, 1)

        self.bbox_w4, self.bbox_bv = _conv_wb(keys[n_tower + 1], in_channels, 4)
        self.ctr_w4, self.ctr_bv = _conv_wb(keys[n_tower + 2], in_channels, 1)
        # bbox_pred and ctrness fused into one Cout=5 head conv (built once).
        self.reg_w = jnp.concatenate(
            [_flatten_w(self.bbox_w4), _flatten_w(self.ctr_w4)], axis=0)
        self.reg_b = jnp.concatenate([self.bbox_bv, self.ctr_bv]).reshape(5, 1)

        self.scales = ([1.0] * num_levels) if use_scale else None
        # Scale values as a (L,) vector consumed by the jitted forward
        # (identity when USE_SCALE=False).
        self.scale_vec = jnp.ones((num_levels,), jnp.float32)

    def forward(self, x, top_module=None, yield_bbox_towers=False):
        """x: list of NCHW feature maps (one per FPN level)."""
        assert len(x) == self.num_levels
        dims = tuple((int(f.shape[2]), int(f.shape[3])) for f in x)
        logits, bbox_reg, ctrness, bbox_towers = _fcos_forward(
            tuple(x), self.scale_vec, self.tower_w, self.tower_b,
            self.cls_w, self.cls_b, self.reg_w, self.reg_b,
            dims=dims, n_share=self.n_share, n_cls=self.n_cls,
            n_box=self.n_box, yield_bt=bool(yield_bbox_towers))
        top_feats = []
        # TODO(synk): top_module is an arbitrary external module; not modeled.
        return logits, bbox_reg, ctrness, top_feats, bbox_towers


# ----------------------------------------------------------------------------
# Pure-JAX reference (lax.conv, f32-highest) for numerical validation.
# ----------------------------------------------------------------------------
def _ref_conv(x, w4, bv):
    y = jax.lax.conv_general_dilated(
        x, w4, window_strides=(1, 1), padding=((1, 1), (1, 1)),
        dimension_numbers=("NCHW", "OIHW", "NCHW"),
        precision=jax.lax.Precision.HIGHEST)
    return y + bv.reshape(1, -1, 1, 1)


def reference_forward(head, xs):
    logits, bbox_reg, ctrness = [], [], []
    for l, x in enumerate(xs):
        a = x
        for i in range(head.n_share):
            a = jax.nn.relu(_ref_conv(a, head.tower_w4[i], head.tower_bv[i]))
        shared = a
        a = shared
        for i in range(head.n_share, head.n_share + head.n_cls):
            a = jax.nn.relu(_ref_conv(a, head.tower_w4[i], head.tower_bv[i]))
        cls_t = a
        a = shared
        for i in range(head.n_share + head.n_cls,
                       head.n_share + head.n_cls + head.n_box):
            a = jax.nn.relu(_ref_conv(a, head.tower_w4[i], head.tower_bv[i]))
        box_t = a
        logits.append(_ref_conv(cls_t, head.cls_w4, head.cls_bv))
        reg = _ref_conv(box_t, head.bbox_w4, head.bbox_bv) * head.scale_vec[l]
        bbox_reg.append(jax.nn.relu(reg))
        ctrness.append(_ref_conv(box_t, head.ctr_w4, head.ctr_bv))
    return logits, bbox_reg, ctrness


if __name__ == "__main__":
    key = jax.random.PRNGKey(0)
    kp, kx0, kx1 = jax.random.split(key, 3)

    head = FCOSHeadPallas(kp, in_channels=8, num_classes=8,
                          num_cls_convs=2, num_box_convs=2,
                          num_share_convs=1, num_levels=2)

    # Two FPN levels, NCHW (PyTorch convention): (2, 8, 16, 16) and (2, 8, 8, 8)
    x0 = jax.random.normal(kx0, (2, 8, 16, 16), dtype=jnp.float32)
    x1 = jax.random.normal(kx1, (2, 8, 8, 8), dtype=jnp.float32)

    logits, bbox_reg, ctrness, top_feats, bbox_towers = head.forward([x0, x1])
    jax.block_until_ready((logits, bbox_reg, ctrness))

    # Shape / sanity checks.
    assert logits[0].shape == (2, 8, 16, 16) and logits[1].shape == (2, 8, 8, 8)
    assert bbox_reg[0].shape == (2, 4, 16, 16) and bbox_reg[1].shape == (2, 4, 8, 8)
    assert ctrness[0].shape == (2, 1, 16, 16) and ctrness[1].shape == (2, 1, 8, 8)
    assert bool(jnp.all(bbox_reg[0] >= 0)) and bool(jnp.all(bbox_reg[1] >= 0))
    assert all(bool(jnp.all(jnp.isfinite(t)))
               for t in (logits + bbox_reg + ctrness))

    # Numerical check against the pure-JAX reference (bf16-matmul tolerance).
    ref_lg, ref_bb, ref_ct = reference_forward(head, [x0, x1])
    for got, ref in zip(logits + bbox_reg + ctrness, ref_lg + ref_bb + ref_ct):
        err = float(jnp.max(jnp.abs(got - ref)))
        assert err < 3e-3, f"max abs error {err}"

    print("KERNEL_OK")
</pallas_src>

<mosaic_0001>
module attributes {stable_mosaic.version = 11 : i64} {
  func.func @_fcos_head_kernel(%arg0: i32, %arg1: memref<1x8x256xf32, #tpu.memory_space<vmem>>, %arg2: memref<1x8x64xf32, #tpu.memory_space<vmem>>, %arg3: memref<1x320xf32, #tpu.memory_space<vmem>>, %arg4: memref<5x8x72xbf16, #tpu.memory_space<vmem>>, %arg5: memref<5x8x1xf32, #tpu.memory_space<vmem>>, %arg6: memref<8x72xbf16, #tpu.memory_space<vmem>>, %arg7: memref<8x1xf32, #tpu.memory_space<vmem>>, %arg8: memref<5x72xbf16, #tpu.memory_space<vmem>>, %arg9: memref<5x1xf32, #tpu.memory_space<vmem>>, %arg10: memref<1x8x320xf32, #tpu.memory_space<vmem>>, %arg11: memref<1x5x320xf32, #tpu.memory_space<vmem>>, %arg12: memref<8x704xf32, #tpu.memory_space<vmem>>) attributes {dimension_semantics = [#tpu.dimension_semantics<parallel>], iteration_bounds = array<i64: 2>, scalar_prefetch = 0 : i64, scratch_operands = 1 : i64, tpu.core_type = #tpu.core_type<tc>, window_params = [{transform_indices = @transform_0, window_bounds = array<i64: 1, 8, 256>}, {transform_indices = @transform_1, window_bounds = array<i64: 1, 8, 64>}, {pipeline_mode = #tpu.pipeline_mode<synchronous>, transform_indices = @transform_2, window_bounds = array<i64: 1, 320>}, {pipeline_mode = #tpu.pipeline_mode<synchronous>, transform_indices = @transform_3, window_bounds = array<i64: 5, 8, 72>}, {pipeline_mode = #tpu.pipeline_mode<synchronous>, transform_indices = @transform_4, window_bounds = array<i64: 5, 8, 1>}, {pipeline_mode = #tpu.pipeline_mode<synchronous>, transform_indices = @transform_5, window_bounds = array<i64: 8, 72>}, {pipeline_mode = #tpu.pipeline_mode<synchronous>, transform_indices = @transform_6, window_bounds = array<i64: 8, 1>}, {pipeline_mode = #tpu.pipeline_mode<synchronous>, transform_indices = @transform_7, window_bounds = array<i64: 5, 72>}, {pipeline_mode = #tpu.pipeline_mode<synchronous>, transform_indices = @transform_8, window_bounds = array<i64: 5, 1>}, {transform_indices = @transform_9, window_bounds = array<i64: 1, 8, 320>}, {transform_indices = @transform_10, window_bounds = array<i64: 1, 5, 320>}]} {
    %0 = tpu.iota {dimensions = array<i32: 1>} : vector<1x256xi32>
    %c15_i32 = arith.constant 15 : i32
    %1 = vector.broadcast %c15_i32 : i32 to vector<1x256xi32>
    %2 = arith.andi %0, %1 : vector<1x256xi32>
    %c0_i32 = arith.constant 0 : i32
    %3 = vector.broadcast %c0_i32 : i32 to vector<1x256xi32>
    %4 = arith.cmpi ne, %2, %3 : vector<1x256xi32>
    %cst = arith.constant 1.000000e+00 : f32
    %cst_0 = arith.constant 0.000000e+00 : f32
    %5 = vector.broadcast %cst : f32 to vector<1x256xf32>
    %6 = vector.broadcast %cst_0 : f32 to vector<1x256xf32>
    %7 = arith.select %4, %5, %6 : vector<1x256xi1>, vector<1x256xf32>
    %c15_i32_1 = arith.constant 15 : i32
    %8 = vector.broadcast %c15_i32_1 : i32 to vector<1x256xi32>
    %9 = arith.cmpi ne, %2, %8 : vector<1x256xi32>
    %cst_2 = arith.constant 1.000000e+00 : f32
    %cst_3 = arith.constant 0.000000e+00 : f32
    %10 = vector.broadcast %cst_2 : f32 to vector<1x256xf32>
    %11 = vector.broadcast %cst_3 : f32 to vector<1x256xf32>
    %12 = arith.select %9, %10, %11 : vector<1x256xi1>, vector<1x256xf32>
    %13 = tpu.iota {dimensions = array<i32: 1>} : vector<1x64xi32>
    %c7_i32 = arith.constant 7 : i32
    %14 = vector.broadcast %c7_i32 : i32 to vector<1x64xi32>
    %15 = arith.andi %13, %14 : vector<1x64xi32>
    %c0_i32_4 = arith.constant 0 : i32
    %16 = vector.broadcast %c0_i32_4 : i32 to vector<1x64xi32>
    %17 = arith.cmpi ne, %15, %16 : vector<1x64xi32>
    %cst_5 = arith.constant 1.000000e+00 : f32
    %cst_6 = arith.constant 0.000000e+00 : f32
    %18 = vector.broadcast %cst_5 : f32 to vector<1x64xf32>
    %19 = vector.broadcast %cst_6 : f32 to vector<1x64xf32>
    %20 = arith.select %17, %18, %19 : vector<1x64xi1>, vector<1x64xf32>
    %c7_i32_7 = arith.constant 7 : i32
    %21 = vector.broadcast %c7_i32_7 : i32 to vector<1x64xi32>
    %22 = arith.cmpi ne, %15, %21 : vector<1x64xi32>
    %cst_8 = arith.constant 1.000000e+00 : f32
    %cst_9 = arith.constant 0.000000e+00 : f32
    %23 = vector.broadcast %cst_8 : f32 to vector<1x64xf32>
    %24 = vector.broadcast %cst_9 : f32 to vector<1x64xf32>
    %25 = arith.select %22, %23, %24 : vector<1x64xi1>, vector<1x64xf32>
    %26 = tpu.concatenate %7, %20 in 1 : vector<1x256xf32>, vector<1x64xf32> -> vector<1x320xf32>
    %27 = tpu.concatenate %12, %25 in 1 : vector<1x256xf32>, vector<1x64xf32> -> vector<1x320xf32>
    %cst_10 = arith.constant 0.000000e+00 : f32
    %28 = vector.broadcast %cst_10 : f32 to vector<8x704xf32>
    %c0 = arith.constant 0 : index
    %c0_11 = arith.constant 0 : index
    %29 = vector.load %arg12[%c0, %c0_11] : memref<8x704xf32, #tpu.memory_space<vmem>>, vector<8x704xf32>
    tpu.vector_store %arg12[%c0, %c0_11], %28 {strides = array<i32>} : memref<8x704xf32, #tpu.memory_space<vmem>>, vector<8x704xf32>,
    %c0_12 = arith.constant 0 : index
    %c0_13 = arith.constant 0 : index
    %c0_14 = arith.constant 0 : index
    %30 = vector.load %arg1[%c0_12, %c0_13, %c0_14] : memref<1x8x256xf32, #tpu.memory_space<vmem>>, vector<1x8x256xf32>
    %31 = vector.shape_cast %30 : vector<1x8x256xf32> to vector<8x256xf32>
    %c0_15 = arith.constant 0 : index
    %c0_16 = arith.constant 0 : index
    %c0_17 = arith.constant 0 : index
    %32 = vector.load %arg2[%c0_15, %c0_16, %c0_17] : memref<1x8x64xf32, #tpu.memory_space<vmem>>, vector<1x8x64xf32>
    %33 = vector.shape_cast %32 : vector<1x8x64xf32> to vector<8x64xf32>
    %34 = tpu.concatenate %31, %33 in 1 : vector<8x256xf32>, vector<8x64xf32> -> vector<8x320xf32>
    %c0_18 = arith.constant 0 : index
    %c0_19 = arith.constant 0 : index
    %c0_20 = arith.constant 0 : index
    %35 = vector.load %arg4[%c0_18, %c0_19, %c0_20] : memref<5x8x72xbf16, #tpu.memory_space<vmem>>, vector<1x8x72xbf16>
    %36 = vector.shape_cast %35 : vector<1x8x72xbf16> to vector<8x72xbf16>
    %c0_21 = arith.constant 0 : index
    %c0_22 = arith.constant 0 : index
    %c0_23 = arith.constant 0 : index
    %37 = vector.load %arg5[%c0_21, %c0_22, %c0_23] : memref<5x8x1xf32, #tpu.memory_space<vmem>>, vector<1x8x1xf32>
    %38 = vector.shape_cast %37 : vector<1x8x1xf32> to vector<8x1xf32>
    %39 = vector.extract_strided_slice %34 {offsets = [0, 0], sizes = [8, 256], strides = [1, 1]} : vector<8x320xf32> to vector<8x256xf32>
    %c0_24 = arith.constant 0 : index
    %c128 = arith.constant 128 : index
    %40 = vector.load %arg12[%c0_24, %c128] : memref<8x704xf32, #tpu.memory_space<vmem>>, vector<8x256xf32>
    tpu.vector_store %arg12[%c0_24, %c128], %39 {strides = array<i32>} : memref<8x704xf32, #tpu.memory_space<vmem>>, vector<8x256xf32>,
    %41 = vector.extract_strided_slice %34 {offsets = [0, 256], sizes = [8, 64], strides = [1, 1]} : vector<8x320xf32> to vector<8x64xf32>
    %c0_25 = arith.constant 0 : index
    %c512 = arith.constant 512 : index
    %42 = vector.load %arg12[%c0_25, %c512] : memref<8x704xf32, #tpu.memory_space<vmem>>, vector<8x64xf32>
    tpu.vector_store %arg12[%c0_25, %c512], %41 {strides = array<i32>} : memref<8x704xf32, #tpu.memory_space<vmem>>, vector<8x64xf32>,
    %c0_26 = arith.constant 0 : index
    %c111 = arith.constant 111 : index
    %43 = vector.load %arg12[%c0_26, %c111] : memref<8x704xf32, #tpu.memory_space<vmem>>, vector<8x256xf32>
    %c0_27 = arith.constant 0 : index
    %c503 = arith.constant 503 : index
    %44 = vector.load %arg12[%c0_27, %c503] : memref<8x704xf32, #tpu.memory_space<vmem>>, vector<8x64xf32>
    %45 = tpu.concatenate %43, %44 in 1 : vector<8x256xf32>, vector<8x64xf32> -> vector<8x320xf32>
    %46 = vector.broadcast %26 : vector<1x320xf32> to vector<8x320xf32>
    %47 = arith.mulf %45, %46 : vector<8x320xf32>
    %c0_28 = arith.constant 0 : index
    %c112 = arith.constant 112 : index
    %48 = vector.load %arg12[%c0_28, %c112] : memref<8x704xf32, #tpu.memory_space<vmem>>, vector<8x256xf32>
    %c0_29 = arith.constant 0 : index
    %c504 = arith.constant 504 : index
    %49 = vector.load %arg12[%c0_29, %c504] : memref<8x704xf32, #tpu.memory_space<vmem>>, vector<8x64xf32>
    %50 = tpu.concatenate %48, %49 in 1 : vector<8x256xf32>, vector<8x64xf32> -> vector<8x320xf32>
    %c0_30 = arith.constant 0 : index
    %c113 = arith.constant 113 : index
    %51 = vector.load %arg12[%c0_30, %c113] : memref<8x704xf32, #tpu.memory_space<vmem>>, vector<8x256xf32>
    %c0_31 = arith.constant 0 : index
    %c505 = arith.constant 505 : index
    %52 = vector.load %arg12[%c0_31, %c505] : memref<8x704xf32, #tpu.memory_space<vmem>>, vector<8x64xf32>
    %53 = tpu.concatenate %51, %52 in 1 : vector<8x256xf32>, vector<8x64xf32> -> vector<8x320xf32>
    %54 = vector.broadcast %27 : vector<1x320xf32> to vector<8x320xf32>
    %55 = arith.mulf %53, %54 : vector<8x320xf32>
    %c0_32 = arith.constant 0 : index
    %c127 = arith.constant 127 : index
    %56 = vector.load %arg12[%c0_32, %c127] : memref<8x704xf32, #tpu.memory_space<vmem>>, vector<8x256xf32>
    %c0_33 = arith.constant 0 : index
    %c511 = arith.constant 511 : index
    %57 = vector.load %arg12[%c0_33, %c511] : memref<8x704xf32, #tpu.memory_space<vmem>>, vector<8x64xf32>
    %58 = tpu.concatenate %56, %57 in 1 : vector<8x256xf32>, vector<8x64xf32> -> vector<8x320xf32>
    %59 = vector.broadcast %26 : vector<1x320xf32> to vector<8x320xf32>
    %60 = arith.mulf %58, %59 : vector<8x320xf32>
    %c0_34 = arith.constant 0 : index
    %c128_35 = arith.constant 128 : index
    %61 = vector.load %arg12[%c0_34, %c128_35] : memref<8x704xf32, #tpu.memory_space<vmem>>, vector<8x256xf32>
    %c0_36 = arith.constant 0 : index
    %c512_37 = arith.constant 512 : index
    %62 = vector.load %arg12[%c0_36, %c512_37] : memref<8x704xf32, #tpu.memory_space<vmem>>, vector<8x64xf32>
    %63 = tpu.concatenate %61, %62 in 1 : vector<8x256xf32>, vector<8x64xf32> -> vector<8x320xf32>
    %c0_38 = arith.constant 0 : index
    %c129 = arith.constant 129 : index
    %64 = vector.load %arg12[%c0_38, %c129] : memref<8x704xf32, #tpu.memory_space<vmem>>, vector<8x256xf32>
    %c0_39 = arith.constant 0 : index
    %c513 = arith.constant 513 : index
    %65 = vector.load %arg12[%c0_39, %c513] : memref<8x704xf32, #tpu.memory_space<vmem>>, vector<8x64xf32>
    %66 = tpu.concatenate %64, %65 in 1 : vector<8x256xf32>, vector<8x64xf32> -> vector<8x320xf32>
    %67 = vector.broadcast %27 : vector<1x320xf32> to vector<8x320xf32>
    %68 = arith.mulf %66, %67 : vector<8x320xf32>
    %c0_40 = arith.constant 0 : index
    %c143 = arith.constant 143 : index
    %69 = vector.load %arg12[%c0_40, %c143] : memref<8x704xf32, #tpu.memory_space<vmem>>, vector<8x256xf32>
    %c0_41 = arith.constant 0 : index
    %c519 = arith.constant 519 : index
    %70 = vector.load %arg12[%c0_41, %c519] : memref<8x704xf32, #tpu.memory_space<vmem>>, vector<8x64xf32>
    %71 = tpu.concatenate %69, %70 in 1 : vector<8x256xf32>, vector<8x64xf32> -> vector<8x320xf32>
    %72 = vector.broadcast %26 : vector<1x320xf32> to vector<8x320xf32>
    %73 = arith.mulf %71, %72 : vector<8x320xf32>
    %c0_42 = arith.constant 0 : index
    %c144 = arith.constant 144 : index
    %74 = vector.load %arg12[%c0_42, %c144] : memref<8x704xf32, #tpu.memory_space<vmem>>, vector<8x256xf32>
    %c0_43 = arith.constant 0 : index
    %c520 = arith.constant 520 : index
    %75 = vector.load %arg12[%c0_43, %c520] : memref<8x704xf32, #tpu.memory_space<vmem>>, vector<8x64xf32>
    %76 = tpu.concatenate %74, %75 in 1 : vector<8x256xf32>, vector<8x64xf32> -> vector<8x320xf32>
    %c0_44 = arith.constant 0 : index
    %c145 = arith.constant 145 : index
    %77 = vector.load %arg12[%c0_44, %c145] : memref<8x704xf32, #tpu.memory_space<vmem>>, vector<8x256xf32>
    %c0_45 = arith.constant 0 : index
    %c521 = arith.constant 521 : index
    %78 = vector.load %arg12[%c0_45, %c521] : memref<8x704xf32, #tpu.memory_space<vmem>>, vector<8x64xf32>
    %79 = tpu.concatenate %77, %78 in 1 : vector<8x256xf32>, vector<8x64xf32> -> vector<8x320xf32>
    %80 = vector.broadcast %27 : vector<1x320xf32> to vector<8x320xf32>
    %81 = arith.mulf %79, %80 : vector<8x320xf32>
    %82 = tpu.concatenate %47, %50, %55, %60, %63, %68, %73, %76, %81 in 0 : vector<8x320xf32>, vector<8x320xf32>, vector<8x320xf32>, vector<8x320xf32>, vector<8x320xf32>, vector<8x320xf32>, vector<8x320xf32>, vector<8x320xf32>, vector<8x320xf32> -> vector<72x320xf32>
    %83 = arith.truncf %82 : vector<72x320xf32> to vector<72x320xbf16>
    %cst_46 = arith.constant dense<0.000000e+00> : vector<8x320xf32>
    %84 = tpu.matmul %36, %83, %cst_46 {dimension_numbers = #tpu.dot_dimension_numbers<[1], [0], [0], [1], [0, 0, 1, 1], [], []>} : vector<8x72xbf16>, vector<72x320xbf16>, vector<8x320xf32> -> vector<8x320xf32>
    %85 = vector.broadcast %38 : vector<8x1xf32> to vector<8x320xf32>
    %86 = arith.addf %84, %85 : vector<8x320xf32>
    %cst_47 = arith.constant 0.000000e+00 : f32
    %87 = vector.broadcast %cst_47 : f32 to vector<8x320xf32>
    %88 = arith.maximumf %86, %87 : vector<8x320xf32>
    %c1 = arith.constant 1 : index
    %c0_48 = arith.constant 0 : index
    %c0_49 = arith.constant 0 : index
    %89 = vector.load %arg4[%c1, %c0_48, %c0_49] : memref<5x8x72xbf16, #tpu.memory_space<vmem>>, vector<1x8x72xbf16>
    %90 = vector.shape_cast %89 : vector<1x8x72xbf16> to vector<8x72xbf16>
    %c1_50 = arith.constant 1 : index
    %c0_51 = arith.constant 0 : index
    %c0_52 = arith.constant 0 : index
    %91 = vector.load %arg5[%c1_50, %c0_51, %c0_52] : memref<5x8x1xf32, #tpu.memory_space<vmem>>, vector<1x8x1xf32>
    %92 = vector.shape_cast %91 : vector<1x8x1xf32> to vector<8x1xf32>
    %93 = vector.extract_strided_slice %88 {offsets = [0, 0], sizes = [8, 256], strides = [1, 1]} : vector<8x320xf32> to vector<8x256xf32>
    %c0_53 = arith.constant 0 : index
    %c128_54 = arith.constant 128 : index
    %94 = vector.load %arg12[%c0_53, %c128_54] : memref<8x704xf32, #tpu.memory_space<vmem>>, vector<8x256xf32>
    tpu.vector_store %arg12[%c0_53, %c128_54], %93 {strides = array<i32>} : memref<8x704xf32, #tpu.memory_space<vmem>>, vector<8x256xf32>,
    %95 = vector.extract_strided_slice %88 {offsets = [0, 256], sizes = [8, 64], strides = [1, 1]} : vector<8x320xf32> to vector<8x64xf32>
    %c0_55 = arith.constant 0 : index
    %c512_56 = arith.constant 512 : index
    %96 = vector.load %arg12[%c0_55, %c512_56] : memref<8x704xf32, #tpu.memory_space<vmem>>, vector<8x64xf32>
    tpu.vector_store %arg12[%c0_55, %c512_56], %95 {strides = array<i32>} : memref<8x704xf32, #tpu.memory_space<vmem>>, vector<8x64xf32>,
    %c0_57 = arith.constant 0 : index
    %c111_58 = arith.constant 111 : index
    %97 = vector.load %arg12[%c0_57, %c111_58] : memref<8x704xf32, #tpu.memory_space<vmem>>, vector<8x256xf32>
    %c0_59 = arith.constant 0 : index
    %c503_60 = arith.constant 503 : index
    %98 = vector.load %arg12[%c0_59, %c503_60] : memref<8x704xf32, #tpu.memory_space<vmem>>, vector<8x64xf32>
    %99 = tpu.concatenate %97, %98 in 1 : vector<8x256xf32>, vector<8x64xf32> -> vector<8x320xf32>
    %100 = vector.broadcast %26 : vector<1x320xf32> to vector<8x320xf32>
    %101 = arith.mulf %99, %100 : vector<8x320xf32>
    %c0_61 = arith.constant 0 : index
    %c112_62 = arith.constant 112 : index
    %102 = vector.load %arg12[%c0_61, %c112_62] : memref<8x704xf32, #tpu.memory_space<vmem>>, vector<8x256xf32>
    %c0_63 = arith.constant 0 : index
    %c504_64 = arith.constant 504 : index
    %103 = vector.load %arg12[%c0_63, %c504_64] : memref<8x704xf32, #tpu.memory_space<vmem>>, vector<8x64xf32>
    %104 = tpu.concatenate %102, %103 in 1 : vector<8x256xf32>, vector<8x64xf32> -> vector<8x320xf32>
    %c0_65 = arith.constant 0 : index
    %c113_66 = arith.constant 113 : index
    %105 = vector.load %arg12[%c0_65, %c113_66] : memref<8x704xf32, #tpu.memory_space<vmem>>, vector<8x256xf32>
    %c0_67 = arith.constant 0 : index
    %c505_68 = arith.constant 505 : index
    %106 = vector.load %arg12[%c0_67, %c505_68] : memref<8x704xf32, #tpu.memory_space<vmem>>, vector<8x64xf32>
    %107 = tpu.concatenate %105, %106 in 1 : vector<8x256xf32>, vector<8x64xf32> -> vector<8x320xf32>
    %108 = vector.broadcast %27 : vector<1x320xf32> to vector<8x320xf32>
    %109 = arith.mulf %107, %108 : vector<8x320xf32>
    %c0_69 = arith.constant 0 : index
    %c127_70 = arith.constant 127 : index
    %110 = vector.load %arg12[%c0_69, %c127_70] : memref<8x704xf32, #tpu.memory_space<vmem>>, vector<8x256xf32>
    %c0_71 = arith.constant 0 : index
    %c511_72 = arith.constant 511 : index
    %111 = vector.load %arg12[%c0_71, %c511_72] : memref<8x704xf32, #tpu.memory_space<vmem>>, vector<8x64xf32>
    %112 = tpu.concatenate %110, %111 in 1 : vector<8x256xf32>, vector<8x64xf32> -> vector<8x320xf32>
    %113 = vector.broadcast %26 : vector<1x320xf32> to vector<8x320xf32>
    %114 = arith.mulf %112, %113 : vector<8x320xf32>
    %c0_73 = arith.constant 0 : index
    %c128_74 = arith.constant 128 : index
    %115 = vector.load %arg12[%c0_73, %c128_74] : memref<8x704xf32, #tpu.memory_space<vmem>>, vector<8x256xf32>
    %c0_75 = arith.constant 0 : index
    %c512_76 = arith.constant 512 : index
    %116 = vector.load %arg12[%c0_75, %c512_76] : memref<8x704xf32, #tpu.memory_space<vmem>>, vector<8x64xf32>
    %117 = tpu.concatenate %115, %116 in 1 : vector<8x256xf32>, vector<8x64xf32> -> vector<8x320xf32>
    %c0_77 = arith.constant 0 : index
    %c129_78 = arith.constant 129 : index
    %118 = vector.load %arg12[%c0_77, %c129_78] : memref<8x704xf32, #tpu.memory_space<vmem>>, vector<8x256xf32>
    %c0_79 = arith.constant 0 : index
    %c513_80 = arith.constant 513 : index
    %119 = vector.load %arg12[%c0_79, %c513_80] : memref<8x704xf32, #tpu.memory_space<vmem>>, vector<8x64xf32>
    %120 = tpu.concatenate %118, %119 in 1 : vector<8x256xf32>, vector<8x64xf32> -> vector<8x320xf32>
    %121 = vector.broadcast %27 : vector<1x320xf32> to vector<8x320xf32>
    %122 = arith.mulf %120, %121 : vector<8x320xf32>
    %c0_81 = arith.constant 0 : index
    %c143_82 = arith.constant 143 : index
    %123 = vector.load %arg12[%c0_81, %c143_82] : memref<8x704xf32, #tpu.memory_space<vmem>>, vector<8x256xf32>
    %c0_83 = arith.constant 0 : index
    %c519_84 = arith.constant 519 : index
    %124 = vector.load %arg12[%c0_83, %c519_84] : memref<8x704xf32, #tpu.memory_space<vmem>>, vector<8x64xf32>
    %125 = tpu.concatenate %123, %124 in 1 : vector<8x256xf32>, vector<8x64xf32> -> vector<8x320xf32>
    %126 = vector.broadcast %26 : vector<1x320xf32> to vector<8x320xf32>
    %127 = arith.mulf %125, %126 : vector<8x320xf32>
    %c0_85 = arith.constant 0 : index
    %c144_86 = arith.constant 144 : index
    %128 = vector.load %arg12[%c0_85, %c144_86] : memref<8x704xf32, #tpu.memory_space<vmem>>, vector<8x256xf32>
    %c0_87 = arith.constant 0 : index
    %c520_88 = arith.constant 520 : index
    %129 = vector.load %arg12[%c0_87, %c520_88] : memref<8x704xf32, #tpu.memory_space<vmem>>, vector<8x64xf32>
    %130 = tpu.concatenate %128, %129 in 1 : vector<8x256xf32>, vector<8x64xf32> -> vector<8x320xf32>
    %c0_89 = arith.constant 0 : index
    %c145_90 = arith.constant 145 : index
    %131 = vector.load %arg12[%c0_89, %c145_90] : memref<8x704xf32, #tpu.memory_space<vmem>>, vector<8x256xf32>
    %c0_91 = arith.constant 0 : index
    %c521_92 = arith.constant 521 : index
    %132 = vector.load %arg12[%c0_91, %c521_92] : memref<8x704xf32, #tpu.memory_space<vmem>>, vector<8x64xf32>
    %133 = tpu.concatenate %131, %132 in 1 : vector<8x256xf32>, vector<8x64xf32> -> vector<8x320xf32>
    %134 = vector.broadcast %27 : vector<1x320xf32> to vector<8x320xf32>
    %135 = arith.mulf %133, %134 : vector<8x320xf32>
    %136 = tpu.concatenate %101, %104, %109, %114, %117, %122, %127, %130, %135 in 0 : vector<8x320xf32>, vector<8x320xf32>, vector<8x320xf32>, vector<8x320xf32>, vector<8x320xf32>, vector<8x320xf32>, vector<8x320xf32>, vector<8x320xf32>, vector<8x320xf32> -> vector<72x320xf32>
    %137 = arith.truncf %136 : vector<72x320xf32> to vector<72x320xbf16>
    %cst_93 = arith.constant dense<0.000000e+00> : vector<8x320xf32>
    %138 = tpu.matmul %90, %137, %cst_93 {dimension_numbers = #tpu.dot_dimension_numbers<[1], [0], [0], [1], [0, 0, 1, 1], [], []>} : vector<8x72xbf16>, vector<72x320xbf16>, vector<8x320xf32> -> vector<8x320xf32>
    %139 = vector.broadcast %92 : vector<8x1xf32> to vector<8x320xf32>
    %140 = arith.addf %138, %139 : vector<8x320xf32>
    %cst_94 = arith.constant 0.000000e+00 : f32
    %141 = vector.broadcast %cst_94 : f32 to vector<8x320xf32>
    %142 = arith.maximumf %140, %141 : vector<8x320xf32>
    %c2 = arith.constant 2 : index
    %c0_95 = arith.constant 0 : index
    %c0_96 = arith.constant 0 : index
    %143 = vector.load %arg4[%c2, %c0_95, %c0_96] : memref<5x8x72xbf16, #tpu.memory_space<vmem>>, vector<1x8x72xbf16>
    %144 = vector.shape_cast %143 : vector<1x8x72xbf16> to vector<8x72xbf16>
    %c2_97 = arith.constant 2 : index
    %c0_98 = arith.constant 0 : index
    %c0_99 = arith.constant 0 : index
    %145 = vector.load %arg5[%c2_97, %c0_98, %c0_99] : memref<5x8x1xf32, #tpu.memory_space<vmem>>, vector<1x8x1xf32>
    %146 = vector.shape_cast %145 : vector<1x8x1xf32> to vector<8x1xf32>
    %147 = vector.extract_strided_slice %142 {offsets = [0, 0], sizes = [8, 256], strides = [1, 1]} : vector<8x320xf32> to vector<8x256xf32>
    %c0_100 = arith.constant 0 : index
    %c128_101 = arith.constant 128 : index
    %148 = vector.load %arg12[%c0_100, %c128_101] : memref<8x704xf32, #tpu.memory_space<vmem>>, vector<8x256xf32>
    tpu.vector_store %arg12[%c0_100, %c128_101], %147 {strides = array<i32>} : memref<8x704xf32, #tpu.memory_space<vmem>>, vector<8x256xf32>,
    %149 = vector.extract_strided_slice %142 {offsets = [0, 256], sizes = [8, 64], strides = [1, 1]} : vector<8x320xf32> to vector<8x64xf32>
    %c0_102 = arith.constant 0 : index
    %c512_103 = arith.constant 512 : index
    %150 = vector.load %arg12[%c0_102, %c512_103] : memref<8x704xf32, #tpu.memory_space<vmem>>, vector<8x64xf32>
    tpu.vector_store %arg12[%c0_102, %c512_103], %149 {strides = array<i32>} : memref<8x704xf32, #tpu.memory_space<vmem>>, vector<8x64xf32>,
    %c0_104 = arith.constant 0 : index
    %c111_105 = arith.constant 111 : index
    %151 = vector.load %arg12[%c0_104, %c111_105] : memref<8x704xf32, #tpu.memory_space<vmem>>, vector<8x256xf32>
    %c0_106 = arith.constant 0 : index
    %c503_107 = arith.constant 503 : index
    %152 = vector.load %arg12[%c0_106, %c503_107] : memref<8x704xf32, #tpu.memory_space<vmem>>, vector<8x64xf32>
    %153 = tpu.concatenate %151, %152 in 1 : vector<8x256xf32>, vector<8x64xf32> -> vector<8x320xf32>
    %154 = vector.broadcast %26 : vector<1x320xf32> to vector<8x320xf32>
    %155 = arith.mulf %153, %154 : vector<8x320xf32>
    %c0_108 = arith.constant 0 : index
    %c112_109 = arith.constant 112 : index
    %156 = vector.load %arg12[%c0_108, %c112_109] : memref<8x704xf32, #tpu.memory_space<vmem>>, vector<8x256xf32>
    %c0_110 = arith.constant 0 : index
    %c504_111 = arith.constant 504 : index
    %157 = vector.load %arg12[%c0_110, %c504_111] : memref<8x704xf32, #tpu.memory_space<vmem>>, vector<8x64xf32>
    %158 = tpu.concatenate %156, %157 in 1 : vector<8x256xf32>, vector<8x64xf32> -> vector<8x320xf32>
    %c0_112 = arith.constant 0 : index
    %c113_113 = arith.constant 113 : index
    %159 = vector.load %arg12[%c0_112, %c113_113] : memref<8x704xf32, #tpu.memory_space<vmem>>, vector<8x256xf32>
    %c0_114 = arith.constant 0 : index
    %c505_115 = arith.constant 505 : index
    %160 = vector.load %arg12[%c0_114, %c505_115] : memref<8x704xf32, #tpu.memory_space<vmem>>, vector<8x64xf32>
    %161 = tpu.concatenate %159, %160 in 1 : vector<8x256xf32>, vector<8x64xf32> -> vector<8x320xf32>
    %162 = vector.broadcast %27 : vector<1x320xf32> to vector<8x320xf32>
    %163 = arith.mulf %161, %162 : vector<8x320xf32>
    %c0_116 = arith.constant 0 : index
    %c127_117 = arith.constant 127 : index
    %164 = vector.load %arg12[%c0_116, %c127_117] : memref<8x704xf32, #tpu.memory_space<vmem>>, vector<8x256xf32>
    %c0_118 = arith.constant 0 : index
    %c511_119 = arith.constant 511 : index
    %165 = vector.load %arg12[%c0_118, %c511_119] : memref<8x704xf32, #tpu.memory_space<vmem>>, vector<8x64xf32>
    %166 = tpu.concatenate %164, %165 in 1 : vector<8x256xf32>, vector<8x64xf32> -> vector<8x320xf32>
    %167 = vector.broadcast %26 : vector<1x320xf32> to vector<8x320xf32>
    %168 = arith.mulf %166, %167 : vector<8x320xf32>
    %c0_120 = arith.constant 0 : index
    %c128_121 = arith.constant 128 : index
    %169 = vector.load %arg12[%c0_120, %c128_121] : memref<8x704xf32, #tpu.memory_space<vmem>>, vector<8x256xf32>
    %c0_122 = arith.constant 0 : index
    %c512_123 = arith.constant 512 : index
    %170 = vector.load %arg12[%c0_122, %c512_123] : memref<8x704xf32, #tpu.memory_space<vmem>>, vector<8x64xf32>
    %171 = tpu.concatenate %169, %170 in 1 : vector<8x256xf32>, vector<8x64xf32> -> vector<8x320xf32>
    %c0_124 = arith.constant 0 : index
    %c129_125 = arith.constant 129 : index
    %172 = vector.load %arg12[%c0_124, %c129_125] : memref<8x704xf32, #tpu.memory_space<vmem>>, vector<8x256xf32>
    %c0_126 = arith.constant 0 : index
    %c513_127 = arith.constant 513 : index
    %173 = vector.load %arg12[%c0_126, %c513_127] : memref<8x704xf32, #tpu.memory_space<vmem>>, vector<8x64xf32>
    %174 = tpu.concatenate %172, %173 in 1 : vector<8x256xf32>, vector<8x64xf32> -> vector<8x320xf32>
    %175 = vector.broadcast %27 : vector<1x320xf32> to vector<8x320xf32>
    %176 = arith.mulf %174, %175 : vector<8x320xf32>
    %c0_128 = arith.constant 0 : index
    %c143_129 = arith.constant 143 : index
    %177 = vector.load %arg12[%c0_128, %c143_129] : memref<8x704xf32, #tpu.memory_space<vmem>>, vector<8x256xf32>
    %c0_130 = arith.constant 0 : index
    %c519_131 = arith.constant 519 : index
    %178 = vector.load %arg12[%c0_130, %c519_131] : memref<8x704xf32, #tpu.memory_space<vmem>>, vector<8x64xf32>
    %179 = tpu.concatenate %177, %178 in 1 : vector<8x256xf32>, vector<8x64xf32> -> vector<8x320xf32>
    %180 = vector.broadcast %26 : vector<1x320xf32> to vector<8x320xf32>
    %181 = arith.mulf %179, %180 : vector<8x320xf32>
    %c0_132 = arith.constant 0 : index
    %c144_133 = arith.constant 144 : index
    %182 = vector.load %arg12[%c0_132, %c144_133] : memref<8x704xf32, #tpu.memory_space<vmem>>, vector<8x256xf32>
    %c0_134 = arith.constant 0 : index
    %c520_135 = arith.constant 520 : index
    %183 = vector.load %arg12[%c0_134, %c520_135] : memref<8x704xf32, #tpu.memory_space<vmem>>, vector<8x64xf32>
    %184 = tpu.concatenate %182, %183 in 1 : vector<8x256xf32>, vector<8x64xf32> -> vector<8x320xf32>
    %c0_136 = arith.constant 0 : index
    %c145_137 = arith.constant 145 : index
    %185 = vector.load %arg12[%c0_136, %c145_137] : memref<8x704xf32, #tpu.memory_space<vmem>>, vector<8x256xf32>
    %c0_138 = arith.constant 0 : index
    %c521_139 = arith.constant 521 : index
    %186 = vector.load %arg12[%c0_138, %c521_139] : memref<8x704xf32, #tpu.memory_space<vmem>>, vector<8x64xf32>
    %187 = tpu.concatenate %185, %186 in 1 : vector<8x256xf32>, vector<8x64xf32> -> vector<8x320xf32>
    %188 = vector.broadcast %27 : vector<1x320xf32> to vector<8x320xf32>
    %189 = arith.mulf %187, %188 : vector<8x320xf32>
    %190 = tpu.concatenate %155, %158, %163, %168, %171, %176, %181, %184, %189 in 0 : vector<8x320xf32>, vector<8x320xf32>, vector<8x320xf32>, vector<8x320xf32>, vector<8x320xf32>, vector<8x320xf32>, vector<8x320xf32>, vector<8x320xf32>, vector<8x320xf32> -> vector<72x320xf32>
    %191 = arith.truncf %190 : vector<72x320xf32> to vector<72x320xbf16>
    %cst_140 = arith.constant dense<0.000000e+00> : vector<8x320xf32>
    %192 = tpu.matmul %144, %191, %cst_140 {dimension_numbers = #tpu.dot_dimension_numbers<[1], [0], [0], [1], [0, 0, 1, 1], [], []>} : vector<8x72xbf16>, vector<72x320xbf16>, vector<8x320xf32> -> vector<8x320xf32>
    %193 = vector.broadcast %146 : vector<8x1xf32> to vector<8x320xf32>
    %194 = arith.addf %192, %193 : vector<8x320xf32>
    %cst_141 = arith.constant 0.000000e+00 : f32
    %195 = vector.broadcast %cst_141 : f32 to vector<8x320xf32>
    %196 = arith.maximumf %194, %195 : vector<8x320xf32>
    %c3 = arith.constant 3 : index
    %c0_142 = arith.constant 0 : index
    %c0_143 = arith.constant 0 : index
    %197 = vector.load %arg4[%c3, %c0_142, %c0_143] : memref<5x8x72xbf16, #tpu.memory_space<vmem>>, vector<1x8x72xbf16>
    %198 = vector.shape_cast %197 : vector<1x8x72xbf16> to vector<8x72xbf16>
    %c3_144 = arith.constant 3 : index
    %c0_145 = arith.constant 0 : index
    %c0_146 = arith.constant 0 : index
    %199 = vector.load %arg5[%c3_144, %c0_145, %c0_146] : memref<5x8x1xf32, #tpu.memory_space<vmem>>, vector<1x8x1xf32>
    %200 = vector.shape_cast %199 : vector<1x8x1xf32> to vector<8x1xf32>
    %201 = vector.extract_strided_slice %88 {offsets = [0, 0], sizes = [8, 256], strides = [1, 1]} : vector<8x320xf32> to vector<8x256xf32>
    %c0_147 = arith.constant 0 : index
    %c128_148 = arith.constant 128 : index
    %202 = vector.load %arg12[%c0_147, %c128_148] : memref<8x704xf32, #tpu.memory_space<vmem>>, vector<8x256xf32>
    tpu.vector_store %arg12[%c0_147, %c128_148], %201 {strides = array<i32>} : memref<8x704xf32, #tpu.memory_space<vmem>>, vector<8x256xf32>,
    %203 = vector.extract_strided_slice %88 {offsets = [0, 256], sizes = [8, 64], strides = [1, 1]} : vector<8x320xf32> to vector<8x64xf32>
    %c0_149 = arith.constant 0 : index
    %c512_150 = arith.constant 512 : index
    %204 = vector.load %arg12[%c0_149, %c512_150] : memref<8x704xf32, #tpu.memory_space<vmem>>, vector<8x64xf32>
    tpu.vector_store %arg12[%c0_149, %c512_150], %203 {strides = array<i32>} : memref<8x704xf32, #tpu.memory_space<vmem>>, vector<8x64xf32>,
    %c0_151 = arith.constant 0 : index
    %c111_152 = arith.constant 111 : index
    %205 = vector.load %arg12[%c0_151, %c111_152] : memref<8x704xf32, #tpu.memory_space<vmem>>, vector<8x256xf32>
    %c0_153 = arith.constant 0 : index
    %c503_154 = arith.constant 503 : index
    %206 = vector.load %arg12[%c0_153, %c503_154] : memref<8x704xf32, #tpu.memory_space<vmem>>, vector<8x64xf32>
    %207 = tpu.concatenate %205, %206 in 1 : vector<8x256xf32>, vector<8x64xf32> -> vector<8x320xf32>
    %208 = vector.broadcast %26 : vector<1x320xf32> to vector<8x320xf32>
    %209 = arith.mulf %207, %208 : vector<8x320xf32>
    %c0_155 = arith.constant 0 : index
    %c112_156 = arith.constant 112 : index
    %210 = vector.load %arg12[%c0_155, %c112_156] : memref<8x704xf32, #tpu.memory_space<vmem>>, vector<8x256xf32>
    %c0_157 = arith.constant 0 : index
    %c504_158 = arith.constant 504 : index
    %211 = vector.load %arg12[%c0_157, %c504_158] : memref<8x704xf32, #tpu.memory_space<vmem>>, vector<8x64xf32>
    %212 = tpu.concatenate %210, %211 in 1 : vector<8x256xf32>, vector<8x64xf32> -> vector<8x320xf32>
    %c0_159 = arith.constant 0 : index
    %c113_160 = arith.constant 113 : index
    %213 = vector.load %arg12[%c0_159, %c113_160] : memref<8x704xf32, #tpu.memory_space<vmem>>, vector<8x256xf32>
    %c0_161 = arith.constant 0 : index
    %c505_162 = arith.constant 505 : index
    %214 = vector.load %arg12[%c0_161, %c505_162] : memref<8x704xf32, #tpu.memory_space<vmem>>, vector<8x64xf32>
    %215 = tpu.concatenate %213, %214 in 1 : vector<8x256xf32>, vector<8x64xf32> -> vector<8x320xf32>
    %216 = vector.broadcast %27 : vector<1x320xf32> to vector<8x320xf32>
    %217 = arith.mulf %215, %216 : vector<8x320xf32>
    %c0_163 = arith.constant 0 : index
    %c127_164 = arith.constant 127 : index
    %218 = vector.load %arg12[%c0_163, %c127_164] : memref<8x704xf32, #tpu.memory_space<vmem>>, vector<8x256xf32>
    %c0_165 = arith.constant 0 : index
    %c511_166 = arith.constant 511 : index
    %219 = vector.load %arg12[%c0_165, %c511_166] : memref<8x704xf32, #tpu.memory_space<vmem>>, vector<8x64xf32>
    %220 = tpu.concatenate %218, %219 in 1 : vector<8x256xf32>, vector<8x64xf32> -> vector<8x320xf32>
    %221 = vector.broadcast %26 : vector<1x320xf32> to vector<8x320xf32>
    %222 = arith.mulf %220, %221 : vector<8x320xf32>
    %c0_167 = arith.constant 0 : index
    %c128_168 = arith.constant 128 : index
    %223 = vector.load %arg12[%c0_167, %c128_168] : memref<8x704xf32, #tpu.memory_space<vmem>>, vector<8x256xf32>
    %c0_169 = arith.constant 0 : index
    %c512_170 = arith.constant 512 : index
    %224 = vector.load %arg12[%c0_169, %c512_170] : memref<8x704xf32, #tpu.memory_space<vmem>>, vector<8x64xf32>
    %225 = tpu.concatenate %223, %224 in 1 : vector<8x256xf32>, vector<8x64xf32> -> vector<8x320xf32>
    %c0_171 = arith.constant 0 : index
    %c129_172 = arith.constant 129 : index
    %226 = vector.load %arg12[%c0_171, %c129_172] : memref<8x704xf32, #tpu.memory_space<vmem>>, vector<8x256xf32>
    %c0_173 = arith.constant 0 : index
    %c513_174 = arith.constant 513 : index
    %227 = vector.load %arg12[%c0_173, %c513_174] : memref<8x704xf32, #tpu.memory_space<vmem>>, vector<8x64xf32>
    %228 = tpu.concatenate %226, %227 in 1 : vector<8x256xf32>, vector<8x64xf32> -> vector<8x320xf32>
    %229 = vector.broadcast %27 : vector<1x320xf32> to vector<8x320xf32>
    %230 = arith.mulf %228, %229 : vector<8x320xf32>
    %c0_175 = arith.constant 0 : index
    %c143_176 = arith.constant 143 : index
    %231 = vector.load %arg12[%c0_175, %c143_176] : memref<8x704xf32, #tpu.memory_space<vmem>>, vector<8x256xf32>
    %c0_177 = arith.constant 0 : index
    %c519_178 = arith.constant 519 : index
    %232 = vector.load %arg12[%c0_177, %c519_178] : memref<8x704xf32, #tpu.memory_space<vmem>>, vector<8x64xf32>
    %233 = tpu.concatenate %231, %232 in 1 : vector<8x256xf32>, vector<8x64xf32> -> vector<8x320xf32>
    %234 = vector.broadcast %26 : vector<1x320xf32> to vector<8x320xf32>
    %235 = arith.mulf %233, %234 : vector<8x320xf32>
    %c0_179 = arith.constant 0 : index
    %c144_180 = arith.constant 144 : index
    %236 = vector.load %arg12[%c0_179, %c144_180] : memref<8x704xf32, #tpu.memory_space<vmem>>, vector<8x256xf32>
    %c0_181 = arith.constant 0 : index
    %c520_182 = arith.constant 520 : index
    %237 = vector.load %arg12[%c0_181, %c520_182] : memref<8x704xf32, #tpu.memory_space<vmem>>, vector<8x64xf32>
    %238 = tpu.concatenate %236, %237 in 1 : vector<8x256xf32>, vector<8x64xf32> -> vector<8x320xf32>
    %c0_183 = arith.constant 0 : index
    %c145_184 = arith.constant 145 : index
    %239 = vector.load %arg12[%c0_183, %c145_184] : memref<8x704xf32, #tpu.memory_space<vmem>>, vector<8x256xf32>
    %c0_185 = arith.constant 0 : index
    %c521_186 = arith.constant 521 : index
    %240 = vector.load %arg12[%c0_185, %c521_186] : memref<8x704xf32, #tpu.memory_space<vmem>>, vector<8x64xf32>
    %241 = tpu.concatenate %239, %240 in 1 : vector<8x256xf32>, vector<8x64xf32> -> vector<8x320xf32>
    %242 = vector.broadcast %27 : vector<1x320xf32> to vector<8x320xf32>
    %243 = arith.mulf %241, %242 : vector<8x320xf32>
    %244 = tpu.concatenate %209, %212, %217, %222, %225, %230, %235, %238, %243 in 0 : vector<8x320xf32>, vector<8x320xf32>, vector<8x320xf32>, vector<8x320xf32>, vector<8x320xf32>, vector<8x320xf32>, vector<8x320xf32>, vector<8x320xf32>, vector<8x320xf32> -> vector<72x320xf32>
    %245 = arith.truncf %244 : vector<72x320xf32> to vector<72x320xbf16>
    %cst_187 = arith.constant dense<0.000000e+00> : vector<8x320xf32>
    %246 = tpu.matmul %198, %245, %cst_187 {dimension_numbers = #tpu.dot_dimension_numbers<[1], [0], [0], [1], [0, 0, 1, 1], [], []>} : vector<8x72xbf16>, vector<72x320xbf16>, vector<8x320xf32> -> vector<8x320xf32>
    %247 = vector.broadcast %200 : vector<8x1xf32> to vector<8x320xf32>
    %248 = arith.addf %246, %247 : vector<8x320xf32>
    %cst_188 = arith.constant 0.000000e+00 : f32
    %249 = vector.broadcast %cst_188 : f32 to vector<8x320xf32>
    %250 = arith.maximumf %248, %249 : vector<8x320xf32>
    %c4 = arith.constant 4 : index
    %c0_189 = arith.constant 0 : index
    %c0_190 = arith.constant 0 : index
    %251 = vector.load %arg4[%c4, %c0_189, %c0_190] : memref<5x8x72xbf16, #tpu.memory_space<vmem>>, vector<1x8x72xbf16>
    %252 = vector.shape_cast %251 : vector<1x8x72xbf16> to vector<8x72xbf16>
    %c4_191 = arith.constant 4 : index
    %c0_192 = arith.constant 0 : index
    %c0_193 = arith.constant 0 : index
    %253 = vector.load %arg5[%c4_191, %c0_192, %c0_193] : memref<5x8x1xf32, #tpu.memory_space<vmem>>, vector<1x8x1xf32>
    %254 = vector.shape_cast %253 : vector<1x8x1xf32> to vector<8x1xf32>
    %255 = vector.extract_strided_slice %250 {offsets = [0, 0], sizes = [8, 256], strides = [1, 1]} : vector<8x320xf32> to vector<8x256xf32>
    %c0_194 = arith.constant 0 : index
    %c128_195 = arith.constant 128 : index
    %256 = vector.load %arg12[%c0_194, %c128_195] : memref<8x704xf32, #tpu.memory_space<vmem>>, vector<8x256xf32>
    tpu.vector_store %arg12[%c0_194, %c128_195], %255 {strides = array<i32>} : memref<8x704xf32, #tpu.memory_space<vmem>>, vector<8x256xf32>,
    %257 = vector.extract_strided_slice %250 {offsets = [0, 256], sizes = [8, 64], strides = [1, 1]} : vector<8x320xf32> to vector<8x64xf32>
    %c0_196 = arith.constant 0 : index
    %c512_197 = arith.constant 512 : index
    %258 = vector.load %arg12[%c0_196, %c512_197] : memref<8x704xf32, #tpu.memory_space<vmem>>, vector<8x64xf32>
    tpu.vector_store %arg12[%c0_196, %c512_197], %257 {strides = array<i32>} : memref<8x704xf32, #tpu.memory_space<vmem>>, vector<8x64xf32>,
    %c0_198 = arith.constant 0 : index
    %c111_199 = arith.constant 111 : index
    %259 = vector.load %arg12[%c0_198, %c111_199] : memref<8x704xf32, #tpu.memory_space<vmem>>, vector<8x256xf32>
    %c0_200 = arith.constant 0 : index
    %c503_201 = arith.constant 503 : index
    %260 = vector.load %arg12[%c0_200, %c503_201] : memref<8x704xf32, #tpu.memory_space<vmem>>, vector<8x64xf32>
    %261 = tpu.concatenate %259, %260 in 1 : vector<8x256xf32>, vector<8x64xf32> -> vector<8x320xf32>
    %262 = vector.broadcast %26 : vector<1x320xf32> to vector<8x320xf32>
    %263 = arith.mulf %261, %262 : vector<8x320xf32>
    %c0_202 = arith.constant 0 : index
    %c112_203 = arith.constant 112 : index
    %264 = vector.load %arg12[%c0_202, %c112_203] : memref<8x704xf32, #tpu.memory_space<vmem>>, vector<8x256xf32>
    %c0_204 = arith.constant 0 : index
    %c504_205 = arith.constant 504 : index
    %265 = vector.load %arg12[%c0_204, %c504_205] : memref<8x704xf32, #tpu.memory_space<vmem>>, vector<8x64xf32>
    %266 = tpu.concatenate %264, %265 in 1 : vector<8x256xf32>, vector<8x64xf32> -> vector<8x320xf32>
    %c0_206 = arith.constant 0 : index
    %c113_207 = arith.constant 113 : index
    %267 = vector.load %arg12[%c0_206, %c113_207] : memref<8x704xf32, #tpu.memory_space<vmem>>, vector<8x256xf32>
    %c0_208 = arith.constant 0 : index
    %c505_209 = arith.constant 505 : index
    %268 = vector.load %arg12[%c0_208, %c505_209] : memref<8x704xf32, #tpu.memory_space<vmem>>, vector<8x64xf32>
    %269 = tpu.concatenate %267, %268 in 1 : vector<8x256xf32>, vector<8x64xf32> -> vector<8x320xf32>
    %270 = vector.broadcast %27 : vector<1x320xf32> to vector<8x320xf32>
    %271 = arith.mulf %269, %270 : vector<8x320xf32>
    %c0_210 = arith.constant 0 : index
    %c127_211 = arith.constant 127 : index
    %272 = vector.load %arg12[%c0_210, %c127_211] : memref<8x704xf32, #tpu.memory_space<vmem>>, vector<8x256xf32>
    %c0_212 = arith.constant 0 : index
    %c511_213 = arith.constant 511 : index
    %273 = vector.load %arg12[%c0_212, %c511_213] : memref<8x704xf32, #tpu.memory_space<vmem>>, vector<8x64xf32>
    %274 = tpu.concatenate %272, %273 in 1 : vector<8x256xf32>, vector<8x64xf32> -> vector<8x320xf32>
    %275 = vector.broadcast %26 : vector<1x320xf32> to vector<8x320xf32>
    %276 = arith.mulf %274, %275 : vector<8x320xf32>
    %c0_214 = arith.constant 0 : index
    %c128_215 = arith.constant 128 : index
    %277 = vector.load %arg12[%c0_214, %c128_215] : memref<8x704xf32, #tpu.memory_space<vmem>>, vector<8x256xf32>
    %c0_216 = arith.constant 0 : index
    %c512_217 = arith.constant 512 : index
    %278 = vector.load %arg12[%c0_216, %c512_217] : memref<8x704xf32, #tpu.memory_space<vmem>>, vector<8x64xf32>
    %279 = tpu.concatenate %277, %278 in 1 : vector<8x256xf32>, vector<8x64xf32> -> vector<8x320xf32>
    %c0_218 = arith.constant 0 : index
    %c129_219 = arith.constant 129 : index
    %280 = vector.load %arg12[%c0_218, %c129_219] : memref<8x704xf32, #tpu.memory_space<vmem>>, vector<8x256xf32>
    %c0_220 = arith.constant 0 : index
    %c513_221 = arith.constant 513 : index
    %281 = vector.load %arg12[%c0_220, %c513_221] : memref<8x704xf32, #tpu.memory_space<vmem>>, vector<8x64xf32>
    %282 = tpu.concatenate %280, %281 in 1 : vector<8x256xf32>, vector<8x64xf32> -> vector<8x320xf32>
    %283 = vector.broadcast %27 : vector<1x320xf32> to vector<8x320xf32>
    %284 = arith.mulf %282, %283 : vector<8x320xf32>
    %c0_222 = arith.constant 0 : index
    %c143_223 = arith.constant 143 : index
    %285 = vector.load %arg12[%c0_222, %c143_223] : memref<8x704xf32, #tpu.memory_space<vmem>>, vector<8x256xf32>
    %c0_224 = arith.constant 0 : index
    %c519_225 = arith.constant 519 : index
    %286 = vector.load %arg12[%c0_224, %c519_225] : memref<8x704xf32, #tpu.memory_space<vmem>>, vector<8x64xf32>
    %287 = tpu.concatenate %285, %286 in 1 : vector<8x256xf32>, vector<8x64xf32> -> vector<8x320xf32>
    %288 = vector.broadcast %26 : vector<1x320xf32> to vector<8x320xf32>
    %289 = arith.mulf %287, %288 : vector<8x320xf32>
    %c0_226 = arith.constant 0 : index
    %c144_227 = arith.constant 144 : index
    %290 = vector.load %arg12[%c0_226, %c144_227] : memref<8x704xf32, #tpu.memory_space<vmem>>, vector<8x256xf32>
    %c0_228 = arith.constant 0 : index
    %c520_229 = arith.constant 520 : index
    %291 = vector.load %arg12[%c0_228, %c520_229] : memref<8x704xf32, #tpu.memory_space<vmem>>, vector<8x64xf32>
    %292 = tpu.concatenate %290, %291 in 1 : vector<8x256xf32>, vector<8x64xf32> -> vector<8x320xf32>
    %c0_230 = arith.constant 0 : index
    %c145_231 = arith.constant 145 : index
    %293 = vector.load %arg12[%c0_230, %c145_231] : memref<8x704xf32, #tpu.memory_space<vmem>>, vector<8x256xf32>
    %c0_232 = arith.constant 0 : index
    %c521_233 = arith.constant 521 : index
    %294 = vector.load %arg12[%c0_232, %c521_233] : memref<8x704xf32, #tpu.memory_space<vmem>>, vector<8x64xf32>
    %295 = tpu.concatenate %293, %294 in 1 : vector<8x256xf32>, vector<8x64xf32> -> vector<8x320xf32>
    %296 = vector.broadcast %27 : vector<1x320xf32> to vector<8x320xf32>
    %297 = arith.mulf %295, %296 : vector<8x320xf32>
    %298 = tpu.concatenate %263, %266, %271, %276, %279, %284, %289, %292, %297 in 0 : vector<8x320xf32>, vector<8x320xf32>, vector<8x320xf32>, vector<8x320xf32>, vector<8x320xf32>, vector<8x320xf32>, vector<8x320xf32>, vector<8x320xf32>, vector<8x320xf32> -> vector<72x320xf32>
    %299 = arith.truncf %298 : vector<72x320xf32> to vector<72x320xbf16>
    %cst_234 = arith.constant dense<0.000000e+00> : vector<8x320xf32>
    %300 = tpu.matmul %252, %299, %cst_234 {dimension_numbers = #tpu.dot_dimension_numbers<[1], [0], [0], [1], [0, 0, 1, 1], [], []>} : vector<8x72xbf16>, vector<72x320xbf16>, vector<8x320xf32> -> vector<8x320xf32>
    %301 = vector.broadcast %254 : vector<8x1xf32> to vector<8x320xf32>
    %302 = arith.addf %300, %301 : vector<8x320xf32>
    %cst_235 = arith.constant 0.000000e+00 : f32
    %303 = vector.broadcast %cst_235 : f32 to vector<8x320xf32>
    %304 = arith.maximumf %302, %303 : vector<8x320xf32>
    %c0_236 = arith.constant 0 : index
    %c0_237 = arith.constant 0 : index
    %305 = vector.load %arg6[%c0_236, %c0_237] : memref<8x72xbf16, #tpu.memory_space<vmem>>, vector<8x72xbf16>
    %c0_238 = arith.constant 0 : index
    %c0_239 = arith.constant 0 : index
    %306 = vector.load %arg7[%c0_238, %c0_239] : memref<8x1xf32, #tpu.memory_space<vmem>>, vector<8x1xf32>
    %307 = vector.extract_strided_slice %196 {offsets = [0, 0], sizes = [8, 256], strides = [1, 1]} : vector<8x320xf32> to vector<8x256xf32>
    %c0_240 = arith.constant 0 : index
    %c128_241 = arith.constant 128 : index
    %308 = vector.load %arg12[%c0_240, %c128_241] : memref<8x704xf32, #tpu.memory_space<vmem>>, vector<8x256xf32>
    tpu.vector_store %arg12[%c0_240, %c128_241], %307 {strides = array<i32>} : memref<8x704xf32, #tpu.memory_space<vmem>>, vector<8x256xf32>,
    %309 = vector.extract_strided_slice %196 {offsets = [0, 256], sizes = [8, 64], strides = [1, 1]} : vector<8x320xf32> to vector<8x64xf32>
    %c0_242 = arith.constant 0 : index
    %c512_243 = arith.constant 512 : index
    %310 = vector.load %arg12[%c0_242, %c512_243] : memref<8x704xf32, #tpu.memory_space<vmem>>, vector<8x64xf32>
    tpu.vector_store %arg12[%c0_242, %c512_243], %309 {strides = array<i32>} : memref<8x704xf32, #tpu.memory_space<vmem>>, vector<8x64xf32>,
    %c0_244 = arith.constant 0 : index
    %c111_245 = arith.constant 111 : index
    %311 = vector.load %arg12[%c0_244, %c111_245] : memref<8x704xf32, #tpu.memory_space<vmem>>, vector<8x256xf32>
    %c0_246 = arith.constant 0 : index
    %c503_247 = arith.constant 503 : index
    %312 = vector.load %arg12[%c0_246, %c503_247] : memref<8x704xf32, #tpu.memory_space<vmem>>, vector<8x64xf32>
    %313 = tpu.concatenate %311, %312 in 1 : vector<8x256xf32>, vector<8x64xf32> -> vector<8x320xf32>
    %314 = vector.broadcast %26 : vector<1x320xf32> to vector<8x320xf32>
    %315 = arith.mulf %313, %314 : vector<8x320xf32>
    %c0_248 = arith.constant 0 : index
    %c112_249 = arith.constant 112 : index
    %316 = vector.load %arg12[%c0_248, %c112_249] : memref<8x704xf32, #tpu.memory_space<vmem>>, vector<8x256xf32>
    %c0_250 = arith.constant 0 : index
    %c504_251 = arith.constant 504 : index
    %317 = vector.load %arg12[%c0_250, %c504_251] : memref<8x704xf32, #tpu.memory_space<vmem>>, vector<8x64xf32>
    %318 = tpu.concatenate %316, %317 in 1 : vector<8x256xf32>, vector<8x64xf32> -> vector<8x320xf32>
    %c0_252 = arith.constant 0 : index
    %c113_253 = arith.constant 113 : index
    %319 = vector.load %arg12[%c0_252, %c113_253] : memref<8x704xf32, #tpu.memory_space<vmem>>, vector<8x256xf32>
    %c0_254 = arith.constant 0 : index
    %c505_255 = arith.constant 505 : index
    %320 = vector.load %arg12[%c0_254, %c505_255] : memref<8x704xf32, #tpu.memory_space<vmem>>, vector<8x64xf32>
    %321 = tpu.concatenate %319, %320 in 1 : vector<8x256xf32>, vector<8x64xf32> -> vector<8x320xf32>
    %322 = vector.broadcast %27 : vector<1x320xf32> to vector<8x320xf32>
    %323 = arith.mulf %321, %322 : vector<8x320xf32>
    %c0_256 = arith.constant 0 : index
    %c127_257 = arith.constant 127 : index
    %324 = vector.load %arg12[%c0_256, %c127_257] : memref<8x704xf32, #tpu.memory_space<vmem>>, vector<8x256xf32>
    %c0_258 = arith.constant 0 : index
    %c511_259 = arith.constant 511 : index
    %325 = vector.load %arg12[%c0_258, %c511_259] : memref<8x704xf32, #tpu.memory_space<vmem>>, vector<8x64xf32>
    %326 = tpu.concatenate %324, %325 in 1 : vector<8x256xf32>, vector<8x64xf32> -> vector<8x320xf32>
    %327 = vector.broadcast %26 : vector<1x320xf32> to vector<8x320xf32>
    %328 = arith.mulf %326, %327 : vector<8x320xf32>
    %c0_260 = arith.constant 0 : index
    %c128_261 = arith.constant 128 : index
    %329 = vector.load %arg12[%c0_260, %c128_261] : memref<8x704xf32, #tpu.memory_space<vmem>>, vector<8x256xf32>
    %c0_262 = arith.constant 0 : index
    %c512_263 = arith.constant 512 : index
    %330 = vector.load %arg12[%c0_262, %c512_263] : memref<8x704xf32, #tpu.memory_space<vmem>>, vector<8x64xf32>
    %331 = tpu.concatenate %329, %330 in 1 : vector<8x256xf32>, vector<8x64xf32> -> vector<8x320xf32>
    %c0_264 = arith.constant 0 : index
    %c129_265 = arith.constant 129 : index
    %332 = vector.load %arg12[%c0_264, %c129_265] : memref<8x704xf32, #tpu.memory_space<vmem>>, vector<8x256xf32>
    %c0_266 = arith.constant 0 : index
    %c513_267 = arith.constant 513 : index
    %333 = vector.load %arg12[%c0_266, %c513_267] : memref<8x704xf32, #tpu.memory_space<vmem>>, vector<8x64xf32>
    %334 = tpu.concatenate %332, %333 in 1 : vector<8x256xf32>, vector<8x64xf32> -> vector<8x320xf32>
    %335 = vector.broadcast %27 : vector<1x320xf32> to vector<8x320xf32>
    %336 = arith.mulf %334, %335 : vector<8x320xf32>
    %c0_268 = arith.constant 0 : index
    %c143_269 = arith.constant 143 : index
    %337 = vector.load %arg12[%c0_268, %c143_269] : memref<8x704xf32, #tpu.memory_space<vmem>>, vector<8x256xf32>
    %c0_270 = arith.constant 0 : index
    %c519_271 = arith.constant 519 : index
    %338 = vector.load %arg12[%c0_270, %c519_271] : memref<8x704xf32, #tpu.memory_space<vmem>>, vector<8x64xf32>
    %339 = tpu.concatenate %337, %338 in 1 : vector<8x256xf32>, vector<8x64xf32> -> vector<8x320xf32>
    %340 = vector.broadcast %26 : vector<1x320xf32> to vector<8x320xf32>
    %341 = arith.mulf %339, %340 : vector<8x320xf32>
    %c0_272 = arith.constant 0 : index
    %c144_273 = arith.constant 144 : index
    %342 = vector.load %arg12[%c0_272, %c144_273] : memref<8x704xf32, #tpu.memory_space<vmem>>, vector<8x256xf32>
    %c0_274 = arith.constant 0 : index
    %c520_275 = arith.constant 520 : index
    %343 = vector.load %arg12[%c0_274, %c520_275] : memref<8x704xf32, #tpu.memory_space<vmem>>, vector<8x64xf32>
    %344 = tpu.concatenate %342, %343 in 1 : vector<8x256xf32>, vector<8x64xf32> -> vector<8x320xf32>
    %c0_276 = arith.constant 0 : index
    %c145_277 = arith.constant 145 : index
    %345 = vector.load %arg12[%c0_276, %c145_277] : memref<8x704xf32, #tpu.memory_space<vmem>>, vector<8x256xf32>
    %c0_278 = arith.constant 0 : index
    %c521_279 = arith.constant 521 : index
    %346 = vector.load %arg12[%c0_278, %c521_279] : memref<8x704xf32, #tpu.memory_space<vmem>>, vector<8x64xf32>
    %347 = tpu.concatenate %345, %346 in 1 : vector<8x256xf32>, vector<8x64xf32> -> vector<8x320xf32>
    %348 = vector.broadcast %27 : vector<1x320xf32> to vector<8x320xf32>
    %349 = arith.mulf %347, %348 : vector<8x320xf32>
    %350 = tpu.concatenate %315, %318, %323, %328, %331, %336, %341, %344, %349 in 0 : vector<8x320xf32>, vector<8x320xf32>, vector<8x320xf32>, vector<8x320xf32>, vector<8x320xf32>, vector<8x320xf32>, vector<8x320xf32>, vector<8x320xf32>, vector<8x320xf32> -> vector<72x320xf32>
    %351 = arith.truncf %350 : vector<72x320xf32> to vector<72x320xbf16>
    %cst_280 = arith.constant dense<0.000000e+00> : vector<8x320xf32>
    %352 = tpu.matmul %305, %351, %cst_280 {dimension_numbers = #tpu.dot_dimension_numbers<[1], [0], [0], [1], [0, 0, 1, 1], [], []>} : vector<8x72xbf16>, vector<72x320xbf16>, vector<8x320xf32> -> vector<8x320xf32>
    %353 = vector.broadcast %306 : vector<8x1xf32> to vector<8x320xf32>
    %354 = arith.addf %352, %353 : vector<8x320xf32>
    %c0_281 = arith.constant 0 : index
    %c0_282 = arith.constant 0 : index
    %c0_283 = arith.constant 0 : index
    %355 = vector.load %arg10[%c0_281, %c0_282, %c0_283] : memref<1x8x320xf32, #tpu.memory_space<vmem>>, vector<1x8x320xf32>
    %356 = vector.shape_cast %355 : vector<1x8x320xf32> to vector<8x320xf32>
    %357 = vector.shape_cast %354 : vector<8x320xf32> to vector<1x8x320xf32>
    tpu.vector_store %arg10[%c0_281, %c0_282, %c0_283], %357 {strides = array<i32>} : memref<1x8x320xf32, #tpu.memory_space<vmem>>, vector<1x8x320xf32>,
    %c0_284 = arith.constant 0 : index
    %c0_285 = arith.constant 0 : index
    %358 = vector.load %arg8[%c0_284, %c0_285] : memref<5x72xbf16, #tpu.memory_space<vmem>>, vector<5x72xbf16>
    %c0_286 = arith.constant 0 : index
    %c0_287 = arith.constant 0 : index
    %359 = vector.load %arg9[%c0_286, %c0_287] : memref<5x1xf32, #tpu.memory_space<vmem>>, vector<5x1xf32>
    %360 = vector.extract_strided_slice %304 {offsets = [0, 0], sizes = [8, 256], strides = [1, 1]} : vector<8x320xf32> to vector<8x256xf32>
    %c0_288 = arith.constant 0 : index
    %c128_289 = arith.constant 128 : index
    %361 = vector.load %arg12[%c0_288, %c128_289] : memref<8x704xf32, #tpu.memory_space<vmem>>, vector<8x256xf32>
    tpu.vector_store %arg12[%c0_288, %c128_289], %360 {strides = array<i32>} : memref<8x704xf32, #tpu.memory_space<vmem>>, vector<8x256xf32>,
    %362 = vector.extract_strided_slice %304 {offsets = [0, 256], sizes = [8, 64], strides = [1, 1]} : vector<8x320xf32> to vector<8x64xf32>
    %c0_290 = arith.constant 0 : index
    %c512_291 = arith.constant 512 : index
    %363 = vector.load %arg12[%c0_290, %c512_291] : memref<8x704xf32, #tpu.memory_space<vmem>>, vector<8x64xf32>
    tpu.vector_store %arg12[%c0_290, %c512_291], %362 {strides = array<i32>} : memref<8x704xf32, #tpu.memory_space<vmem>>, vector<8x64xf32>,
    %c0_292 = arith.constant 0 : index
    %c111_293 = arith.constant 111 : index
    %364 = vector.load %arg12[%c0_292, %c111_293] : memref<8x704xf32, #tpu.memory_space<vmem>>, vector<8x256xf32>
    %c0_294 = arith.constant 0 : index
    %c503_295 = arith.constant 503 : index
    %365 = vector.load %arg12[%c0_294, %c503_295] : memref<8x704xf32, #tpu.memory_space<vmem>>, vector<8x64xf32>
    %366 = tpu.concatenate %364, %365 in 1 : vector<8x256xf32>, vector<8x64xf32> -> vector<8x320xf32>
    %367 = vector.broadcast %26 : vector<1x320xf32> to vector<8x320xf32>
    %368 = arith.mulf %366, %367 : vector<8x320xf32>
    %c0_296 = arith.constant 0 : index
    %c112_297 = arith.constant 112 : index
    %369 = vector.load %arg12[%c0_296, %c112_297] : memref<8x704xf32, #tpu.memory_space<vmem>>, vector<8x256xf32>
    %c0_298 = arith.constant 0 : index
    %c504_299 = arith.constant 504 : index
    %370 = vector.load %arg12[%c0_298, %c504_299] : memref<8x704xf32, #tpu.memory_space<vmem>>, vector<8x64xf32>
    %371 = tpu.concatenate %369, %370 in 1 : vector<8x256xf32>, vector<8x64xf32> -> vector<8x320xf32>
    %c0_300 = arith.constant 0 : index
    %c113_301 = arith.constant 113 : index
    %372 = vector.load %arg12[%c0_300, %c113_301] : memref<8x704xf32, #tpu.memory_space<vmem>>, vector<8x256xf32>
    %c0_302 = arith.constant 0 : index
    %c505_303 = arith.constant 505 : index
    %373 = vector.load %arg12[%c0_302, %c505_303] : memref<8x704xf32, #tpu.memory_space<vmem>>, vector<8x64xf32>
    %374 = tpu.concatenate %372, %373 in 1 : vector<8x256xf32>, vector<8x64xf32> -> vector<8x320xf32>
    %375 = vector.broadcast %27 : vector<1x320xf32> to vector<8x320xf32>
    %376 = arith.mulf %374, %375 : vector<8x320xf32>
    %c0_304 = arith.constant 0 : index
    %c127_305 = arith.constant 127 : index
    %377 = vector.load %arg12[%c0_304, %c127_305] : memref<8x704xf32, #tpu.memory_space<vmem>>, vector<8x256xf32>
    %c0_306 = arith.constant 0 : index
    %c511_307 = arith.constant 511 : index
    %378 = vector.load %arg12[%c0_306, %c511_307] : memref<8x704xf32, #tpu.memory_space<vmem>>, vector<8x64xf32>
    %379 = tpu.concatenate %377, %378 in 1 : vector<8x256xf32>, vector<8x64xf32> -> vector<8x320xf32>
    %380 = vector.broadcast %26 : vector<1x320xf32> to vector<8x320xf32>
    %381 = arith.mulf %379, %380 : vector<8x320xf32>
    %c0_308 = arith.constant 0 : index
    %c128_309 = arith.constant 128 : index
    %382 = vector.load %arg12[%c0_308, %c128_309] : memref<8x704xf32, #tpu.memory_space<vmem>>, vector<8x256xf32>
    %c0_310 = arith.constant 0 : index
    %c512_311 = arith.constant 512 : index
    %383 = vector.load %arg12[%c0_310, %c512_311] : memref<8x704xf32, #tpu.memory_space<vmem>>, vector<8x64xf32>
    %384 = tpu.concatenate %382, %383 in 1 : vector<8x256xf32>, vector<8x64xf32> -> vector<8x320xf32>
    %c0_312 = arith.constant 0 : index
    %c129_313 = arith.constant 129 : index
    %385 = vector.load %arg12[%c0_312, %c129_313] : memref<8x704xf32, #tpu.memory_space<vmem>>, vector<8x256xf32>
    %c0_314 = arith.constant 0 : index
    %c513_315 = arith.constant 513 : index
    %386 = vector.load %arg12[%c0_314, %c513_315] : memref<8x704xf32, #tpu.memory_space<vmem>>, vector<8x64xf32>
    %387 = tpu.concatenate %385, %386 in 1 : vector<8x256xf32>, vector<8x64xf32> -> vector<8x320xf32>
    %388 = vector.broadcast %27 : vector<1x320xf32> to vector<8x320xf32>
    %389 = arith.mulf %387, %388 : vector<8x320xf32>
    %c0_316 = arith.constant 0 : index
    %c143_317 = arith.constant 143 : index
    %390 = vector.load %arg12[%c0_316, %c143_317] : memref<8x704xf32, #tpu.memory_space<vmem>>, vector<8x256xf32>
    %c0_318 = arith.constant 0 : index
    %c519_319 = arith.constant 519 : index
    %391 = vector.load %arg12[%c0_318, %c519_319] : memref<8x704xf32, #tpu.memory_space<vmem>>, vector<8x64xf32>
    %392 = tpu.concatenate %390, %391 in 1 : vector<8x256xf32>, vector<8x64xf32> -> vector<8x320xf32>
    %393 = vector.broadcast %26 : vector<1x320xf32> to vector<8x320xf32>
    %394 = arith.mulf %392, %393 : vector<8x320xf32>
    %c0_320 = arith.constant 0 : index
    %c144_321 = arith.constant 144 : index
    %395 = vector.load %arg12[%c0_320, %c144_321] : memref<8x704xf32, #tpu.memory_space<vmem>>, vector<8x256xf32>
    %c0_322 = arith.constant 0 : index
    %c520_323 = arith.constant 520 : index
    %396 = vector.load %arg12[%c0_322, %c520_323] : memref<8x704xf32, #tpu.memory_space<vmem>>, vector<8x64xf32>
    %397 = tpu.concatenate %395, %396 in 1 : vector<8x256xf32>, vector<8x64xf32> -> vector<8x320xf32>
    %c0_324 = arith.constant 0 : index
    %c145_325 = arith.constant 145 : index
    %398 = vector.load %arg12[%c0_324, %c145_325] : memref<8x704xf32, #tpu.memory_space<vmem>>, vector<8x256xf32>
    %c0_326 = arith.constant 0 : index
    %c521_327 = arith.constant 521 : index
    %399 = vector.load %arg12[%c0_326, %c521_327] : memref<8x704xf32, #tpu.memory_space<vmem>>, vector<8x64xf32>
    %400 = tpu.concatenate %398, %399 in 1 : vector<8x256xf32>, vector<8x64xf32> -> vector<8x320xf32>
    %401 = vector.broadcast %27 : vector<1x320xf32> to vector<8x320xf32>
    %402 = arith.mulf %400, %401 : vector<8x320xf32>
    %403 = tpu.concatenate %368, %371, %376, %381, %384, %389, %394, %397, %402 in 0 : vector<8x320xf32>, vector<8x320xf32>, vector<8x320xf32>, vector<8x320xf32>, vector<8x320xf32>, vector<8x320xf32>, vector<8x320xf32>, vector<8x320xf32>, vector<8x320xf32> -> vector<72x320xf32>
    %404 = arith.truncf %403 : vector<72x320xf32> to vector<72x320xbf16>
    %cst_328 = arith.constant dense<0.000000e+00> : vector<5x320xf32>
    %405 = tpu.matmul %358, %404, %cst_328 {dimension_numbers = #tpu.dot_dimension_numbers<[1], [0], [0], [1], [0, 0, 1, 1], [], []>} : vector<5x72xbf16>, vector<72x320xbf16>, vector<5x320xf32> -> vector<5x320xf32>
    %406 = vector.broadcast %359 : vector<5x1xf32> to vector<5x320xf32>
    %407 = arith.addf %405, %406 : vector<5x320xf32>
    %408 = vector.extract_strided_slice %407 {offsets = [0, 0], sizes = [4, 320], strides = [1, 1]} : vector<5x320xf32> to vector<4x320xf32>
    %c0_329 = arith.constant 0 : index
    %c0_330 = arith.constant 0 : index
    %409 = vector.load %arg3[%c0_329, %c0_330] : memref<1x320xf32, #tpu.memory_space<vmem>>, vector<1x320xf32>
    %410 = vector.broadcast %409 : vector<1x320xf32> to vector<4x320xf32>
    %411 = arith.mulf %408, %410 : vector<4x320xf32>
    %cst_331 = arith.constant 0.000000e+00 : f32
    %412 = vector.broadcast %cst_331 : f32 to vector<4x320xf32>
    %413 = arith.maximumf %411, %412 : vector<4x320xf32>
    %414 = vector.extract_strided_slice %407 {offsets = [4, 0], sizes = [1, 320], strides = [1, 1]} : vector<5x320xf32> to vector<1x320xf32>
    %415 = tpu.concatenate %413, %414 in 0 : vector<4x320xf32>, vector<1x320xf32> -> vector<5x320xf32>
    %c0_332 = arith.constant 0 : index
    %c0_333 = arith.constant 0 : index
    %c0_334 = arith.constant 0 : index
    %416 = vector.load %arg11[%c0_332, %c0_333, %c0_334] : memref<1x5x320xf32, #tpu.memory_space<vmem>>, vector<1x5x320xf32>
    %417 = vector.shape_cast %416 : vector<1x5x320xf32> to vector<5x320xf32>
    %418 = vector.shape_cast %415 : vector<5x320xf32> to vector<1x5x320xf32>
    tpu.vector_store %arg11[%c0_332, %c0_333, %c0_334], %418 {strides = array<i32>} : memref<1x5x320xf32, #tpu.memory_space<vmem>>, vector<1x5x320xf32>,
    return
  }
  func.func @transform_0(%arg0: i32) -> (i32, i32, i32) {
    %c0_i32 = arith.constant 0 : i32
    %c0_i32_0 = arith.constant 0 : i32
    %c0_i32_1 = arith.constant 0 : i32
    return %arg0, %c0_i32, %c0_i32_0 : i32, i32, i32
  }
  func.func @transform_1(%arg0: i32) -> (i32, i32, i32) {
    %c0_i32 = arith.constant 0 : i32
    %c0_i32_0 = arith.constant 0 : i32
    %c0_i32_1 = arith.constant 0 : i32
    return %arg0, %c0_i32, %c0_i32_0 : i32, i32, i32
  }
  func.func @transform_2(%arg0: i32) -> (i32, i32) {
    %c0_i32 = arith.constant 0 : i32
    %c0_i32_0 = arith.constant 0 : i32
    %c0_i32_1 = arith.constant 0 : i32
    return %c0_i32, %c0_i32_0 : i32, i32
  }
  func.func @transform_3(%arg0: i32) -> (i32, i32, i32) {
    %c0_i32 = arith.constant 0 : i32
    %c0_i32_0 = arith.constant 0 : i32
    %c0_i32_1 = arith.constant 0 : i32
    %c0_i32_2 = arith.constant 0 : i32
    return %c0_i32, %c0_i32_0, %c0_i32_1 : i32, i32, i32
  }
  func.func @transform_4(%arg0: i32) -> (i32, i32, i32) {
    %c0_i32 = arith.constant 0 : i32
    %c0_i32_0 = arith.constant 0 : i32
    %c0_i32_1 = arith.constant 0 : i32
    %c0_i32_2 = arith.constant 0 : i32
    return %c0_i32, %c0_i32_0, %c0_i32_1 : i32, i32, i32
  }
  func.func @transform_5(%arg0: i32) -> (i32, i32) {
    %c0_i32 = arith.constant 0 : i32
    %c0_i32_0 = arith.constant 0 : i32
    %c0_i32_1 = arith.constant 0 : i32
    return %c0_i32, %c0_i32_0 : i32, i32
  }
  func.func @transform_6(%arg0: i32) -> (i32, i32) {
    %c0_i32 = arith.constant 0 : i32
    %c0_i32_0 = arith.constant 0 : i32
    %c0_i32_1 = arith.constant 0 : i32
    return %c0_i32, %c0_i32_0 : i32, i32
  }
  func.func @transform_7(%arg0: i32) -> (i32, i32) {
    %c0_i32 = arith.constant 0 : i32
    %c0_i32_0 = arith.constant 0 : i32
    %c0_i32_1 = arith.constant 0 : i32
    return %c0_i32, %c0_i32_0 : i32, i32
  }
  func.func @transform_8(%arg0: i32) -> (i32, i32) {
    %c0_i32 = arith.constant 0 : i32
    %c0_i32_0 = arith.constant 0 : i32
    %c0_i32_1 = arith.constant 0 : i32
    return %c0_i32, %c0_i32_0 : i32, i32
  }
  func.func @transform_9(%arg0: i32) -> (i32, i32, i32) {
    %c0_i32 = arith.constant 0 : i32
    %c0_i32_0 = arith.constant 0 : i32
    %c0_i32_1 = arith.constant 0 : i32
    return %arg0, %c0_i32, %c0_i32_0 : i32, i32, i32
  }
  func.func @transform_10(%arg0: i32) -> (i32, i32, i32) {
    %c0_i32 = arith.constant 0 : i32
    %c0_i32_0 = arith.constant 0 : i32
    %c0_i32_1 = arith.constant 0 : i32
    return %arg0, %c0_i32, %c0_i32_0 : i32, i32, i32
  }
}

</mosaic_0001>

<bundles_post_ra>
// kernel: _fcos_forward.1
= control target key start
LH: loop header
LB: loop body
LE: loop exit
PB: predicated region body
PF: predicated region fallthrough
CT: control target
= control target key end

     0   :  { %s2485_s13 = smov 0   ;;  %s3692_s0 = inlined_call_operand.vmem [shape: f32[2,8,256], index: 0, kind: input, shape index: {}]   ;;  %s3693_s1 = inlined_call_operand.vmem [shape: f32[2,8,64], index: 1, kind: input, shape index: {}]   ;;  %s3694_s2 = inlined_call_operand.vmem [shape: f32[1,320], index: 2, kind: input, shape index: {}]   ;;  %s3695_s3 = inlined_call_operand.vmem [shape: bf16[5,8,72], index: 3, kind: input, shape index: {}]   ;;  %s3696_s4 = inlined_call_operand.vmem [shape: f32[5,8,1], index: 4, kind: input, shape index: {}]   ;;  %s3697_s5 = inlined_call_operand.vmem [shape: bf16[8,72], index: 5, kind: input, shape index: {}]   ;;  %s3698_s6 = inlined_call_operand.vmem [shape: f32[8,1], index: 6, kind: input, shape index: {}]   ;;  %s3699_s7 = inlined_call_operand.vmem [shape: bf16[5,72], index: 7, kind: input, shape index: {}]   ;;  %s3700_s8 = inlined_call_operand.vmem [shape: f32[5,1], index: 8, kind: input, shape index: {}]   ;;  %s3701_s9 = inlined_call_operand.vmem [shape: f32[2,8,320], index: 9, kind: output, shape index: {0}]   ;;  %s3702_s10 = inlined_call_operand.vmem [shape: f32[2,5,320], index: 10, kind: output, shape index: {1}]  }
   0x1 LB: > { %s2125_s14 = sadd.s32 4294967295, %s2412_s13   ;;  %p2129_p0 = scmp.ge.s32.totalorder %s2412_s13, 1  ;;  %s2412_s13 = sphi %s2485_s13, %s21_s13  }
   0x2   : > { %p324_p1 = scmp.lt.s32.totalorder %s2412_s13, 3 }
   0x4   : > { %p325_p2 = pnand %p2129_p0, %p324_p1 }
   0x5   : > { %p371_p3 = scmp.lt.s32.totalorder (!%p325_p2), %s2125_s14, 1  ;;  %s2415_s15 = smov (!%p325_p2), 111  }
   0x6   : > { %328 = sbr.rel (%p325_p2) target bundleno = 1614 (0x64e), region = 56  ;;  %s2416_s16 = smov (!%p325_p2), 113  }
   0x7   : > { %s2417_s22 = smov (!%p325_p2), 112   ;;  %s2418_s23 = smov (!%p325_p2), 127  }
   0x8   : > { %s2419_s27 = smov (!%p325_p2), 15   ;;  %s2420_s28 = smov (!%p325_p2), 1  }
   0x9   : > { %s2421_s29 = smov (!%p325_p2), 119   ;;  %s2422_s30 = smov (!%p325_p2), 17  }
   0xa   : > { %s2423_s11 = smov (!%p325_p2), 16   ;;  %s2424_s12 = smov (!%p325_p2), 121  }
   0xb   : > { %v2414_v0 = vmov 0.0   ;;  %s3704_s14 = smov (!%p371_p3, %s2125_s14), 1  ;;  %vm414_vm0 = vcmask 523264   ;;  %s2426_s18 = smov 120   ;;  %v391_v10 = vlaneseq  ;;  %vm574_vm4 = vcmask 908288  }
   0xc   : > { %412 = vst [vmem:[#allocation2 + $0x18] sm:$0xff] %v2414_v0  ;;  %572 = vrot.lane.b32.xlu1 %v2414_v0, %s2415_s15  ;;  %541 = vrot.lane.b32.xlu2 %v2414_v0, %s2416_s16  ;;  %s2166_s17 = sshll.u32 %s3704_s14, 4  ;;  %s2132_s21 = sshll.u32 %s3704_s14, 3  ;;  %vm609_vm7 = vcmask 1043456   ;;  %vm543_vm8 = vcmask 924672   ;;  %vm560_vm9 = vcmask 916480  }
   0xd   : > { %413 = vst [vmem:[#allocation2 + $0x20] sm:$0xff] %v2414_v0  ;;  %s375_s20 = scalar_lea.vmem %s3692_s0, %s2166_s17  ;;  %s379_s26 = scalar_lea.vmem %s3693_s1, %s2132_s21  ;;  %v2593_v12 = vand.u32 127, %v391_v10  ;;  %vm526_vm10 = vcmask 1039360   ;;  %vm482_vm11 = vcmask 121856   ;;  %vm506_vm12 = vcmask 7168  }
   0xe   : > { %v2505_v1 = vld [vmem:[%s375_s20] sm:$0xff]  ;;  %v2511_v2 = vld [vmem:[%s375_s20 + $0x8] sm:$0xff]  ;;  %s2425_s17 = smov 7   ;;  %s2427_s19 = smov 9   ;;  %vm438_vm13 = vcmask 138240   ;;  %vm464_vm14 = vcmask 130048  }
   0xf   : > { %568 = vrot.lane.b32.xlu0 %v2505_v1, %s2415_s15  ;;  %v2192_v3 = vpack.i.bf16 %v2511_v2, %v2505_v1  ;;  %v418_v4 = vld [vmem:[%s379_s26] sm:$0xff]  ;;  %v2197_v6 = vpack.i.bf16 %v2505_v1, %v2414_v0  ;;  %s2428_s20 = smov 8   ;;  %v393_v13 = vadd.s32 128, %v2593_v12  ;;  %v394_v16 = vand.u32 15, %v2593_v12 }
  0x10   : > { %423 = vst.msk [vmem:[#allocation2 + $0x20] sm:$0xff] %vm414_vm0, %v418_v4  ;;  %v404_v18 = vand.u32 7, %v2593_v12 }
  0x11   : > { %v395_v17 = vand.u32 15, %v393_v13  ;;  %vm400_vm1 = vcmp.ne.s32.totalorder %v394_v16, 15  ;;  %vm396_vm5 = vcmp.ne.s32.totalorder %v394_v16, 0 }
  0x12   : > { %vm407_vm3 = vcmp.ne.s32.totalorder %v404_v18, 7  ;;  %v402_v21 = vsel %vm400_vm1, 1.0, %v2414_v0  ;;  %v398_v31 = vsel %vm396_vm5, 1.0, %v2414_v0  ;;  %vm405_vm15 = vcmp.ne.s32.totalorder %v404_v18, 0 }
  0x13   : > { %vm401_vm2 = vcmp.ne.s32.totalorder %v395_v17, 15  ;;  %v408_v24 = vsel %vm407_vm3, 1.0, %v2414_v0  ;;  %v2607_v25 = vperm.slane %v402_v21, 0  ;;  %vm397_vm6 = vcmp.ne.s32.totalorder %v395_v17, 0 }
  0x14   : > { %537 = vrot.lane.b32.xlu1 %v2505_v1, %s2416_s16  ;;  %539 = vrot.lane.b32.xlu2 %v2511_v2, %s2416_s16  ;;  %v403_v22 = vsel %vm401_vm2, 1.0, %v2414_v0  ;;  %v2611_v27 = vperm.slane %v408_v24, 0  ;;  %v399_v35 = vsel %vm397_vm6, 1.0, %v2414_v0  ;;  %v2620_v40 = vperm.slane %v398_v31, 0 }
  0x15   : > { %v2609_v26 = vperm.slane %v403_v22, 0  ;;  %v2622_v41 = vperm.slane %v399_v35, 0  ;;  %vm605_vm1 = vcmask 588800   ;;  %vm491_vm2 = vcmask 56320  }
  0x16   : > { %vm449_vm3 = vcmask 72704   ;;  %vm473_vm5 = vcmask 64512  }
  0x17   : > { %570 = vrot.lane.b32.xlu0 %v2511_v2, %s2415_s15  ;;  %v2543_v5 = vld [vmem:[#allocation2 + $0x20] sm:$0xff] }
  0x18   : > { %v2202_v7 = vpack.i.bf16 %v2543_v5, %v2414_v0 }
  0x1c   : > { %558 = vrot.lane.b32.xlu1 %v2414_v0, %s2417_s22  ;;  %520 = vrot.lane.b32.xlu2 %v2505_v1, %s2418_s23 }
  0x1f   : > { %2193 = vrot.lane.b32.xlu0 %v2192_v3, %s2417_s22 }
  0x24   : > { %524 = vrot.lane.b32.xlu1 %v2414_v0, %s2418_s23  ;;  %476 = vrot.lane.b32.xlu2 %v2414_v0, %s2419_s27 }
  0x27   : > { %522 = vrot.lane.b32.xlu0 %v2511_v2, %s2418_s23 }
  0x2c   : > { %480 = vrot.lane.b32.xlu1 %v2511_v2, %s2419_s27  ;;  %500 = vrot.lane.b32.xlu2 %v2414_v0, %s2420_s28 }
  0x2f   : > { %478 = vrot.lane.b32.xlu0 %v2505_v1, %s2419_s27 }
  0x34   : > { %504 = vrot.lane.b32.xlu1 %v2511_v2, %s2420_s28  ;;  %579 = vrot.lane.b32.xlu2 %v2543_v5, %s2421_s29 }
  0x37   : > { %502 = vrot.lane.b32.xlu0 %v2505_v1, %s2420_s28 }
  0x3c   : > { %434 = vrot.lane.b32.xlu1 %v2505_v1, %s2422_s30  ;;  %436 = vrot.lane.b32.xlu2 %v2511_v2, %s2422_s30 }
  0x3f   : > { %432 = vrot.lane.b32.xlu0 %v2414_v0, %s2422_s30 }
  0x44   : > { %2198 = vrot.lane.b32.xlu1 %v2197_v6, %s2423_s11  ;;  %462 = vrot.lane.b32.xlu2 %v2511_v2, %s2423_s11 }
  0x47   : > { %548 = vrot.lane.b32.xlu0 %v2543_v5, %s2424_s12 }
  0x4c   : > { %531 = vrot.lane.b32.xlu1 %v2543_v5, %s2418_s23  ;;  %487 = vrot.lane.b32.xlu2 %v2414_v0, %s2425_s17 }
  0x4f   : > { %565 = vrot.lane.b32.xlu0 %v2543_v5, %s2426_s18 }
  0x54   : > { %511 = vrot.lane.b32.xlu1 %v2414_v0, %s2420_s28  ;;  %513 = vrot.lane.b32.xlu2 %v2543_v5, %s2420_s28 }
  0x57   : > { %489 = vrot.lane.b32.xlu0 %v2543_v5, %s2425_s17 }
  0x5c   : > { %447 = vrot.lane.b32.xlu1 %v2543_v5, %s2427_s19  ;;  %2203 = vrot.lane.b32.xlu2 %v2202_v7, %s2428_s20  ;;  %v420_v7 = vld [vmem:[%s3696_s4] sm:$0xff] }
  0x5f   : > { %445 = vrot.lane.b32.xlu0 %v2414_v0, %s2427_s19 }
  0x64   : > { %771 = vrot.lane.b32.xlu1 %v2414_v0, %s2416_s16  ;;  %713 = vrot.lane.b32.xlu2 %v2414_v0, %s2419_s27 }
  0x66   : > { %v542_v8 = vpop.permute.xlu2 %541 }
  0x6c   : > { %732 = vrot.lane.b32.xlu1 %v2414_v0, %s2420_s28  ;;  %676 = vrot.lane.b32.xlu2 %v2414_v0, %s2422_s30 }
  0x6e   : > { %v540_v9 = vpop.permute.xlu2 %539 }
  0x6f   : > { %v545_v45 = vsel %vm543_vm8, %v540_v9, %v542_v8  ;;  %v2429_v8 = vmov 0  }
  0x70   : > { %v552_v53 = vmul.f32 %v545_v45, %v2622_v41  ;;  %2207 = vset.pattern.permute.xlu0 %v2429_v8  ;;  %2223 = vset.pattern.permute.xlu2 %v2429_v8 }
  0x71   : > { %602 = vperm.xlu0 %2207, %v420_v7   ;;  %2319 = vset.pattern.permute.xlu1 %v2429_v8 }
  0x74   : > { %755 = vrot.lane.b32.xlu1 %v2414_v0, %s2418_s23 }
  0x76   : > { %v2591_v11 = vpop.permute.xlu2 %520 }
  0x79   : > { %800 = vrot.lane.b32.xlu0 %v2414_v0, %s2415_s15 }
  0x7e   : > { %v573_v14 = vpop.permute.xlu1 %572  ;;  %v2596_v15 = vpop.permute.xlu2 %476 }
  0x81   : > { %v569_v19 = vpop.permute.xlu0 %568  ;;  %787 = vrot.lane.b32.xlu0 %v2414_v0, %s2417_s22 }
  0x86   : > { %v538_v20 = vpop.permute.xlu1 %537  ;;  %v2604_v23 = vpop.permute.xlu2 %500 }
  0x87   : > { %v544_v46 = vsel %vm543_vm8, %v538_v20, %v540_v9 }
  0x88   : > { %v551_v51 = vmul.f32 %v544_v46, %v2620_v40 }
  0x89   : > { %v571_v28 = vpop.permute.xlu0 %570 }
  0x8a   : > { %v575_v29 = vsel %vm574_vm4, %v569_v19, %v571_v28  ;;  %v576_v30 = vsel %vm574_vm4, %v571_v28, %v573_v14 }
  0x8b   : > { %v582_v33 = vmul.f32 %v575_v29, %v2607_v25  ;;  %v583_v34 = vmul.f32 %v576_v30, %v2609_v26 }
  0x8d   : > { %v597_v37 = vpack.c.bf16 %v582_v33, %v582_v33  ;;  %v598_v38 = vpack.c.bf16 %v583_v34, %v583_v34 }
  0x8e   : > { %v559_v32 = vpop.permute.xlu1 %558  ;;  %v580_v36 = vpop.permute.xlu2 %579 }
  0x8f   : > { %v584_v39 = vmul.f32 %v580_v36, %v2611_v27  ;;  %v611_v42 = vsel %vm609_vm7, %v597_v37, 0  ;;  %v614_v43 = vsel %vm609_vm7, %v598_v38, 0 }
  0x90   : > { %622 = vmatpush.bf16.msra.mxu0 %v611_v42  ;;  %635 = vmatpush.bf16.msra.mxu1 %v614_v43  ;;  %v406_v42 = vsel %vm405_vm15, 1.0, %v2414_v0 }
  0x91   : > { %v599_v44 = vpack.c.bf16 %v584_v39, %v584_v39  ;;  %v2194_v47 = vpop.permute.xlu0 %2193  ;;  %v2669_v12 = vperm.slane %v406_v42, 0 }
  0x92   : > { %v2196_v49 = vunpack.i.h.bf16 %v2194_v47  ;;  %v2195_v50 = vunpack.i.l.bf16 %v2194_v47 }
  0x93   : > { %v617_v48 = vsel %vm609_vm7, %v599_v44, 0  ;;  %v419_v44 = vld [vmem:[%s3695_s3] sm:$0xf] }
  0x94   : > { %648 = vmatpush.bf16.msra.mxu2 %v617_v48  ;;  %v561_v54 = vsel %vm560_vm9, %v2195_v50, %v2196_v49  ;;  %v562_v55 = vsel %vm560_vm9, %v2196_v49, %v559_v32 }
  0x95   : > { %v594_v56 = vpack.c.bf16 %v561_v54, %v551_v51  ;;  %v595_v57 = vpack.c.bf16 %v562_v55, %v552_v53 }
  0x96   : > { %v525_v52 = vpop.permute.xlu1 %524  ;;  %v437_v10 = vpop.permute.xlu2 %436 }
  0x97   : > { %623 = vmatpush.bf16.msra.mxu0 %v594_v56  ;;  %636 = vmatpush.bf16.msra.mxu1 %v595_v57 }
  0x99   : > { %v523_v58 = vpop.permute.xlu0 %522 }
  0x9a   : > { %v527_v59 = vsel %vm526_vm10, %v2591_v11, %v523_v58  ;;  %v528_v60 = vsel %vm526_vm10, %v523_v58, %v525_v52 }
  0x9b   : > { %v534_v62 = vmul.f32 %v527_v59, %v2607_v25  ;;  %v535_v63 = vmul.f32 %v528_v60, %v2609_v26 }
  0x9d   : > { %v591_v3 = vpack.c.bf16 %v534_v62, %v2505_v1  ;;  %v592_v4 = vpack.c.bf16 %v535_v63, %v2511_v2 }
  0x9e   : > { %v481_v61 = vpop.permute.xlu1 %480 }
  0x9f   : > { %624 = vmatpush.bf16.msra.mxu0 %v591_v3  ;;  %637 = vmatpush.bf16.msra.mxu1 %v592_v4 }
  0xa1   : > { %v479_v6 = vpop.permute.xlu0 %478 }
  0xa2   : > { %v483_v1 = vsel %vm482_vm11, %v2596_v15, %v479_v6  ;;  %v484_v2 = vsel %vm482_vm11, %v479_v6, %v481_v61 }
  0xa3   : > { %v497_v17 = vmul.f32 %v2607_v25, %v483_v1  ;;  %v498_v20 = vmul.f32 %v2609_v26, %v484_v2 }
  0xa6   : > { %v505_v9 = vpop.permute.xlu1 %504 }
  0xa9   : > { %v503_v11 = vpop.permute.xlu0 %502 }
  0xaa   : > { %v507_v13 = vsel %vm506_vm12, %v2604_v23, %v503_v11  ;;  %v508_v14 = vsel %vm506_vm12, %v503_v11, %v505_v9  ;;  %v463_v23 = vpop.permute.xlu2 %462 }
  0xab   : > { %v517_v19 = vmul.f32 %v507_v13, %v2620_v40  ;;  %v518_v21 = vmul.f32 %v508_v14, %v2622_v41 }
  0xad   : > { %v588_v15 = vpack.c.bf16 %v517_v19, %v497_v17  ;;  %v589_v22 = vpack.c.bf16 %v518_v21, %v498_v20 }
  0xae   : > { %v435_v16 = vpop.permute.xlu1 %434 }
  0xaf   : > { %625 = vmatpush.bf16.msra.mxu0 %v588_v15  ;;  %638 = vmatpush.bf16.msra.mxu1 %v589_v22  ;;  %v440_v28 = vsel %vm438_vm13, %v435_v16, %v437_v10 }
  0xb0   : > { %v456_v34 = vmul.f32 %v2622_v41, %v440_v28 }
  0xb1   : > { %v433_v24 = vpop.permute.xlu0 %432 }
  0xb2   : > { %v439_v29 = vsel %vm438_vm13, %v433_v24, %v435_v16  ;;  %v488_v39 = vpop.permute.xlu2 %487 }
  0xb3   : > { %v455_v33 = vmul.f32 %v2620_v40, %v439_v29 }
  0xb6   : > { %v2199_v30 = vpop.permute.xlu1 %2198 }
  0xb7   : > { %v2201_v31 = vunpack.i.h.bf16 %v2199_v30  ;;  %v2200_v32 = vunpack.i.l.bf16 %v2199_v30 }
  0xb9   : > { %v466_v35 = vsel %vm464_vm14, %v2201_v31, %v463_v23  ;;  %v465_v36 = vsel %vm464_vm14, %v2200_v32, %v2201_v31  ;;  %v549_v43 = vpop.permute.xlu0 %548 }
  0xba   : > { %v585_v37 = vpack.c.bf16 %v465_v36, %v455_v33  ;;  %v586_v38 = vpack.c.bf16 %v466_v35, %v456_v34  ;;  %v553_v18 = vmul.f32 %v549_v43, %v2669_v12  ;;  %v514_v47 = vpop.permute.xlu2 %513 }
  0xbc   : > { %626 = vmatpush.bf16.msra.mxu0 %v585_v37  ;;  %639 = vmatpush.bf16.msra.mxu1 %v586_v38 }
  0xbe   : > { %v532_v45 = vpop.permute.xlu1 %531 }
  0xbf   : > { %2135 = vmatmul.msk.bf16.vlgmr.msra.gmra.mxu0 %vm605_vm1, %v419_v44  ;;  %2136 = vmatmul.msk.bf16.vlgmr.msra.gmra.mxu1 %vm605_vm1, %v419_v44  ;;  %v536_v48 = vmul.f32 %v532_v45, %v2611_v27 }
  0xc1   : > { %v566_v46 = vpop.permute.xlu0 %565  ;;  %v593_v52 = vpack.c.bf16 %v536_v48, %v2543_v5 }
  0xc2   : > { %v596_v49 = vpack.c.bf16 %v566_v46, %v553_v18  ;;  %v2204_v57 = vpop.permute.xlu2 %2203 }
  0xc3   : > { %v2206_v59 = vunpack.i.h.bf16 %v2204_v57  ;;  %v2205_v60 = vunpack.i.l.bf16 %v2204_v57 }
  0xc4   : > { %649 = vmatpush.bf16.msra.mxu2 %v596_v49 }
  0xc5   : > { %v474_v63 = vsel %vm473_vm5, %v2205_v60, %v2206_v59 }
  0xc6   : > { %v512_v50 = vpop.permute.xlu1 %511 }
  0xc7   : > { %v515_v51 = vsel %vm506_vm12, %v512_v50, %v514_v47 }
  0xc8   : > { %650 = vmatpush.bf16.msra.mxu2 %v593_v52  ;;  %v519_v53 = vmul.f32 %v515_v51, %v2669_v12 }
  0xc9   : > { %v490_v54 = vpop.permute.xlu0 %489 }
  0xca   : > { %v492_v55 = vsel %vm491_vm2, %v488_v39, %v490_v54  ;;  %v714_v23 = vpop.permute.xlu2 %713 }
  0xcb   : > { %v499_v56 = vmul.f32 %v2611_v27, %v492_v55 }
  0xcd   : > { %v590_v58 = vpack.c.bf16 %v519_v53, %v499_v56 }
  0xce   : > { %v448_v61 = vpop.permute.xlu1 %447 }
  0xcf   : > { %651 = vmatpush.bf16.msra.mxu2 %v590_v58 }
  0xd1   : > { %v446_v62 = vpop.permute.xlu0 %445 }
  0xd2   : > { %v450_v5 = vsel %vm449_vm3, %v446_v62, %v448_v61  ;;  %v677_v24 = vpop.permute.xlu2 %676 }
  0xd3   : > { %v457_v3 = vmul.f32 %v2669_v12, %v450_v5 }
  0xd5   : > { %v587_v4 = vpack.c.bf16 %v474_v63, %v457_v3 }
  0xd6   : > { %v772_v28 = vpop.permute.xlu1 %771 }
  0xd7   : > { %652 = vmatpush.bf16.msra.mxu2 %v587_v4 }
  0xda   : > { %2137 = vmatmul.msk.bf16.vlgmr.msra.gmra.mxu2 %vm605_vm1, %v419_v44 }
  0xde   : > { %v733_v34 = vpop.permute.xlu1 %732 }
  0xe3   : > { %v603_v6 = vpop.permute.xlu0 %602 }
  0xe6   : > { %v756_v38 = vpop.permute.xlu1 %755 }
  0xeb   : > { %v801_v29 = vpop.permute.xlu0 %800 }
  0xf3   : > { %v788_v37 = vpop.permute.xlu0 %787 }
 0x13c   : > { %v628_v7 = vpop.f32.mrf.mxu0  ;;  %v641_v8 = vpop.f32.mrf.mxu1 }
 0x13d   : > { %v629_v9 = vadd.f32 %v628_v7, %v603_v6  ;;  %v642_v10 = vadd.f32 %v641_v8, %v603_v6 }
 0x13f   : > { %v2684_v1 = vmax.f32 %v629_v9, 0.0  ;;  %v2686_v2 = vmax.f32 %v642_v10, 0.0 }
 0x141   : > { %753 = vrot.lane.b32.xlu0 %v2686_v2, %s2418_s23  ;;  %798 = vrot.lane.b32.xlu2 %v2686_v2, %s2415_s15  ;;  %v2208_v14 = vpack.i.bf16 %v2686_v2, %v2684_v1  ;;  %v2715_v16 = vpack.i.bf16 %v2684_v1, %v2414_v0 }
 0x142   : > { %796 = vrot.lane.b32.xlu1 %v2684_v1, %s2415_s15 }
 0x144   : > { %v630_v11 = vpop.f32.mrf.mxu0  ;;  %v643_v13 = vpop.f32.mrf.mxu1 }
 0x149   : > { %769 = vrot.lane.b32.xlu2 %v2686_v2, %s2416_s16  ;;  %715 = vrot.lane.b32.xlu0 %v2684_v1, %s2419_s27 }
 0x14a   : > { %767 = vrot.lane.b32.xlu1 %v2684_v1, %s2416_s16 }
 0x151   : > { %678 = vrot.lane.b32.xlu0 %v2684_v1, %s2422_s30  ;;  %751 = vrot.lane.b32.xlu2 %v2684_v1, %s2418_s23 }
 0x152   : > { %2209 = vrot.lane.b32.xlu1 %v2208_v14, %s2417_s22 }
 0x159   : > { %717 = vrot.lane.b32.xlu0 %v2686_v2, %s2419_s27  ;;  %734 = vrot.lane.b32.xlu2 %v2684_v1, %s2420_s28 }
 0x15a   : > { %736 = vrot.lane.b32.xlu1 %v2686_v2, %s2420_s28 }
 0x15d   : > { %v654_v17 = vpop.f32.mrf.mxu2 }
 0x15e   : > { %v2717_v19 = vadd.f32 %v654_v17, %v603_v6 }
 0x160   : > { %v660_v20 = vmax.f32 %v2717_v19, 0.0 }
 0x161   : > { %742 = vrot.lane.b32.xlu0 %v2414_v0, %s2420_s28  ;;  %2214 = vrot.lane.b32.xlu2 %v2715_v16, %s2423_s11 }
 0x162   : > { %701 = vrot.lane.b32.xlu1 %v2686_v2, %s2423_s11  ;;  %667 = vst.msk [vmem:[#allocation2 + $0x20] sm:$0xff] %vm414_vm0, %v660_v20 }
 0x165   : > { %v656_v21 = vpop.f32.mrf.mxu2 }
 0x169   : > { %680 = vrot.lane.b32.xlu2 %v2686_v2, %s2422_s30  ;;  %v2731_v15 = vld [vmem:[#allocation2 + $0x20] sm:$0xff] }
 0x16a   : > { %777 = vrot.lane.b32.xlu0 %v2731_v15, %s2424_s12  ;;  %806 = vrot.lane.b32.xlu1 %v2731_v15, %s2421_s29  ;;  %v2218_v22 = vpack.i.bf16 %v2731_v15, %v2414_v0 }
 0x171   : > { %793 = vrot.lane.b32.xlu2 %v2731_v15, %s2426_s18 }
 0x172   : > { %761 = vrot.lane.b32.xlu0 %v2731_v15, %s2418_s23  ;;  %723 = vrot.lane.b32.xlu1 %v2414_v0, %s2425_s17 }
 0x179   : > { %725 = vrot.lane.b32.xlu2 %v2731_v15, %s2425_s17 }
 0x17a   : > { %690 = vrot.lane.b32.xlu0 %v2731_v15, %s2427_s19  ;;  %744 = vrot.lane.b32.xlu1 %v2731_v15, %s2420_s28 }
 0x181   : > { %688 = vrot.lane.b32.xlu2 %v2414_v0, %s2427_s19 }
 0x182   : > { %2219 = vrot.lane.b32.xlu1 %v2218_v22, %s2428_s20  ;;  %901 = vrot.lane.b32.xlu0 %v2414_v0, %s2422_s30 }
 0x18a   : > { %1173 = vrot.lane.b32.xlu0 %v2414_v0, %s2425_s17  ;;  %2235 = vrot.lane.b32.xlu1 %v2414_v0, %s2418_s23 }
 0x192   : > { %1138 = vrot.lane.b32.xlu0 %v2414_v0, %s2427_s19  ;;  %2240 = vrot.lane.b32.xlu1 %v2414_v0, %s2420_s28 }
 0x19a   : > { %1163 = vrot.lane.b32.xlu0 %v2414_v0, %s2419_s27  ;;  %1182 = vrot.lane.b32.xlu1 %v2414_v0, %s2420_s28 }
 0x19b   : > { %v799_v30 = vpop.permute.xlu2 %798 }
 0x19c   : > { %v803_v31 = vsel %vm574_vm4, %v799_v30, %v801_v29 }
 0x19d   : > { %v810_v32 = vmul.f32 %v803_v31, %v2609_v26 }
 0x19f   : > { %v825_v33 = vpack.c.bf16 %v810_v32, %v810_v32 }
 0x1a1   : > { %v839_v35 = vsel %vm609_vm7, %v825_v33, 0 }
 0x1a2   : > { %860 = vmatpush.bf16.msrb.mxu0 %v839_v35 }
 0x1a3   : > { %v770_v36 = vpop.permute.xlu2 %769 }
 0x1a4   : > { %v774_v50 = vsel %vm543_vm8, %v770_v36, %v772_v28 }
 0x1a5   : > { %v781_v60 = vmul.f32 %v774_v50, %v2622_v41 }
 0x1ab   : > { %v752_v39 = vpop.permute.xlu2 %751 }
 0x1b3   : > { %v754_v42 = vpop.permute.xlu0 %753  ;;  %v735_v46 = vpop.permute.xlu2 %734 }
 0x1b4   : > { %v797_v43 = vpop.permute.xlu1 %796  ;;  %v757_v55 = vsel %vm526_vm10, %v752_v39, %v754_v42  ;;  %v758_v56 = vsel %vm526_vm10, %v754_v42, %v756_v38  ;;  %v738_v7 = vsel %vm506_vm12, %v733_v34, %v735_v46 }
 0x1b5   : > { %v802_v44 = vsel %vm574_vm4, %v797_v43, %v799_v30  ;;  %v764_v3 = vmul.f32 %v757_v55, %v2607_v25  ;;  %v765_v4 = vmul.f32 %v758_v56, %v2609_v26  ;;  %v748_v29 = vmul.f32 %v738_v7, %v2620_v40 }
 0x1b6   : > { %v809_v45 = vmul.f32 %v802_v44, %v2607_v25  ;;  %v2138_v44 = vld [vmem:[%s3695_s3 + $0x4] sm:$0xf] }
 0x1b7   : > { %v818_v11 = vpack.c.bf16 %v764_v3, %v2684_v1  ;;  %v819_v13 = vpack.c.bf16 %v765_v4, %v2686_v2 }
 0x1b8   : > { %v824_v18 = vpack.c.bf16 %v809_v45, %v809_v45  ;;  %v2139_v45 = vld [vmem:[%s3696_s4 + $0x8] sm:$0xff] }
 0x1b9   : > { %829 = vperm.xlu2 %2223, %v2139_v45  }
 0x1ba   : > { %v836_v47 = vsel %vm609_vm7, %v824_v18, 0 }
 0x1bb   : > { %847 = vmatpush.bf16.msra.mxu3 %v836_v47  ;;  %v716_v48 = vpop.permute.xlu0 %715  ;;  %v2215_v53 = vpop.permute.xlu2 %2214 }
 0x1bc   : > { %v768_v49 = vpop.permute.xlu1 %767  ;;  %v719_v6 = vsel %vm482_vm11, %v714_v23, %v716_v48  ;;  %v2217_v30 = vunpack.i.h.bf16 %v2215_v53  ;;  %v2216_v31 = vunpack.i.l.bf16 %v2215_v53 }
 0x1bd   : > { %v773_v51 = vsel %vm543_vm8, %v768_v49, %v770_v36  ;;  %v729_v14 = vmul.f32 %v719_v6, %v2607_v25 }
 0x1be   : > { %v780_v59 = vmul.f32 %v773_v51, %v2620_v40 }
 0x1bf   : > { %v815_v32 = vpack.c.bf16 %v748_v29, %v729_v14 }
 0x1c1   : > { %2225 = vrot.lane.b32.xlu2 %v2414_v0, %s2415_s15 }
 0x1c3   : > { %v679_v52 = vpop.permute.xlu0 %678  ;;  %v681_v23 = vpop.permute.xlu2 %680 }
 0x1c4   : > { %v2210_v54 = vpop.permute.xlu1 %2209  ;;  %v682_v17 = vsel %vm438_vm13, %v677_v24, %v679_v52  ;;  %v683_v35 = vsel %vm438_vm13, %v679_v52, %v681_v23  ;;  %v703_v24 = vsel %vm464_vm14, %v2216_v31, %v2217_v30 }
 0x1c5   : > { %v2212_v57 = vunpack.i.h.bf16 %v2210_v54  ;;  %v2211_v58 = vunpack.i.l.bf16 %v2210_v54  ;;  %v694_v34 = vmul.f32 %v682_v17, %v2620_v40  ;;  %v695_v36 = vmul.f32 %v683_v35, %v2622_v41 }
 0x1c7   : > { %v789_v61 = vsel %vm560_vm9, %v2211_v58, %v2212_v57  ;;  %v790_v62 = vsel %vm560_vm9, %v2212_v57, %v788_v37  ;;  %v812_v38 = vpack.c.bf16 %v703_v24, %v694_v34 }
 0x1c8   : > { %v821_v5 = vpack.c.bf16 %v789_v61, %v780_v59  ;;  %v822_v63 = vpack.c.bf16 %v790_v62, %v781_v60 }
 0x1c9   : > { %2230 = vrot.lane.b32.xlu2 %v2414_v0, %s2416_s16 }
 0x1ca   : > { %848 = vmatpush.bf16.msra.mxu3 %v821_v5  ;;  %861 = vmatpush.bf16.msrb.mxu0 %v822_v63 }
 0x1cb   : > { %v718_v8 = vpop.permute.xlu0 %717 }
 0x1cc   : > { %v720_v9 = vsel %vm482_vm11, %v716_v48, %v718_v8  ;;  %v737_v10 = vpop.permute.xlu1 %736  ;;  %v794_v48 = vpop.permute.xlu2 %793 }
 0x1cd   : > { %v730_v21 = vmul.f32 %v720_v9, %v2609_v26  ;;  %v739_v22 = vsel %vm506_vm12, %v735_v46, %v737_v10 }
 0x1ce   : > { %v749_v28 = vmul.f32 %v739_v22, %v2622_v41  ;;  %849 = vmatpush.bf16.msra.mxu3 %v818_v11  ;;  %862 = vmatpush.bf16.msrb.mxu0 %v819_v13 }
 0x1d0   : > { %v816_v33 = vpack.c.bf16 %v749_v28, %v730_v21 }
 0x1d1   : > { %938 = vrot.lane.b32.xlu2 %v2414_v0, %s2419_s27 }
 0x1d2   : > { %850 = vmatpush.bf16.msra.mxu3 %v815_v32  ;;  %863 = vmatpush.bf16.msrb.mxu0 %v816_v33 }
 0x1d3   : > { %v743_v39 = vpop.permute.xlu0 %742 }
 0x1d4   : > { %v702_v37 = vpop.permute.xlu1 %701  ;;  %v726_v57 = vpop.permute.xlu2 %725 }
 0x1d5   : > { %v704_v42 = vsel %vm464_vm14, %v2217_v30, %v702_v37 }
 0x1d6   : > { %851 = vmatpush.bf16.msra.mxu3 %v812_v38  ;;  %v813_v43 = vpack.c.bf16 %v704_v42, %v695_v36  ;;  %v2254_v36 = vpack.i.bf16 %v2686_v2, %v2414_v0 }
 0x1d8   : > { %864 = vmatpush.bf16.msrb.mxu0 %v813_v43 }
 0x1d9   : > { %2140 = vmatmul.msk.bf16.vlgmr.msra.gmra.mxu3 %vm605_vm1, %v2138_v44 }
 0x1db   : > { %2141 = vmatmul.msk.bf16.vlgmr.msrb.gmra.mxu0 %vm605_vm1, %v2138_v44 }
 0x1dc   : > { %v778_v18 = vpop.permute.xlu0 %777  ;;  %v807_v46 = vpop.permute.xlu1 %806 }
 0x1dd   : > { %v811_v47 = vmul.f32 %v807_v46, %v2611_v27  ;;  %v782_v50 = vmul.f32 %v778_v18, %v2669_v12  ;;  %v689_v5 = vpop.permute.xlu2 %688 }
 0x1df   : > { %v826_v49 = vpack.c.bf16 %v811_v47, %v811_v47  ;;  %v823_v54 = vpack.c.bf16 %v794_v48, %v782_v50  ;;  %v2149_v48 = vld [vmem:[%s3696_s4 + $0x18] sm:$0xff] }
 0x1e1   : > { %v842_v51 = vsel %vm609_vm7, %v826_v49, 0 }
 0x1e2   : > { %873 = vmatpush.bf16.msrb.mxu1 %v842_v51 }
 0x1e4   : > { %v762_v52 = vpop.permute.xlu0 %761  ;;  %v724_v53 = vpop.permute.xlu1 %723 }
 0x1e5   : > { %v766_v55 = vmul.f32 %v762_v52, %v2611_v27  ;;  %v727_v58 = vsel %vm491_vm2, %v724_v53, %v726_v57 }
 0x1e6   : > { %874 = vmatpush.bf16.msrb.mxu1 %v823_v54  ;;  %v731_v61 = vmul.f32 %v727_v58, %v2611_v27 }
 0x1e7   : > { %v820_v56 = vpack.c.bf16 %v766_v55, %v2731_v15 }
 0x1ea   : > { %875 = vmatpush.bf16.msrb.mxu1 %v820_v56 }
 0x1ec   : > { %v745_v59 = vpop.permute.xlu1 %744  ;;  %v691_v15 = vpop.permute.xlu0 %690 }
 0x1ed   : > { %v746_v60 = vsel %vm506_vm12, %v743_v39, %v745_v59  ;;  %v692_v3 = vsel %vm449_vm3, %v689_v5, %v691_v15 }
 0x1ee   : > { %v750_v62 = vmul.f32 %v746_v60, %v2669_v12  ;;  %v696_v8 = vmul.f32 %v692_v3, %v2669_v12 }
 0x1f0   : > { %v817_v63 = vpack.c.bf16 %v750_v62, %v731_v61 }
 0x1f2   : > { %876 = vmatpush.bf16.msrb.mxu1 %v817_v63 }
 0x1f4   : > { %v2220_v4 = vpop.permute.xlu1 %2219  ;;  %v2905_v39 = vpop.permute.xlu0 %901 }
 0x1f5   : > { %v2222_v6 = vunpack.i.h.bf16 %v2220_v4  ;;  %v2221_v7 = vunpack.i.l.bf16 %v2220_v4 }
 0x1f7   : > { %v711_v9 = vsel %vm473_vm5, %v2221_v7, %v2222_v6 }
 0x1f8   : > { %v814_v10 = vpack.c.bf16 %v711_v9, %v696_v8 }
 0x1fa   : > { %877 = vmatpush.bf16.msrb.mxu1 %v814_v10 }
 0x1fc   : > { %v2915_v43 = vpop.permute.xlu0 %1173 }
 0x1fd   : > { %2142 = vmatmul.msk.bf16.vlgmr.msrb.gmra.mxu1 %vm605_vm1, %v2138_v44  ;;  %v2919_v44 = vpop.permute.xlu1 %2235 }
 0x204   : > { %v2931_v18 = vpop.permute.xlu0 %1138 }
 0x205   : > { %v2933_v46 = vpop.permute.xlu1 %2240 }
 0x20c   : > { %v2947_v49 = vpop.permute.xlu0 %1163 }
 0x20d   : > { %v2949_v50 = vpop.permute.xlu1 %1182 }
 0x213   : > { %v830_v11 = vpop.permute.xlu2 %829 }
 0x21b   : > { %v2888_v19 = vpop.permute.xlu2 %2225 }
 0x21c   : > { %v2227_v52 = vunpack.i.l.bf16 %v2888_v19 }
 0x223   : > { %v2900_v38 = vpop.permute.xlu2 %2230 }
 0x22b   : > { %v2913_v42 = vpop.permute.xlu2 %938 }
 0x258   : > { %v866_v13 = vpop.f32.mrf.mxu0 }
 0x259   : > { %v867_v14 = vadd.f32 %v866_v13, %v830_v11 }
 0x25b   : > { %v2827_v17 = vmax.f32 %v867_v14, 0.0 }
 0x25c   : > { %v853_v21 = vpop.f32.mrf.mxu3 }
 0x25d   : > { %942 = vrot.lane.b32.xlu0 %v2827_v17, %s2419_s27  ;;  %978 = vrot.lane.b32.xlu2 %v2827_v17, %s2418_s23  ;;  %v854_v22 = vadd.f32 %v853_v21, %v830_v11 }
 0x25e   : > { %1023 = vrot.lane.b32.xlu1 %v2827_v17, %s2415_s15 }
 0x25f   : > { %v2835_v28 = vmax.f32 %v854_v22, 0.0 }
 0x260   : > { %v868_v23 = vpop.f32.mrf.mxu0 }
 0x261   : > { %v2244_v30 = vpack.i.bf16 %v2827_v17, %v2835_v28  ;;  %v2249_v34 = vpack.i.bf16 %v2835_v28, %v2414_v0 }
 0x264   : > { %v855_v29 = vpop.f32.mrf.mxu3 }
 0x265   : > { %905 = vrot.lane.b32.xlu2 %v2827_v17, %s2422_s30  ;;  %1021 = vrot.lane.b32.xlu0 %v2835_v28, %s2415_s15  ;;  %v2242_v29 = vunpack.i.l.bf16 %v2933_v46 }
 0x266   : > { %994 = vrot.lane.b32.xlu1 %v2827_v17, %s2416_s16 }
 0x26d   : > { %959 = vrot.lane.b32.xlu2 %v2835_v28, %s2420_s28  ;;  %992 = vrot.lane.b32.xlu0 %v2835_v28, %s2416_s16 }
 0x26e   : > { %961 = vrot.lane.b32.xlu1 %v2827_v17, %s2420_s28 }
 0x275   : > { %1248 = vrot.lane.b32.xlu2 %v2686_v2, %s2415_s15  ;;  %2245 = vrot.lane.b32.xlu0 %v2244_v30, %s2417_s22 }
 0x276   : > { %976 = vrot.lane.b32.xlu1 %v2835_v28, %s2418_s23 }
 0x27a   : > { %v879_v31 = vpop.f32.mrf.mxu1 }
 0x27b   : > { %v880_v32 = vadd.f32 %v879_v31, %v830_v11  ;;  %v3006_v31 = vld [vmem:[#allocation2 + $0x18] sm:$0xff] }
 0x27d   : > { %1186 = vrot.lane.b32.xlu2 %v2686_v2, %s2420_s28  ;;  %940 = vrot.lane.b32.xlu0 %v2835_v28, %s2419_s27  ;;  %v885_v33 = vmax.f32 %v880_v32, 0.0 }
 0x27e   : > { %903 = vrot.lane.b32.xlu1 %v2835_v28, %s2422_s30 }
 0x27f   : > { %892 = vst.msk [vmem:[#allocation2 + $0x20] sm:$0xff] %vm414_vm0, %v885_v33 }
 0x282   : > { %v881_v35 = vpop.f32.mrf.mxu1 }
 0x285   : > { %1130 = vrot.lane.b32.xlu2 %v2686_v2, %s2422_s30  ;;  %2250 = vrot.lane.b32.xlu0 %v2249_v34, %s2423_s11 }
 0x286   : > { %1203 = vrot.lane.b32.xlu1 %v2686_v2, %s2418_s23  ;;  %v2870_v24 = vld [vmem:[#allocation2 + $0x20] sm:$0xff] }
 0x287   : > { %1117 = vst.msk [vmem:[#allocation2 + $0x20] sm:$0xff] %vm414_vm0, %v660_v20  ;;  %v2259_v20 = vpack.i.bf16 %v2684_v1, %v2827_v17  ;;  %v2289_v63 = vpack.i.bf16 %v2870_v24, %v2414_v0 }
 0x28d   : > { %1151 = vrot.lane.b32.xlu2 %v2686_v2, %s2423_s11  ;;  %2255 = vrot.lane.b32.xlu0 %v2254_v36, %s2417_s22 }
 0x28e   : > { %v2880_v37 = vld [vmem:[#allocation2 + $0x20] sm:$0xff] }
 0x28f   : > { %1256 = vrot.lane.b32.xlu1 %v2880_v37, %s2421_s29 }
 0x295   : > { %1243 = vrot.lane.b32.xlu2 %v2880_v37, %s2426_s18  ;;  %1219 = vrot.lane.b32.xlu0 %v2686_v2, %s2416_s16 }
 0x297   : > { %1211 = vrot.lane.b32.xlu1 %v2880_v37, %s2418_s23 }
 0x29d   : > { %1194 = vrot.lane.b32.xlu2 %v2880_v37, %s2420_s28  ;;  %1167 = vrot.lane.b32.xlu0 %v2686_v2, %s2419_s27 }
 0x29f   : > { %1175 = vrot.lane.b32.xlu1 %v2880_v37, %s2425_s17 }
 0x2a5   : > { %1227 = vrot.lane.b32.xlu0 %v2880_v37, %s2424_s12  ;;  %2260 = vrot.lane.b32.xlu2 %v2259_v20, %s2423_s11  ;;  %v2228_v20 = vunpack.i.h.bf16 %v2888_v19 }
 0x2a7   : > { %1140 = vrot.lane.b32.xlu1 %v2880_v37, %s2427_s19 }
 0x2ad   : > { %1217 = vrot.lane.b32.xlu0 %v2684_v1, %s2416_s16  ;;  %2265 = vrot.lane.b32.xlu2 %v2715_v16, %s2417_s22  ;;  %v2269_v16 = vpack.i.bf16 %v2880_v37, %v2414_v0 }
 0x2af   : > { %1246 = vrot.lane.b32.xlu1 %v2684_v1, %s2415_s15 }
 0x2b5   : > { %1201 = vrot.lane.b32.xlu0 %v2684_v1, %s2418_s23  ;;  %1165 = vrot.lane.b32.xlu2 %v2684_v1, %s2419_s27 }
 0x2b7   : > { %v2925_v45 = vpop.permute.xlu2 %978  ;;  %1184 = vrot.lane.b32.xlu1 %v2684_v1, %s2420_s28 }
 0x2bd   : > { %1126 = vrot.lane.b32.xlu0 %v2414_v0, %s2422_s30  ;;  %2270 = vrot.lane.b32.xlu2 %v2269_v16, %s2428_s20 }
 0x2bf   : > { %v2938_v47 = vpop.permute.xlu2 %905  ;;  %1128 = vrot.lane.b32.xlu1 %v2684_v1, %s2422_s30 }
 0x2c5   : > { %1031 = vrot.lane.b32.xlu0 %v2870_v24, %s2421_s29  ;;  %1279 = vperm.xlu2 %2223, %v2149_v48  }
 0x2c7   : > { %v2951_v51 = vpop.permute.xlu2 %959  ;;  %1147 = vrot.lane.b32.xlu1 %v2414_v0, %s2423_s11 }
 0x2c8   : > { %v963_v33 = vsel %vm506_vm12, %v2242_v29, %v2951_v51 }
 0x2c9   : > { %v973_v48 = vmul.f32 %v963_v33, %v2620_v40 }
 0x2cd   : > { %986 = vrot.lane.b32.xlu0 %v2870_v24, %s2418_s23  ;;  %950 = vrot.lane.b32.xlu2 %v2870_v24, %s2425_s17 }
 0x2cf   : > { %v2960_v53 = vpop.permute.xlu0 %942  ;;  %v2962_v54 = vpop.permute.xlu2 %1248  ;;  %1002 = vrot.lane.b32.xlu1 %v2870_v24, %s2424_s12 }
 0x2d0   : > { %v1024_v55 = vpop.permute.xlu1 %1023 }
 0x2d1   : > { %v1028_v56 = vsel %vm574_vm4, %v1024_v55, %v2227_v52 }
 0x2d2   : > { %v1035_v57 = vmul.f32 %v1028_v56, %v2609_v26 }
 0x2d4   : > { %v1050_v58 = vpack.c.bf16 %v1035_v57, %v1035_v57 }
 0x2d5   : > { %2280 = vrot.lane.b32.xlu0 %v2414_v0, %s2420_s28  ;;  %2285 = vrot.lane.b32.xlu2 %v2414_v0, %s2427_s19 }
 0x2d6   : > { %v1064_v59 = vsel %vm609_vm7, %v1050_v58, 0 }
 0x2d7   : > { %1085 = vmatpush.bf16.msrb.mxu3 %v1064_v59  ;;  %v2973_v60 = vpop.permute.xlu2 %1186  ;;  %v1022_v61 = vpop.permute.xlu0 %1021  ;;  %2275 = vrot.lane.b32.xlu1 %v2414_v0, %s2425_s17 }
 0x2d8   : > { %v2975_v62 = vpop.permute.xlu1 %994  ;;  %v1027_v15 = vsel %vm574_vm4, %v1022_v61, %v1024_v55  ;;  %v1253_v55 = vsel %vm574_vm4, %v2962_v54, %v2228_v20  ;;  %v2238_v20 = vunpack.i.h.bf16 %v2919_v44 }
 0x2d9   : > { %v1034_v5 = vmul.f32 %v1027_v15, %v2607_v25 }
 0x2db   : > { %v1049_v3 = vpack.c.bf16 %v1034_v5, %v1034_v5 }
 0x2dd   : > { %915 = vrot.lane.b32.xlu0 %v2870_v24, %s2427_s19  ;;  %2290 = vrot.lane.b32.xlu2 %v2289_v63, %s2428_s20  ;;  %v1061_v4 = vsel %vm609_vm7, %v1049_v3, 0 }
 0x2de   : > { %1072 = vmatpush.bf16.msrb.mxu2 %v1061_v4  ;;  %v2232_v4 = vunpack.i.l.bf16 %v2900_v38 }
 0x2df   : > { %v2987_v6 = vpop.permute.xlu2 %1130  ;;  %v993_v7 = vpop.permute.xlu0 %992  ;;  %969 = vrot.lane.b32.xlu1 %v2870_v24, %s2420_s28 }
 0x2e0   : > { %v2989_v8 = vpop.permute.xlu1 %961  ;;  %v998_v9 = vsel %vm543_vm8, %v993_v7, %v2975_v62  ;;  %v2237_v7 = vunpack.i.l.bf16 %v2919_v44 }
 0x2e1   : > { %v1005_v22 = vmul.f32 %v998_v9, %v2620_v40 }
 0x2e5   : > { %1446 = vrot.lane.b32.xlu2 %v2414_v0, %s2416_s16  ;;  %2295 = vrot.lane.b32.xlu0 %v2414_v0, %s2422_s30 }
 0x2e7   : > { %v2999_v10 = vpop.permute.xlu2 %1151  ;;  %v2246_v11 = vpop.permute.xlu0 %2245  ;;  %1475 = vrot.lane.b32.xlu1 %v3006_v31, %s2415_s15 }
 0x2e8   : > { %v977_v13 = vpop.permute.xlu1 %976  ;;  %v2248_v14 = vunpack.i.h.bf16 %v2246_v11  ;;  %v2247_v21 = vunpack.i.l.bf16 %v2246_v11  ;;  %v999_v11 = vsel %vm543_vm8, %v2975_v62, %v2232_v4 }
 0x2e9   : > { %v982_v23 = vsel %vm526_vm10, %v977_v13, %v2925_v45  ;;  %v1006_v62 = vmul.f32 %v999_v11, %v2622_v41 }
 0x2ea   : > { %v1014_v30 = vsel %vm560_vm9, %v2247_v21, %v2248_v14  ;;  %v989_v0 = vmul.f32 %v982_v23, %v2607_v25  ;;  %v983_v23 = vsel %vm526_vm10, %v2925_v45, %v2237_v7  ;;  %v2233_v45 = vunpack.i.h.bf16 %v2900_v38 }
 0x2eb   : > { %v1046_v32 = vpack.c.bf16 %v1014_v30, %v1005_v22  ;;  %v3052_v22 = vld [vmem:[%s3695_s3 + $0x8] sm:$0xf] }
 0x2ec   : > { %v1043_v36 = vpack.c.bf16 %v989_v0, %v2835_v28  ;;  %v1260_v28 = vmul.f32 %v1253_v55, %v2609_v26  ;;  %v990_v0 = vmul.f32 %v983_v23, %v2609_v26 }
 0x2ed   : > { %1073 = vmatpush.bf16.msrb.mxu2 %v1046_v32  ;;  %1462 = vrot.lane.b32.xlu2 %v3006_v31, %s2417_s22 }
 0x2ee   : > { %v1275_v15 = vpack.c.bf16 %v1260_v28, %v1260_v28 }
 0x2ef   : > { %v3015_v34 = vpop.permute.xlu2 %1243  ;;  %v941_v35 = vpop.permute.xlu0 %940  ;;  %1388 = vrot.lane.b32.xlu1 %v3006_v31, %s2419_s27 }
 0x2f0   : > { %v944_v16 = vsel %vm482_vm11, %v2913_v42, %v941_v35  ;;  %v904_v56 = vpop.permute.xlu1 %903  ;;  %v945_v33 = vsel %vm482_vm11, %v941_v35, %v2960_v53  ;;  %v1044_v53 = vpack.c.bf16 %v990_v0, %v2827_v17  ;;  %v2243_v0 = vunpack.i.h.bf16 %v2933_v46 }
 0x2f1   : > { %v954_v52 = vmul.f32 %v944_v16, %v2607_v25  ;;  %1074 = vmatpush.bf16.msrb.mxu2 %v1043_v36  ;;  %v907_v19 = vsel %vm438_vm13, %v2905_v39, %v904_v56  ;;  %v1289_v39 = vsel %vm609_vm7, %v1275_v15, 0  ;;  %v964_v16 = vsel %vm506_vm12, %v2951_v51, %v2989_v8 }
 0x2f2   : > { %v919_v5 = vmul.f32 %v907_v19, %v2620_v40  ;;  %v974_v51 = vmul.f32 %v964_v16, %v2622_v41  ;;  %v908_v19 = vsel %vm438_vm13, %v904_v56, %v2938_v47 }
 0x2f3   : > { %v1040_v57 = vpack.c.bf16 %v973_v48, %v954_v52  ;;  %v955_v48 = vmul.f32 %v945_v33, %v2609_v26 }
 0x2f5   : > { %1075 = vmatpush.bf16.msrb.mxu2 %v1040_v57  ;;  %1430 = vrot.lane.b32.xlu2 %v3006_v31, %s2418_s23 }
 0x2f7   : > { %v3032_v42 = vpop.permute.xlu2 %1194  ;;  %v2251_v58 = vpop.permute.xlu0 %2250  ;;  %1417 = vrot.lane.b32.xlu1 %v3006_v31, %s2420_s28 }
 0x2f8   : > { %v2253_v59 = vunpack.i.h.bf16 %v2251_v58  ;;  %v2252_v61 = vunpack.i.l.bf16 %v2251_v58  ;;  %v3040_v9 = vpop.permute.xlu1 %1203  ;;  %v1196_v33 = vsel %vm506_vm12, %v2243_v0, %v3032_v42 }
 0x2fa   : > { %v928_v63 = vsel %vm464_vm14, %v2252_v61, %v2253_v59  ;;  %v1041_v61 = vpack.c.bf16 %v974_v51, %v955_v48 }
 0x2fb   : > { %v1037_v3 = vpack.c.bf16 %v928_v63, %v919_v5 }
 0x2fd   : > { %1076 = vmatpush.bf16.msrb.mxu2 %v1037_v3  ;;  %v920_v3 = vmul.f32 %v908_v19, %v2622_v41  ;;  %v2148_v19 = vld [vmem:[%s3695_s3 + $0xc] sm:$0xf] }
 0x2ff   : > { %v3045_v13 = vpop.permute.xlu0 %2255  ;;  %v3047_v21 = vpop.permute.xlu2 %2260 }
 0x300   : > { %v2257_v29 = vunpack.i.l.bf16 %v3045_v13  ;;  %2145 = vmatmul.msk.bf16.vlgmr.msrb.gmra.mxu2 %vm605_vm1, %v3052_v22  ;;  %v2258_v35 = vunpack.i.h.bf16 %v3045_v13  ;;  %v2262_v44 = vunpack.i.l.bf16 %v3047_v21 }
 0x301   : > { %1310 = vmatpush.bf16.msra.mxu2 %v1289_v39  ;;  %v1257_v36 = vpop.permute.xlu1 %1256 }
 0x302   : > { %v1015_v30 = vsel %vm560_vm9, %v2248_v14, %v2257_v29  ;;  %v1208_v14 = vsel %vm526_vm10, %v3040_v9, %v2238_v20  ;;  %v1261_v8 = vmul.f32 %v1257_v36, %v2611_v27  ;;  %v929_v63 = vsel %vm464_vm14, %v2253_v59, %v2262_v44 }
 0x303   : > { %v1047_v32 = vpack.c.bf16 %v1015_v30, %v1006_v62  ;;  %v1215_v58 = vmul.f32 %v1208_v14, %v2609_v26  ;;  %v1038_v39 = vpack.c.bf16 %v929_v63, %v920_v3 }
 0x304   : > { %v1276_v4 = vpack.c.bf16 %v1261_v8, %v1261_v8 }
 0x305   : > { %1086 = vmatpush.bf16.msrb.mxu3 %v1047_v32  ;;  %v1269_v47 = vpack.c.bf16 %v1215_v58, %v2686_v2 }
 0x306   : > { %v1292_v56 = vsel %vm609_vm7, %v1276_v4, 0 }
 0x307   : > { %v1220_v52 = vpop.permute.xlu0 %1219  ;;  %v3072_v55 = vpop.permute.xlu2 %2265 }
 0x308   : > { %v1224_v38 = vsel %vm543_vm8, %v1220_v52, %v2233_v45  ;;  %v2267_v57 = vunpack.i.l.bf16 %v3072_v55  ;;  %v2268_v8 = vunpack.i.h.bf16 %v3072_v55 }
 0x309   : > { %v1231_v28 = vmul.f32 %v1224_v38, %v2622_v41  ;;  %1087 = vmatpush.bf16.msrb.mxu3 %v1044_v53  ;;  %v1212_v5 = vpop.permute.xlu1 %1211 }
 0x30a   : > { %v1240_v17 = vsel %vm560_vm9, %v2258_v35, %v2267_v57  ;;  %v1216_v62 = vmul.f32 %v1212_v5, %v2611_v27  ;;  %v1239_v55 = vsel %vm560_vm9, %v2268_v8, %v2258_v35 }
 0x30b   : > { %v1272_v15 = vpack.c.bf16 %v1240_v17, %v1231_v28 }
 0x30c   : > { %v1270_v36 = vpack.c.bf16 %v1216_v62, %v2880_v37 }
 0x30d   : > { %1088 = vmatpush.bf16.msrb.mxu3 %v1041_v61  ;;  %1311 = vmatpush.bf16.msra.mxu2 %v1272_v15 }
 0x30f   : > { %v1168_v7 = vpop.permute.xlu0 %1167  ;;  %v1166_v23 = vpop.permute.xlu2 %1165 }
 0x310   : > { %v1169_v13 = vsel %vm482_vm11, %v2947_v49, %v1166_v23 }
 0x311   : > { %1089 = vmatpush.bf16.msrb.mxu3 %v1038_v39  ;;  %1312 = vmatpush.bf16.msra.mxu2 %v1269_v47  ;;  %v1176_v11 = vpop.permute.xlu1 %1175 }
 0x312   : > { %v1177_v2 = vsel %vm491_vm2, %v2915_v43, %v1176_v11 }
 0x313   : > { %v1181_v20 = vmul.f32 %v1177_v2, %v2611_v27 }
 0x314   : > { %2146 = vmatmul.msk.bf16.vlgmr.msrb.gmra.mxu3 %vm605_vm1, %v3052_v22 }
 0x315   : > { %1323 = vmatpush.bf16.msra.mxu3 %v1292_v56  ;;  %v1179_v56 = vmul.f32 %v1169_v13, %v2607_v25 }
 0x317   : > { %v1228_v59 = vpop.permute.xlu0 %1227  ;;  %v2271_v45 = vpop.permute.xlu2 %2270 }
 0x318   : > { %v1232_v29 = vmul.f32 %v1228_v59, %v2669_v12  ;;  %v2273_v46 = vunpack.i.h.bf16 %v2271_v45  ;;  %v2272_v14 = vunpack.i.l.bf16 %v2271_v45 }
 0x319   : > { %v1141_v32 = vpop.permute.xlu1 %1140 }
 0x31a   : > { %v1273_v30 = vpack.c.bf16 %v3015_v34, %v1232_v29  ;;  %v1142_v16 = vsel %vm449_vm3, %v2931_v18, %v1141_v32  ;;  %v1200_v34 = vmul.f32 %v1196_v33, %v2669_v12  ;;  %v1161_v42 = vsel %vm473_vm5, %v2272_v14, %v2273_v46 }
 0x31b   : > { %v1146_v43 = vmul.f32 %v1142_v16, %v2669_v12 }
 0x31c   : > { %1324 = vmatpush.bf16.msra.mxu3 %v1273_v30  ;;  %v1267_v53 = vpack.c.bf16 %v1200_v34, %v1181_v20 }
 0x31d   : > { %v1264_v57 = vpack.c.bf16 %v1161_v42, %v1146_v43 }
 0x31f   : > { %v1218_v48 = vpop.permute.xlu0 %1217  ;;  %v1280_v16 = vpop.permute.xlu2 %1279 }
 0x320   : > { %1325 = vmatpush.bf16.msra.mxu3 %v1270_v36  ;;  %v1223_v38 = vsel %vm543_vm8, %v1218_v48, %v1220_v52  ;;  %v1170_v52 = vsel %vm482_vm11, %v1166_v23, %v1168_v7 }
 0x321   : > { %v1247_v44 = vpop.permute.xlu1 %1246  ;;  %v1230_v17 = vmul.f32 %v1223_v38, %v2620_v40  ;;  %v1180_v3 = vmul.f32 %v1170_v52, %v2609_v26  ;;  %v2144_v52 = vld [vmem:[%s3696_s4 + $0x10] sm:$0xff] }
 0x322   : > { %v1252_v37 = vsel %vm574_vm4, %v1247_v44, %v2962_v54 }
 0x323   : > { %v1259_v18 = vmul.f32 %v1252_v37, %v2607_v25  ;;  %v1271_v63 = vpack.c.bf16 %v1239_v55, %v1230_v17 }
 0x324   : > { %1326 = vmatpush.bf16.msra.mxu3 %v1267_v53 }
 0x325   : > { %v1274_v28 = vpack.c.bf16 %v1259_v18, %v1259_v18 }
 0x327   : > { %v1202_v51 = vpop.permute.xlu0 %1201  ;;  %v1286_v54 = vsel %vm609_vm7, %v1274_v28, 0 }
 0x328   : > { %1327 = vmatpush.bf16.msra.mxu3 %v1264_v57  ;;  %v1207_v58 = vsel %vm526_vm10, %v1202_v51, %v3040_v9  ;;  %1297 = vmatpush.bf16.msra.mxu1 %v1286_v54 }
 0x329   : > { %v1185_v61 = vpop.permute.xlu1 %1184  ;;  %v1214_v15 = vmul.f32 %v1207_v58, %v2607_v25 }
 0x32a   : > { %v1189_v5 = vsel %vm506_vm12, %v1185_v61, %v2973_v60  ;;  %v1188_v9 = vsel %vm506_vm12, %v2949_v50, %v1185_v61  ;;  %v2263_v60 = vunpack.i.h.bf16 %v3047_v21  ;;  %v2154_v61 = vld [vmem:[%s3696_s4 + $0x20] sm:$0xff] }
 0x32b   : > { %2152 = vmatmul.msk.bf16.vlgmr.msra.gmra.mxu3 %vm605_vm1, %v2148_v19  ;;  %v1199_v4 = vmul.f32 %v1189_v5, %v2622_v41  ;;  %v1198_v35 = vmul.f32 %v1188_v9, %v2620_v40  ;;  %v1268_v47 = vpack.c.bf16 %v1214_v15, %v2684_v1 }
 0x32c   : > { %1298 = vmatpush.bf16.msra.mxu1 %v1271_v63  ;;  %v1154_v49 = vsel %vm464_vm14, %v2263_v60, %v2999_v10 }
 0x32d   : > { %v1266_v39 = vpack.c.bf16 %v1199_v4, %v1180_v3  ;;  %v1265_v59 = vpack.c.bf16 %v1198_v35, %v1179_v56 }
 0x32f   : > { %v1127_v7 = vpop.permute.xlu0 %1126  ;;  %1313 = vmatpush.bf16.msra.mxu2 %v1266_v39 }
 0x330   : > { %1299 = vmatpush.bf16.msra.mxu1 %v1268_v47 }
 0x331   : > { %v1129_v11 = vpop.permute.xlu1 %1128 }
 0x332   : > { %v1133_v50 = vsel %vm438_vm13, %v1129_v11, %v2987_v6  ;;  %v1132_v21 = vsel %vm438_vm13, %v1127_v7, %v1129_v11 }
 0x333   : > { %v1145_v29 = vmul.f32 %v1133_v50, %v2622_v41  ;;  %v1144_v0 = vmul.f32 %v1132_v21, %v2620_v40 }
 0x334   : > { %1300 = vmatpush.bf16.msra.mxu1 %v1265_v59 }
 0x335   : > { %v1263_v62 = vpack.c.bf16 %v1154_v49, %v1145_v29 }
 0x337   : > { %v1032_v23 = vpop.permute.xlu0 %1031  ;;  %1314 = vmatpush.bf16.msra.mxu2 %v1263_v62 }
 0x338   : > { %v1036_v1 = vmul.f32 %v1032_v23, %v2611_v27 }
 0x339   : > { %v1148_v6 = vpop.permute.xlu1 %1147 }
 0x33a   : > { %v1051_v30 = vpack.c.bf16 %v1036_v1, %v1036_v1  ;;  %v1153_v32 = vsel %vm464_vm14, %v1148_v6, %v2263_v60  ;;  %2151 = vmatmul.msk.bf16.vlgmr.msra.gmra.mxu2 %vm605_vm1, %v2148_v19 }
 0x33b   : > { %v1262_v33 = vpack.c.bf16 %v1153_v32, %v1144_v0 }
 0x33c   : > { %v1067_v2 = vsel %vm609_vm7, %v1051_v30, 0 }
 0x33d   : > { %1098 = vmatpush.bf16.msra.mxu0 %v1067_v2  ;;  %1301 = vmatpush.bf16.msra.mxu1 %v1262_v33 }
 0x33f   : > { %v987_v9 = vpop.permute.xlu0 %986 }
 0x340   : > { %2150 = vmatmul.msk.bf16.vlgmr.msra.gmra.mxu1 %vm605_vm1, %v2148_v19  ;;  %v951_v19 = vpop.permute.xlu2 %950  ;;  %v991_v21 = vmul.f32 %v987_v9, %v2611_v27 }
 0x341   : > { %v1003_v55 = vpop.permute.xlu1 %1002 }
 0x342   : > { %v1007_v23 = vmul.f32 %v1003_v55, %v2669_v12  ;;  %v1045_v33 = vpack.c.bf16 %v991_v21, %v2870_v24 }
 0x347   : > { %v2281_v39 = vpop.permute.xlu0 %2280 }
 0x348   : > { %v3200_v17 = vpop.permute.xlu2 %2285  ;;  %v2282_v29 = vunpack.i.l.bf16 %v2281_v39  ;;  %v2283_v6 = vunpack.i.h.bf16 %v2281_v39 }
 0x349   : > { %v3222_v63 = vpop.permute.xlu1 %2275  ;;  %v2287_v0 = vunpack.i.l.bf16 %v3200_v17 }
 0x34a   : > { %v2277_v1 = vunpack.i.l.bf16 %v3222_v63 }
 0x34c   : > { %v952_v32 = vsel %vm491_vm2, %v2277_v1, %v951_v19 }
 0x34f   : > { %v916_v60 = vpop.permute.xlu0 %915 }
 0x350   : > { %v2291_v58 = vpop.permute.xlu2 %2290 }
 0x351   : > { %v970_v4 = vpop.permute.xlu1 %969 }
 0x352   : > { %v971_v2 = vsel %vm506_vm12, %v2282_v29, %v970_v4 }
 0x357   : > { %v3236_v50 = vpop.permute.xlu0 %2295 }
 0x358   : > { %v3217_v15 = vpop.permute.xlu2 %1446 }
 0x359   : > { %v3228_v13 = vpop.permute.xlu1 %1475 }
 0x360   : > { %v3224_v3 = vpop.permute.xlu2 %1462 }
 0x361   : > { %v1389_v47 = vpop.permute.xlu1 %1388 }
 0x368   : > { %v3226_v7 = vpop.permute.xlu2 %1430 }
 0x369   : > { %v1418_v59 = vpop.permute.xlu1 %1417 }
 0x383   : > { %v3151_v10 = vpop.f32.mrf.mxu2 }
 0x38b   : > { %v1080_v36 = vpop.f32.mrf.mxu2 }
 0x38c   : > { %v975_v36 = vmul.f32 %v971_v2, %v2669_v12 }
 0x397   : > { %v3153_v20 = vpop.f32.mrf.mxu3 }
 0x39f   : > { %v1093_v45 = vpop.f32.mrf.mxu3 }
 0x3ae   : > { %v1329_v48 = vpop.f32.mrf.mxu3 }
 0x3af   : > { %v1330_v34 = vadd.f32 %v1329_v48, %v1280_v16  ;;  %v917_v48 = vsel %vm449_vm3, %v2287_v0, %v916_v60 }
 0x3b1   : > { %v1335_v46 = vmax.f32 %v1330_v34, 0.0 }
 0x3b3   : > { %1342 = vst.msk [vmem:[#allocation2 + $0x20] sm:$0xff] %vm414_vm0, %v1335_v46 }
 0x3b6   : > { %v1331_v14 = vpop.f32.mrf.mxu3 }
 0x3ba   : > { %v3164_v18 = vld [vmem:[#allocation2 + $0x20] sm:$0xff] }
 0x3bb   : > { %v2299_v8 = vpack.i.bf16 %v3164_v18, %v2870_v24  ;;  %v2314_v5 = vpack.i.bf16 %v3164_v18, %v3006_v31  ;;  %v2293_v24 = vunpack.i.h.bf16 %v2291_v58 }
 0x3bd   : > { %v1303_v43 = vpop.f32.mrf.mxu1  ;;  %v1316_v53 = vpop.f32.mrf.mxu2 }
 0x3be   : > { %v1304_v44 = vadd.f32 %v1303_v43, %v1280_v16  ;;  %v1317_v57 = vadd.f32 %v1316_v53, %v1280_v16  ;;  %v956_v43 = vmul.f32 %v952_v32, %v2611_v27  ;;  %v2292_v53 = vunpack.i.l.bf16 %v2291_v58 }
 0x3c0   : > { %v3156_v37 = vmax.f32 %v1304_v44, 0.0  ;;  %v3172_v51 = vmax.f32 %v1317_v57, 0.0  ;;  %v921_v44 = vmul.f32 %v917_v48, %v2669_v12  ;;  %v936_v57 = vsel %vm473_vm5, %v2292_v53, %v2293_v24 }
 0x3c2   : > { %1409 = vrot.lane.b32.xlu1 %v3156_v37, %s2420_s28  ;;  %1442 = vrot.lane.b32.xlu0 %v3156_v37, %s2416_s16  ;;  %v2304_v28 = vpack.i.bf16 %v3172_v51, %v3156_v37  ;;  %v2309_v54 = vpack.i.bf16 %v3156_v37, %v3006_v31  ;;  %v1039_v19 = vpack.c.bf16 %v936_v57, %v921_v44 }
 0x3c3   : > { %1471 = vrot.lane.b32.xlu2 %v3156_v37, %s2415_s15 }
 0x3c5   : > { %v1305_v42 = vpop.f32.mrf.mxu1  ;;  %v1318_v38 = vpop.f32.mrf.mxu2 }
 0x3c6   : > { %v1042_v42 = vpack.c.bf16 %v975_v36, %v956_v43 }
 0x3ca   : > { %1426 = vrot.lane.b32.xlu0 %v3156_v37, %s2418_s23  ;;  %1481 = vrot.lane.b32.xlu1 %v3164_v18, %s2421_s29 }
 0x3cb   : > { %1390 = vrot.lane.b32.xlu2 %v3156_v37, %s2419_s27 }
 0x3d2   : > { %1452 = vrot.lane.b32.xlu0 %v3164_v18, %s2424_s12  ;;  %1444 = vrot.lane.b32.xlu1 %v3172_v51, %s2416_s16 }
 0x3d3   : > { %2300 = vrot.lane.b32.xlu2 %v2299_v8, %s2426_s18 }
 0x3da   : > { %1436 = vrot.lane.b32.xlu0 %v3164_v18, %s2418_s23  ;;  %2305 = vrot.lane.b32.xlu1 %v2304_v28, %s2417_s22 }
 0x3db   : > { %1419 = vrot.lane.b32.xlu2 %v3164_v18, %s2420_s28 }
 0x3e2   : > { %1400 = vrot.lane.b32.xlu0 %v3164_v18, %s2425_s17  ;;  %1428 = vrot.lane.b32.xlu1 %v3172_v51, %s2418_s23 }
 0x3e3   : > { %1411 = vrot.lane.b32.xlu2 %v3172_v51, %s2420_s28 }
 0x3ea   : > { %1473 = vrot.lane.b32.xlu0 %v3172_v51, %s2415_s15  ;;  %1353 = vrot.lane.b32.xlu1 %v3156_v37, %s2422_s30 }
 0x3eb   : > { %1355 = vrot.lane.b32.xlu2 %v3172_v51, %s2422_s30 }
 0x3f2   : > { %1365 = vrot.lane.b32.xlu0 %v3164_v18, %s2427_s19  ;;  %2310 = vrot.lane.b32.xlu1 %v2309_v54, %s2423_s11 }
 0x3f3   : > { %1376 = vrot.lane.b32.xlu2 %v3172_v51, %s2423_s11 }
 0x3fa   : > { %1392 = vrot.lane.b32.xlu0 %v3172_v51, %s2419_s27  ;;  %1054 = vperm.xlu1 %2319, %v2144_v52  }
 0x3fb   : > { %1504 = vperm.xlu2 %2223, %v2154_v61  }
 0x402   : > { %2315 = vrot.lane.b32.xlu0 %v2314_v5, %s2428_s20 }
 0x41d   : > { %v3230_v35 = vpop.permute.xlu2 %1471 }
 0x425   : > { %v3232_v56 = vpop.permute.xlu2 %1390 }
 0x426   : > { %v1394_v11 = vsel %vm482_vm11, %v1389_v47, %v3232_v56 }
 0x427   : > { %v3252_v46 = vmul.f32 %v1394_v11, %v2607_v25 }
 0x42d   : > { %v2301_v49 = vpop.permute.xlu2 %2300 }
 0x42e   : > { %v2302_v62 = vunpack.i.l.bf16 %v2301_v49  ;;  %v2303_v5 = vunpack.i.h.bf16 %v2301_v49 }
 0x430   : > { %v1048_v30 = vpack.c.bf16 %v2302_v62, %v1007_v23  ;;  %v2278_v23 = vunpack.i.h.bf16 %v3222_v63 }
 0x432   : > { %1099 = vmatpush.bf16.msra.mxu0 %v1048_v30 }
 0x434   : > { %v3246_v45 = vpop.permute.xlu1 %1409  ;;  %v1443_v16 = vpop.permute.xlu0 %1442 }
 0x435   : > { %v1413_v34 = vsel %vm506_vm12, %v2283_v6, %v3246_v45  ;;  %v1420_v29 = vpop.permute.xlu2 %1419 }
 0x436   : > { %v3255_v14 = vmul.f32 %v1413_v34, %v2620_v40  ;;  %1100 = vmatpush.bf16.msra.mxu0 %v1045_v33 }
 0x438   : > { %v1490_v38 = vpack.c.bf16 %v3255_v14, %v3252_v46 }
 0x43a   : > { %1101 = vmatpush.bf16.msra.mxu0 %v1042_v42 }
 0x43c   : > { %v1427_v8 = vpop.permute.xlu0 %1426  ;;  %v1482_v28 = vpop.permute.xlu1 %1481 }
 0x43d   : > { %v1486_v54 = vmul.f32 %v1482_v28, %v2611_v27  ;;  %v1412_v2 = vpop.permute.xlu2 %1411 }
 0x43e   : > { %1102 = vmatpush.bf16.msra.mxu0 %v1039_v19 }
 0x43f   : > { %v1501_v52 = vpack.c.bf16 %v1486_v54, %v1486_v54 }
 0x441   : > { %v1517_v61 = vsel %vm609_vm7, %v1501_v52, 0  ;;  %2147 = vmatmul.msk.bf16.vlgmr.msra.gmra.mxu0 %vm605_vm1, %v3052_v22  ;;  %v1421_v22 = vsel %vm506_vm12, %v1418_v59, %v1420_v29 }
 0x442   : > { %1548 = vmatpush.bf16.msrb.mxu2 %v1517_v61  ;;  %v1425_v21 = vmul.f32 %v1421_v22, %v2669_v12 }
 0x444   : > { %v1453_v58 = vpop.permute.xlu0 %1452  ;;  %v1445_v55 = vpop.permute.xlu1 %1444 }
 0x445   : > { %v1457_v9 = vmul.f32 %v1453_v58, %v2669_v12  ;;  %v1448_v34 = vsel %vm543_vm8, %v1443_v16, %v1445_v55  ;;  %v1449_v43 = vsel %vm543_vm8, %v1445_v55, %v3217_v15  ;;  %v1356_v58 = vpop.permute.xlu2 %1355 }
 0x446   : > { %v1455_v16 = vmul.f32 %v1448_v34, %v2620_v40  ;;  %v1456_v15 = vmul.f32 %v1449_v43, %v2622_v41 }
 0x447   : > { %v1498_v4 = vpack.c.bf16 %v2303_v5, %v1457_v9  ;;  %v2297_v5 = vunpack.i.l.bf16 %v3236_v50 }
 0x449   : > { %1549 = vmatpush.bf16.msrb.mxu2 %v1498_v4 }
 0x44c   : > { %v1437_v39 = vpop.permute.xlu0 %1436  ;;  %v2306_v47 = vpop.permute.xlu1 %2305 }
 0x44d   : > { %v1441_v60 = vmul.f32 %v1437_v39, %v2611_v27  ;;  %v2307_v33 = vunpack.i.l.bf16 %v2306_v47  ;;  %v1414_v39 = vsel %vm506_vm12, %v3246_v45, %v1412_v2 }
 0x44f   : > { %v1495_v11 = vpack.c.bf16 %v1441_v60, %v3164_v18  ;;  %v2308_v18 = vunpack.i.h.bf16 %v2306_v47 }
 0x451   : > { %1550 = vmatpush.bf16.msrb.mxu2 %v1495_v11  ;;  %v1464_v44 = vsel %vm560_vm9, %v2307_v33, %v2308_v18  ;;  %v1465_v42 = vsel %vm560_vm9, %v2308_v18, %v3224_v3 }
 0x452   : > { %v1497_v61 = vpack.c.bf16 %v1465_v42, %v1456_v15 }
 0x454   : > { %v1401_v62 = vpop.permute.xlu0 %1400  ;;  %v1429_v1 = vpop.permute.xlu1 %1428 }
 0x455   : > { %v1402_v49 = vsel %vm491_vm2, %v2278_v23, %v1401_v62 }
 0x456   : > { %v1406_v30 = vmul.f32 %v1402_v49, %v2611_v27  ;;  %v1377_v49 = vpop.permute.xlu2 %1376 }
 0x458   : > { %v1492_v0 = vpack.c.bf16 %v1425_v21, %v1406_v30 }
 0x45a   : > { %1551 = vmatpush.bf16.msrb.mxu2 %v1492_v0 }
 0x45c   : > { %v1474_v6 = vpop.permute.xlu0 %1473  ;;  %v1354_v32 = vpop.permute.xlu1 %1353 }
 0x45d   : > { %v1477_v63 = vsel %vm574_vm4, %v3230_v35, %v1474_v6  ;;  %v1478_v59 = vsel %vm574_vm4, %v1474_v6, %v3228_v13  ;;  %v1432_v35 = vsel %vm526_vm10, %v1427_v8, %v1429_v1  ;;  %v1433_v13 = vsel %vm526_vm10, %v1429_v1, %v3226_v7 }
 0x45e   : > { %v1484_v36 = vmul.f32 %v1477_v63, %v2607_v25  ;;  %v1485_v48 = vmul.f32 %v1478_v59, %v2609_v26  ;;  %v1439_v52 = vmul.f32 %v1432_v35, %v2607_v25  ;;  %v1440_v3 = vmul.f32 %v1433_v13, %v2609_v26  ;;  %v1505_v42 = vpop.permute.xlu2 %1504 }
 0x45f   : > { %v1496_v8 = vpack.c.bf16 %v1464_v44, %v1455_v16  ;;  %v1357_v47 = vsel %vm438_vm13, %v2297_v5, %v1354_v32  ;;  %v1358_v62 = vsel %vm438_vm13, %v1354_v32, %v1356_v58  ;;  %v3329_v32 = vpack.i.bf16 %v3006_v31, %v3006_v31 }
 0x460   : > { %v1499_v24 = vpack.c.bf16 %v1484_v36, %v1484_v36  ;;  %v1500_v53 = vpack.c.bf16 %v1485_v48, %v1485_v48  ;;  %v1493_v7 = vpack.c.bf16 %v1439_v52, %v3156_v37  ;;  %v1494_v55 = vpack.c.bf16 %v1440_v3, %v3172_v51 }
 0x461   : > { %v1424_v51 = vmul.f32 %v1414_v39, %v2622_v41  ;;  %v1369_v45 = vmul.f32 %v1357_v47, %v2620_v40  ;;  %v1370_v0 = vmul.f32 %v1358_v62, %v2622_v41 }
 0x462   : > { %v1511_v57 = vsel %vm609_vm7, %v1499_v24, 0  ;;  %v1514_v28 = vsel %vm609_vm7, %v1500_v53, 0 }
 0x463   : > { %1522 = vmatpush.bf16.msrb.mxu0 %v1511_v57  ;;  %1535 = vmatpush.bf16.msrb.mxu1 %v1514_v28 }
 0x464   : > { %v1366_v19 = vpop.permute.xlu0 %1365  ;;  %v2311_v54 = vpop.permute.xlu1 %2310 }
 0x465   : > { %v2313_v9 = vunpack.i.h.bf16 %v2311_v54  ;;  %v2312_v4 = vunpack.i.l.bf16 %v2311_v54 }
 0x467   : > { %1523 = vmatpush.bf16.msrb.mxu0 %v1496_v8  ;;  %1536 = vmatpush.bf16.msrb.mxu1 %v1497_v61  ;;  %v1378_v22 = vsel %vm464_vm14, %v2312_v4, %v2313_v9  ;;  %v1379_v30 = vsel %vm464_vm14, %v2313_v9, %v1377_v49 }
 0x468   : > { %v1487_v21 = vpack.c.bf16 %v1378_v22, %v1369_v45 }
 0x46b   : > { %1524 = vmatpush.bf16.msrb.mxu0 %v1493_v7  ;;  %1537 = vmatpush.bf16.msrb.mxu1 %v1494_v55 }
 0x46c   : > { %v1393_v60 = vpop.permute.xlu0 %1392  ;;  %v1055_v11 = vpop.permute.xlu1 %1054 }
 0x46d   : > { %v1395_v29 = vsel %vm482_vm11, %v3232_v56, %v1393_v60  ;;  %v1079_v37 = vadd.f32 %v3151_v10, %v1055_v11  ;;  %v2288_v10 = vunpack.i.h.bf16 %v3200_v17  ;;  %v2153_v17 = vld [vmem:[%s3695_s3 + $0x10] sm:$0xf]  ;;  %v1092_v36 = vadd.f32 %v3153_v20, %v1055_v11 }
 0x46e   : > { %v1405_v23 = vmul.f32 %v1395_v29, %v2609_v26 }
 0x46f   : > { %v3309_v1 = vmax.f32 %v1079_v37, 0.0  ;;  %1525 = vmatpush.bf16.msrb.mxu0 %v1490_v38  ;;  %v1367_v46 = vsel %vm449_vm3, %v2288_v10, %v1366_v19  ;;  %v1488_v38 = vpack.c.bf16 %v1379_v30, %v1370_v0  ;;  %v3362_v48 = vmax.f32 %v1092_v36, 0.0 }
 0x470   : > { %v1491_v56 = vpack.c.bf16 %v1424_v51, %v1405_v23  ;;  %v1371_v18 = vmul.f32 %v1367_v46, %v2669_v12 }
 0x471   : > { %1665 = vrot.lane.b32.xlu1 %v3309_v1, %s2416_s16  ;;  %1576 = vrot.lane.b32.xlu0 %v3309_v1, %s2422_s30  ;;  %v2345_v59 = vpack.i.bf16 %v3309_v1, %v3006_v31  ;;  %v2360_v20 = vpack.i.bf16 %v3362_v48, %v3309_v1  ;;  %v2365_v19 = vpack.i.bf16 %v3006_v31, %v3362_v48 }
 0x472   : > { %1538 = vmatpush.bf16.msrb.mxu1 %v1491_v56  ;;  %1694 = vrot.lane.b32.xlu2 %v3309_v1, %s2415_s15  ;;  %v1785_v56 = vld [vmem:[%s3700_s8] sm:$0x1f] }
 0x473   : > { %1526 = vmatpush.bf16.msrb.mxu0 %v1487_v21 }
 0x474   : > { %v2316_v14 = vpop.permute.xlu0 %2315 }
 0x475   : > { %v2318_v2 = vunpack.i.h.bf16 %v2316_v14  ;;  %v2317_v6 = vunpack.i.l.bf16 %v2316_v14 }
 0x476   : > { %2155 = vmatmul.msk.bf16.vlgmr.msrb.gmra.mxu0 %vm605_vm1, %v2153_v17  ;;  %1539 = vmatpush.bf16.msrb.mxu1 %v1488_v38 }
 0x477   : > { %v1386_v33 = vsel %vm473_vm5, %v2317_v6, %v2318_v2 }
 0x478   : > { %v1489_v63 = vpack.c.bf16 %v1386_v33, %v1371_v18 }
 0x479   : > { %2156 = vmatmul.msk.bf16.vlgmr.msrb.gmra.mxu1 %vm605_vm1, %v2153_v17  ;;  %2326 = vrot.lane.b32.xlu1 %v3329_v32, %s2416_s16 }
 0x47a   : > { %1552 = vmatpush.bf16.msrb.mxu2 %v1489_v63  ;;  %2321 = vrot.lane.b32.xlu0 %v3329_v32, %s2415_s15  ;;  %v1562_v63 = vld [vmem:[%s3698_s6] sm:$0xff] }
 0x47b   : > { %1649 = vrot.lane.b32.xlu2 %v3309_v1, %s2418_s23 }
 0x47d   : > { %2157 = vmatmul.msk.bf16.vlgmr.msrb.gmra.mxu2 %vm605_vm1, %v2153_v17 }
 0x481   : > { %2336 = vrot.lane.b32.xlu1 %v3329_v32, %s2420_s28 }
 0x482   : > { %1613 = vrot.lane.b32.xlu0 %v3309_v1, %s2419_s27 }
 0x483   : > { %2331 = vrot.lane.b32.xlu2 %v3329_v32, %s2419_s27 }
 0x489   : > { %2341 = vrot.lane.b32.xlu1 %v3329_v32, %s2418_s23 }
 0x48a   : > { %1797 = vrot.lane.b32.xlu0 %v3006_v31, %s2422_s30 }
 0x48b   : > { %1632 = vrot.lane.b32.xlu2 %v3309_v1, %s2420_s28 }
 0x491   : > { %2346 = vrot.lane.b32.xlu1 %v2345_v59, %s2423_s11 }
 0x492   : > { %2351 = vrot.lane.b32.xlu0 %v3329_v32, %s2425_s17 }
 0x493   : > { %2356 = vrot.lane.b32.xlu2 %v3329_v32, %s2420_s28 }
 0x49b   : > { %1667 = vrot.lane.b32.xlu2 %v3362_v48, %s2416_s16 }
 0x4a3   : > { %1615 = vrot.lane.b32.xlu2 %v3362_v48, %s2419_s27 }
 0x4be   : > { %v1104_v34 = vpop.f32.mrf.mxu0 }
 0x4bf   : > { %v1105_v43 = vadd.f32 %v1104_v34, %v1055_v11 }
 0x4c1   : > { %v1110_v24 = vmax.f32 %v1105_v43, 0.0 }
 0x4c3   : > { %1565 = vst.msk [vmem:[#allocation2 + $0x20] sm:$0xff] %vm414_vm0, %v1110_v24 }
 0x4c6   : > { %v1106_v53 = vpop.f32.mrf.mxu0 }
 0x4ca   : > { %v3369_v44 = vld [vmem:[#allocation2 + $0x20] sm:$0xff] }
 0x4cb   : > { %1659 = vrot.lane.b32.xlu1 %v3369_v44, %s2418_s23  ;;  %1704 = vrot.lane.b32.xlu0 %v3369_v44, %s2421_s29 }
 0x4cc   : > { %v1695_v37 = vpop.permute.xlu2 %1694 }
 0x4d3   : > { %1623 = vrot.lane.b32.xlu1 %v3369_v44, %s2425_s17  ;;  %1675 = vrot.lane.b32.xlu0 %v3369_v44, %s2424_s12 }
 0x4d5   : > { %v1650_v22 = vpop.permute.xlu2 %1649 }
 0x4db   : > { %1578 = vrot.lane.b32.xlu1 %v3362_v48, %s2422_s30  ;;  %1642 = vrot.lane.b32.xlu0 %v3369_v44, %s2420_s28 }
 0x4dd   : > { %v3459_v49 = vpop.permute.xlu2 %2331 }
 0x4e3   : > { %2361 = vrot.lane.b32.xlu1 %v2360_v20, %s2417_s22  ;;  %1696 = vrot.lane.b32.xlu0 %v3362_v48, %s2415_s15  ;;  %v3402_v55 = vpop.permute.xlu1 %1665  ;;  %v3404_v5 = vpop.permute.xlu0 %1576 }
 0x4e5   : > { %v3473_v0 = vpop.permute.xlu2 %1632 }
 0x4eb   : > { %1651 = vrot.lane.b32.xlu0 %v3362_v48, %s2418_s23  ;;  %v3419_v39 = vpop.permute.xlu1 %2326 }
 0x4ec   : > { %v3421_v47 = vpop.permute.xlu0 %2321 }
 0x4ed   : > { %v3485_v6 = vpop.permute.xlu2 %2356  ;;  %v2323_v59 = vunpack.i.l.bf16 %v3421_v47 }
 0x4f3   : > { %1634 = vrot.lane.b32.xlu0 %v3362_v48, %s2420_s28  ;;  %v1528_v35 = vpop.f32.mrf.mxu0  ;;  %v3431_v11 = vpop.permute.xlu1 %2336 }
 0x4f4   : > { %v1529_v13 = vadd.f32 %v1528_v35, %v1505_v42  ;;  %v3433_v29 = vpop.permute.xlu0 %1613 }
 0x4f5   : > { %v3500_v36 = vpop.permute.xlu2 %1667 }
 0x4f6   : > { %v3392_v57 = vmax.f32 %v1529_v13, 0.0  ;;  %v1541_v28 = vpop.f32.mrf.mxu1 }
 0x4f7   : > { %v1542_v16 = vadd.f32 %v1541_v28, %v1505_v42  ;;  %v1671_v28 = vsel %vm543_vm8, %v3402_v55, %v3500_v36  ;;  %v2333_v55 = vunpack.i.l.bf16 %v3459_v49 }
 0x4f8   : > { %v2375_v4 = vpack.i.bf16 %v3392_v57, %v3006_v31 }
 0x4f9   : > { %v3394_v15 = vmax.f32 %v1542_v16, 0.0 }
 0x4fb   : > { %2366 = vrot.lane.b32.xlu0 %v2365_v19, %s2423_s11  ;;  %v1530_v54 = vpop.f32.mrf.mxu0  ;;  %v2380_v60 = vpack.i.bf16 %v3006_v31, %v3394_v15  ;;  %v3443_v23 = vpop.permute.xlu1 %2341  ;;  %v2390_v14 = vpack.i.bf16 %v3394_v15, %v3392_v57 }
 0x4fc   : > { %v3441_v51 = vpop.permute.xlu0 %1797  ;;  %v2338_v54 = vunpack.i.l.bf16 %v3431_v11 }
 0x4fe   : > { %v1543_v52 = vpop.f32.mrf.mxu1 }
 0x500   : > { %v1554_v3 = vpop.f32.mrf.mxu2 }
 0x501   : > { %v1555_v8 = vadd.f32 %v1554_v3, %v1505_v42 }
 0x503   : > { %v1560_v61 = vmax.f32 %v1555_v8, 0.0  ;;  %v3453_v45 = vpop.permute.xlu1 %2346 }
 0x504   : > { %v3451_v62 = vpop.permute.xlu0 %2351 }
 0x505   : > { %1788 = vst.msk [vmem:[#allocation2 + $0x20] sm:$0xff] %vm414_vm0, %v1560_v61 }
 0x508   : > { %v1556_v58 = vpop.f32.mrf.mxu2 }
 0x509   : > { %v1678_v58 = vmul.f32 %v1671_v28, %v2620_v40 }
 0x50c   : > { %v3400_v7 = vld [vmem:[#allocation2 + $0x20] sm:$0xff] }
 0x50d   : > { %1898 = vrot.lane.b32.xlu1 %v3400_v7, %s2424_s12  ;;  %1927 = vrot.lane.b32.xlu2 %v3400_v7, %s2421_s29  ;;  %v2370_v9 = vpack.i.bf16 %v3400_v7, %v3369_v44  ;;  %v2400_v8 = vpack.i.bf16 %v3400_v7, %v3006_v31 }
 0x50f   : > { %2371 = vrot.lane.b32.xlu0 %v2370_v9, %s2426_s18 }
 0x515   : > { %1888 = vrot.lane.b32.xlu1 %v3392_v57, %s2416_s16  ;;  %1882 = vrot.lane.b32.xlu2 %v3400_v7, %s2418_s23 }
 0x517   : > { %2376 = vrot.lane.b32.xlu0 %v2375_v4, %s2417_s22 }
 0x51d   : > { %2381 = vrot.lane.b32.xlu1 %v2380_v60, %s2417_s22  ;;  %1846 = vrot.lane.b32.xlu2 %v3400_v7, %s2425_s17 }
 0x51f   : > { %1919 = vrot.lane.b32.xlu0 %v3394_v15, %s2415_s15 }
 0x525   : > { %1872 = vrot.lane.b32.xlu1 %v3392_v57, %s2418_s23  ;;  %1917 = vrot.lane.b32.xlu2 %v3392_v57, %s2415_s15 }
 0x527   : > { %1838 = vrot.lane.b32.xlu0 %v3394_v15, %s2419_s27 }
 0x52d   : > { %2386 = vrot.lane.b32.xlu1 %v3329_v32, %s2427_s19  ;;  %1890 = vrot.lane.b32.xlu2 %v3394_v15, %s2416_s16  ;;  %v2395_v32 = vpack.i.bf16 %v3369_v44, %v3006_v31  ;;  %v1616_v31 = vpop.permute.xlu2 %1615 }
 0x52f   : > { %1865 = vrot.lane.b32.xlu0 %v3400_v7, %s2420_s28 }
 0x535   : > { %1855 = vrot.lane.b32.xlu1 %v3392_v57, %s2420_s28  ;;  %1874 = vrot.lane.b32.xlu2 %v3394_v15, %s2418_s23 }
 0x537   : > { %1811 = vrot.lane.b32.xlu0 %v3400_v7, %s2427_s19 }
 0x53d   : > { %v3466_v10 = vpop.permute.xlu1 %1659  ;;  %v1705_v21 = vpop.permute.xlu0 %1704  ;;  %1799 = vrot.lane.b32.xlu1 %v3392_v57, %s2422_s30  ;;  %1836 = vrot.lane.b32.xlu2 %v3392_v57, %s2419_s27 }
 0x53e   : > { %v1709_v30 = vmul.f32 %v1705_v21, %v2611_v27  ;;  %v1617_v21 = vsel %vm482_vm11, %v2333_v55, %v3433_v29  ;;  %v1664_v55 = vmul.f32 %v3466_v10, %v2611_v27 }
 0x53f   : > { %1950 = vperm.xlu0 %2207, %v1785_v56  }
 0x540   : > { %v1724_v46 = vpack.c.bf16 %v1709_v30, %v1709_v30 }
 0x542   : > { %v1740_v17 = vsel %vm609_vm7, %v1724_v46, 0 }
 0x543   : > { %1771 = vmatpush.bf16.msra.mxu1 %v1740_v17  ;;  %v2298_v17 = vunpack.i.h.bf16 %v3236_v50 }
 0x545   : > { %v3478_v38 = vpop.permute.xlu1 %1623  ;;  %v3480_v2 = vpop.permute.xlu0 %1675  ;;  %2391 = vrot.lane.b32.xlu1 %v2390_v14, %s2423_s11  ;;  %1588 = vrot.lane.b32.xlu2 %v3369_v44, %s2427_s19  ;;  %v2349_v14 = vunpack.i.h.bf16 %v3453_v45  ;;  %s2167_s11 = smul.u32 24, %s3704_s14 }
 0x547   : > { %s3674_s18 = scalar_lea.vmem %s3701_s9, %s2167_s11  ;;  %s389_s24 = scalar_lea.vmem %s3702_s10, %s2167_s11 }
 0x54d   : > { %v3489_v18 = vpop.permute.xlu1 %1578  ;;  %v3491_v33 = vpop.permute.xlu0 %1642  ;;  %2396 = vrot.lane.b32.xlu1 %v2395_v32, %s2428_s20  ;;  %1857 = vrot.lane.b32.xlu2 %v3394_v15, %s2420_s28  ;;  %v1627_v32 = vmul.f32 %v1617_v21, %v2607_v25 }
 0x555   : > { %v3502_v34 = vpop.permute.xlu1 %2361  ;;  %v1697_v43 = vpop.permute.xlu0 %1696  ;;  %1727 = vperm.xlu1 %2319, %v1562_v63   ;;  %1801 = vrot.lane.b32.xlu2 %v3394_v15, %s2422_s30  ;;  %v1580_v63 = vsel %vm438_vm13, %v2298_v17, %v3404_v5 }
 0x556   : > { %v1700_v24 = vsel %vm574_vm4, %v1695_v37, %v1697_v43  ;;  %v1701_v53 = vsel %vm574_vm4, %v1697_v43, %v2323_v59  ;;  %v2364_v20 = vunpack.i.h.bf16 %v3502_v34  ;;  %v2363_v42 = vunpack.i.l.bf16 %v3502_v34 }
 0x557   : > { %v1707_v35 = vmul.f32 %v1700_v24, %v2607_v25  ;;  %v1708_v13 = vmul.f32 %v1701_v53, %v2609_v26  ;;  %v1636_v37 = vsel %vm506_vm12, %v2338_v54, %v3473_v0  ;;  %v1592_v24 = vmul.f32 %v1580_v63, %v2620_v40  ;;  %v3547_v53 = vld [vmem:[%s3697_s5] sm:$0xf] }
 0x558   : > { %v1687_v61 = vsel %vm560_vm9, %v2363_v42, %v2364_v20  ;;  %v1646_v46 = vmul.f32 %v1636_v37, %v2620_v40  ;;  %v2358_v54 = vunpack.i.l.bf16 %v3485_v6  ;;  %v2329_v34 = vunpack.i.h.bf16 %v3419_v39 }
 0x559   : > { %v1722_v16 = vpack.c.bf16 %v1707_v35, %v1707_v35  ;;  %v1723_v19 = vpack.c.bf16 %v1708_v13, %v1708_v13  ;;  %v1719_v60 = vpack.c.bf16 %v1687_v61, %v1678_v58  ;;  %v2353_v61 = vunpack.i.l.bf16 %v3451_v62 }
 0x55a   : > { %v1713_v59 = vpack.c.bf16 %v1646_v46, %v1627_v32  ;;  %v2328_v58 = vunpack.i.l.bf16 %v3419_v39  ;;  %v1718_v46 = vpack.c.bf16 %v1664_v55, %v3369_v44 }
 0x55b   : > { %v1734_v52 = vsel %vm609_vm7, %v1722_v16, 0  ;;  %v1737_v3 = vsel %vm609_vm7, %v1723_v19, 0  ;;  %v1625_v37 = vsel %vm491_vm2, %v2353_v61, %v3478_v38 }
 0x55c   : > { %1745 = vmatpush.bf16.msrb.mxu3 %v1734_v52  ;;  %1758 = vmatpush.bf16.msra.mxu0 %v1737_v3  ;;  %v1680_v3 = vmul.f32 %v3480_v2, %v2669_v12  ;;  %v1672_v2 = vsel %vm543_vm8, %v3500_v36, %v2328_v58 }
 0x55d   : > { %v1652_v9 = vpop.permute.xlu0 %1651  ;;  %2401 = vrot.lane.b32.xlu2 %v2400_v8, %s2428_s20  ;;  %v1679_v38 = vmul.f32 %v1672_v2, %v2622_v41 }
 0x55e   : > { %v1655_v4 = vsel %vm526_vm10, %v1650_v22, %v1652_v9  ;;  %v2348_v22 = vunpack.i.l.bf16 %v3453_v45 }
 0x55f   : > { %v1662_v56 = vmul.f32 %v1655_v4, %v2607_v25 }
 0x560   : > { %1746 = vmatpush.bf16.msrb.mxu3 %v1719_v60  ;;  %v1644_v60 = vsel %vm506_vm12, %v2358_v54, %v3491_v33  ;;  %v2324_v54 = vunpack.i.h.bf16 %v3421_v47 }
 0x561   : > { %v1716_v30 = vpack.c.bf16 %v1662_v56, %v3309_v1  ;;  %v1601_v1 = vsel %vm464_vm14, %v2348_v22, %v2349_v14  ;;  %v1648_v17 = vmul.f32 %v1644_v60, %v2669_v12  ;;  %v1629_v22 = vmul.f32 %v1625_v37, %v2611_v27 }
 0x562   : > { %v1710_v50 = vpack.c.bf16 %v1601_v1, %v1592_v24  ;;  %v1618_v24 = vsel %vm482_vm11, %v3433_v29, %v1616_v31 }
 0x563   : > { %v1715_v63 = vpack.c.bf16 %v1648_v17, %v1629_v22 }
 0x564   : > { %1747 = vmatpush.bf16.msrb.mxu3 %v1716_v30  ;;  %v2343_v30 = vunpack.i.l.bf16 %v3443_v23 }
 0x565   : > { %v1635_v42 = vpop.permute.xlu0 %1634 }
 0x566   : > { %v1656_v33 = vsel %vm526_vm10, %v1652_v9, %v2343_v30  ;;  %v1637_v44 = vsel %vm506_vm12, %v3473_v0, %v1635_v42  ;;  %v1581_v0 = vsel %vm438_vm13, %v3404_v5, %v3489_v18  ;;  %v2344_v5 = vunpack.i.h.bf16 %v3443_v23 }
 0x567   : > { %v1928_v43 = vpop.permute.xlu2 %1927 }
 0x568   : > { %1748 = vmatpush.bf16.msrb.mxu3 %v1713_v59  ;;  %v1663_v59 = vmul.f32 %v1656_v33, %v2609_v26  ;;  %v1932_v29 = vmul.f32 %v1928_v43, %v2611_v27 }
 0x56a   : > { %v1947_v30 = vpack.c.bf16 %v1932_v29, %v1932_v29 }
 0x56c   : > { %1749 = vmatpush.bf16.msrb.mxu3 %v1710_v50 }
 0x56d   : > { %v3555_v28 = vpop.permute.xlu0 %2366 }
 0x56e   : > { %v2368_v31 = vunpack.i.l.bf16 %v3555_v28 }
 0x56f   : > { %2158 = vmatmul.msk.bf16.vlgmr.msrb.gmra.mxu3 %vm605_vm1, %v3547_v53  ;;  %v3551_v35 = vpop.permute.xlu2 %1882 }
 0x570   : > { %v1602_v17 = vsel %vm464_vm14, %v2349_v14, %v2368_v31  ;;  %v2334_v31 = vunpack.i.h.bf16 %v3459_v49 }
 0x577   : > { %v3553_v13 = vpop.permute.xlu2 %1846 }
 0x57f   : > { %v3557_v16 = vpop.permute.xlu1 %1898  ;;  %v1918_v19 = vpop.permute.xlu2 %1917 }
 0x581   : > { %v3560_v52 = vpop.permute.xlu0 %2371 }
 0x582   : > { %v2373_v8 = vunpack.i.l.bf16 %v3560_v52 }
 0x584   : > { %v1721_v4 = vpack.c.bf16 %v2373_v8, %v1680_v3  ;;  %v1647_v3 = vmul.f32 %v1637_v44, %v2622_v41  ;;  %v1717_v8 = vpack.c.bf16 %v1663_v59, %v3362_v48 }
 0x586   : > { %1772 = vmatpush.bf16.msra.mxu1 %v1721_v4 }
 0x587   : > { %v1889_v56 = vpop.permute.xlu1 %1888  ;;  %v1891_v21 = vpop.permute.xlu2 %1890 }
 0x588   : > { %v1894_v18 = vsel %vm543_vm8, %v1889_v56, %v1891_v21  ;;  %v1895_v43 = vsel %vm543_vm8, %v1891_v21, %v2329_v34 }
 0x589   : > { %v2377_v10 = vpop.permute.xlu0 %2376 }
 0x58a   : > { %v2378_v32 = vunpack.i.l.bf16 %v2377_v10  ;;  %1773 = vmatpush.bf16.msra.mxu1 %v1718_v46  ;;  %v2379_v60 = vunpack.i.h.bf16 %v2377_v10 }
 0x58c   : > { %v1688_v36 = vsel %vm560_vm9, %v2364_v20, %v2378_v32  ;;  %v1628_v20 = vmul.f32 %v1618_v24, %v2609_v26  ;;  %v1901_v32 = vmul.f32 %v1894_v18, %v2620_v40  ;;  %v2374_v24 = vunpack.i.h.bf16 %v3560_v52 }
 0x58d   : > { %v1720_v1 = vpack.c.bf16 %v1688_v36, %v1679_v38  ;;  %v1902_v38 = vmul.f32 %v1895_v43, %v2622_v41  ;;  %v1887_v52 = vmul.f32 %v3551_v35, %v2611_v27 }
 0x58e   : > { %1774 = vmatpush.bf16.msra.mxu1 %v1715_v63  ;;  %v1714_v48 = vpack.c.bf16 %v1647_v3, %v1628_v20 }
 0x58f   : > { %1759 = vmatpush.bf16.msra.mxu0 %v1720_v1  ;;  %v2382_v9 = vpop.permute.xlu1 %2381  ;;  %v1875_v50 = vpop.permute.xlu2 %1874 }
 0x590   : > { %v2384_v58 = vunpack.i.h.bf16 %v2382_v9  ;;  %v2383_v55 = vunpack.i.l.bf16 %v2382_v9  ;;  %v1879_v46 = vsel %vm526_vm10, %v1875_v50, %v2344_v5  ;;  %v1963_v9 = vsel %vm609_vm7, %v1947_v30, 0 }
 0x591   : > { %v1920_v42 = vpop.permute.xlu0 %1919  ;;  %v1886_v36 = vmul.f32 %v1879_v46, %v2609_v26 }
 0x592   : > { %v1923_v61 = vsel %vm574_vm4, %v1918_v19, %v1920_v42  ;;  %v1924_v47 = vsel %vm574_vm4, %v1920_v42, %v2324_v54  ;;  %v1593_v19 = vmul.f32 %v1581_v0, %v2622_v41  ;;  %v1910_v21 = vsel %vm560_vm9, %v2379_v60, %v2383_v55 }
 0x593   : > { %v1930_v39 = vmul.f32 %v1923_v61, %v2607_v25  ;;  %v1931_v4 = vmul.f32 %v1924_v47, %v2609_v26  ;;  %1760 = vmatpush.bf16.msra.mxu0 %v1717_v8  ;;  %v1911_v10 = vsel %vm560_vm9, %v2383_v55, %v2384_v58  ;;  %v1942_v44 = vpack.c.bf16 %v1910_v21, %v1901_v32 }
 0x594   : > { %v1711_v14 = vpack.c.bf16 %v1602_v17, %v1593_v19  ;;  %v1943_v1 = vpack.c.bf16 %v1911_v10, %v1902_v38  ;;  %v2354_v54 = vunpack.i.h.bf16 %v3451_v62  ;;  %v1940_v34 = vpack.c.bf16 %v1886_v36, %v3394_v15  ;;  %v1784_v36 = vld [vmem:[%s3699_s7] sm:$0x7] }
 0x595   : > { %v1945_v37 = vpack.c.bf16 %v1930_v39, %v1930_v39  ;;  %v1946_v2 = vpack.c.bf16 %v1931_v4, %v1931_v4  ;;  %v2359_v8 = vunpack.i.h.bf16 %v3485_v6  ;;  %v2339_v6 = vunpack.i.h.bf16 %v3431_v11 }
 0x596   : > { %v2369_v19 = vunpack.i.h.bf16 %v3555_v28  ;;  %vm2023_vm4 = vcmask 520192  }
 0x597   : > { %1761 = vmatpush.bf16.msra.mxu0 %v1714_v48  ;;  %v1873_v22 = vpop.permute.xlu1 %1872  ;;  %v1837_v23 = vpop.permute.xlu2 %1836  ;;  %v1957_v56 = vsel %vm609_vm7, %v1945_v37, 0  ;;  %v1960_v33 = vsel %vm609_vm7, %v1946_v2, 0 }
 0x598   : > { %v1878_v63 = vsel %vm526_vm10, %v1873_v22, %v1875_v50  ;;  %1968 = vmatpush.bf16.msra.mxu2 %v1957_v56  ;;  %1981 = vmatpush.bf16.msra.mxu3 %v1960_v33  ;;  %v1903_v50 = vmul.f32 %v3557_v16, %v2669_v12  ;;  %v1848_v16 = vsel %vm491_vm2, %v2354_v54, %v3553_v13 }
 0x599   : > { %v1839_v45 = vpop.permute.xlu0 %1838  ;;  %v1885_v59 = vmul.f32 %v1878_v63, %v2607_v25  ;;  %v1852_v15 = vmul.f32 %v1848_v16, %v2611_v27  ;;  %v1840_v13 = vsel %vm482_vm11, %v2334_v31, %v1837_v23 }
 0x59a   : > { %v1944_v20 = vpack.c.bf16 %v2374_v24, %v1903_v50  ;;  %v1841_v47 = vsel %vm482_vm11, %v1837_v23, %v1839_v45  ;;  %v1850_v27 = vmul.f32 %v1840_v13, %v2607_v25 }
 0x59b   : > { %1762 = vmatpush.bf16.msra.mxu0 %v1711_v14  ;;  %v1939_v3 = vpack.c.bf16 %v1885_v59, %v3392_v57  ;;  %v1941_v57 = vpack.c.bf16 %v1887_v52, %v3400_v7  ;;  %v1851_v4 = vmul.f32 %v1841_v47, %v2609_v26 }
 0x59c   : > { %1969 = vmatpush.bf16.msra.mxu2 %v1942_v44  ;;  %1982 = vmatpush.bf16.msra.mxu3 %v1943_v1 }
 0x59e   : > { %2159 = vmatmul.msk.bf16.vlgmr.msra.gmra.mxu0 %vm605_vm1, %v3547_v53 }
 0x59f   : > { %1994 = vmatpush.bf16.msrb.mxu0 %v1963_v9  ;;  %v2387_v0 = vpop.permute.xlu1 %2386  ;;  %v1589_v42 = vpop.permute.xlu2 %1588 }
 0x5a0   : > { %1970 = vmatpush.bf16.msra.mxu2 %v1939_v3  ;;  %1983 = vmatpush.bf16.msra.mxu3 %v1940_v34  ;;  %v2389_v37 = vunpack.i.h.bf16 %v2387_v0  ;;  %v2388_v32 = vunpack.i.l.bf16 %v2387_v0 }
 0x5a1   : > { %v1866_v62 = vpop.permute.xlu0 %1865 }
 0x5a2   : > { %v1867_v29 = vsel %vm506_vm12, %v2359_v8, %v1866_v62 }
 0x5a3   : > { %1995 = vmatpush.bf16.msrb.mxu0 %v1944_v20  ;;  %v1871_v35 = vmul.f32 %v1867_v29, %v2669_v12 }
 0x5a5   : > { %v1938_v61 = vpack.c.bf16 %v1871_v35, %v1852_v15 }
 0x5a7   : > { %1996 = vmatpush.bf16.msrb.mxu0 %v1941_v57  ;;  %v1856_v58 = vpop.permute.xlu1 %1855  ;;  %v1858_v55 = vpop.permute.xlu2 %1857 }
 0x5a8   : > { %v1859_v39 = vsel %vm506_vm12, %v2339_v6, %v1856_v58  ;;  %v1860_v7 = vsel %vm506_vm12, %v1856_v58, %v1858_v55 }
 0x5a9   : > { %v1869_v49 = vmul.f32 %v1859_v39, %v2620_v40  ;;  %v1870_v5 = vmul.f32 %v1860_v7, %v2622_v41  ;;  %v1812_v60 = vpop.permute.xlu0 %1811 }
 0x5aa   : > { %v1813_v2 = vsel %vm449_vm3, %v2389_v37, %v1812_v60 }
 0x5ab   : > { %1997 = vmatpush.bf16.msrb.mxu0 %v1938_v61  ;;  %v1936_v11 = vpack.c.bf16 %v1869_v49, %v1850_v27  ;;  %v1937_v18 = vpack.c.bf16 %v1870_v5, %v1851_v4  ;;  %v1817_v33 = vmul.f32 %v1813_v2, %v2669_v12 }
 0x5ad   : > { %1971 = vmatpush.bf16.msra.mxu2 %v1936_v11  ;;  %1984 = vmatpush.bf16.msra.mxu3 %v1937_v18 }
 0x5af   : > { %v1800_v48 = vpop.permute.xlu1 %1799  ;;  %v1802_v43 = vpop.permute.xlu2 %1801 }
 0x5b0   : > { %v1803_v25 = vsel %vm438_vm13, %v3441_v51, %v1800_v48  ;;  %v1804_v26 = vsel %vm438_vm13, %v1800_v48, %v1802_v43 }
 0x5b1   : > { %v1815_v21 = vmul.f32 %v1803_v25, %v2620_v40  ;;  %v1816_v10 = vmul.f32 %v1804_v26, %v2622_v41  ;;  %v1590_v40 = vsel %vm449_vm3, %v2388_v32, %v1589_v42  ;;  %v1951_v42 = vpop.permute.xlu0 %1950 }
 0x5b2   : > { %v1594_v1 = vmul.f32 %v1590_v40, %v2669_v12 }
 0x5b7   : > { %v2392_v30 = vpop.permute.xlu1 %2391  ;;  %v2402_v46 = vpop.permute.xlu2 %2401 }
 0x5b8   : > { %v2394_v17 = vunpack.i.h.bf16 %v2392_v30  ;;  %v2393_v22 = vunpack.i.l.bf16 %v2392_v30  ;;  %v2404_v23 = vunpack.i.h.bf16 %v2402_v46  ;;  %v2403_v56 = vunpack.i.l.bf16 %v2402_v46 }
 0x5ba   : > { %v1824_v38 = vsel %vm464_vm14, %v2369_v19, %v2393_v22  ;;  %v1825_v51 = vsel %vm464_vm14, %v2393_v22, %v2394_v17  ;;  %v1832_v63 = vsel %vm473_vm5, %v2403_v56, %v2404_v23 }
 0x5bb   : > { %v1933_v28 = vpack.c.bf16 %v1824_v38, %v1815_v21  ;;  %v1934_v45 = vpack.c.bf16 %v1825_v51, %v1816_v10  ;;  %v1935_v14 = vpack.c.bf16 %v1832_v63, %v1817_v33 }
 0x5bd   : > { %1972 = vmatpush.bf16.msra.mxu2 %v1933_v28  ;;  %1985 = vmatpush.bf16.msra.mxu3 %v1934_v45 }
 0x5be   : > { %1998 = vmatpush.bf16.msrb.mxu0 %v1935_v14 }
 0x5bf   : > { %v2397_v41 = vpop.permute.xlu1 %2396 }
 0x5c0   : > { %v2399_v59 = vunpack.i.h.bf16 %v2397_v41  ;;  %v2398_v44 = vunpack.i.l.bf16 %v2397_v41  ;;  %2161 = vmatmul.msk.bf16.vlgmr.msra.gmra.mxu2 %vm605_vm1, %v1784_v36  ;;  %2162 = vmatmul.msk.bf16.vlgmr.msra.gmra.mxu3 %vm605_vm1, %v1784_v36 }
 0x5c1   : > { %2163 = vmatmul.msk.bf16.vlgmr.msrb.gmra.mxu0 %vm605_vm1, %v1784_v36 }
 0x5c2   : > { %v1609_v24 = vsel %vm473_vm5, %v2398_v44, %v2399_v59 }
 0x5c3   : > { %v1712_v9 = vpack.c.bf16 %v1609_v24, %v1594_v1 }
 0x5c5   : > { %1775 = vmatpush.bf16.msra.mxu1 %v1712_v9 }
 0x5c7   : > { %v1728_v50 = vpop.permute.xlu1 %1727 }
 0x5c8   : > { %2160 = vmatmul.msk.bf16.vlgmr.msra.gmra.mxu1 %vm605_vm1, %v3547_v53  ;;  %v2004_v53 = vld [vmem:[%s3694_s2] sm:$0x7] }
 0x5c9   : > { %v2008_v0 = vperm.slane %v2004_v53, 2  ;;  %v2006_v29 = vperm.slane %v2004_v53, 0  ;;  %v2007_v57 = vperm.slane %v2004_v53, 1 }
 0x5f2   : > { %v1751_v54 = vpop.f32.mrf.mxu3 }
 0x5f3   : > { %v1752_v12 = vadd.f32 %v1751_v54, %v1728_v50 }
 0x5f5   : > { %1781 = vst [vmem:[%s3674_s18] sm:$0xff] %v1752_v12 }
 0x5fa   : > { %v1753_v3 = vpop.f32.mrf.mxu3 }
 0x61b   : > { %v1764_v34 = vpop.f32.mrf.mxu0 }
 0x61c   : > { %v1765_v52 = vadd.f32 %v1764_v34, %v1728_v50 }
 0x61e   : > { %1782 = vst [vmem:[%s3674_s18 + $0x8] sm:$0xff] %v1765_v52 }
 0x623   : > { %v1766_v20 = vpop.f32.mrf.mxu0 }
 0x63e   : > { %v2000_v8 = vpop.f32.mrf.mxu0 }
 0x63f   : > { %v2001_v16 = vadd.f32 %v2000_v8, %v1951_v42 }
 0x641   : > { %v2014_v62 = vmul.f32 %v2008_v0, %v2001_v16 }
 0x643   : > { %v2017_v15 = vmax.f32 %v2014_v62, 0.0  ;;  %v1974_v35 = vpop.f32.mrf.mxu2  ;;  %v1987_v31 = vpop.f32.mrf.mxu3 }
 0x644   : > { %v1975_v61 = vadd.f32 %v1974_v35, %v1951_v42  ;;  %v1988_v6 = vadd.f32 %v1987_v31, %v1951_v42 }
 0x645   : > { %v2020_v13 = vsel %vm609_vm7, %v2017_v15, %v2001_v16  ;;  %v1777_v47 = vpop.f32.mrf.mxu1 }
 0x646   : > { %2024 = vst.msk [vmem:[%s389_s24 + $0x10] sm:$0x1f] %vm2023_vm4, %v2020_v13  ;;  %v2012_v58 = vmul.f32 %v2006_v29, %v1975_v61  ;;  %v2013_v55 = vmul.f32 %v2007_v57, %v1988_v6  ;;  %v1778_v39 = vadd.f32 %v1777_v47, %v1728_v50  ;;  %v2002_v7 = vpop.f32.mrf.mxu0 }
 0x648   : > { %v2015_v27 = vmax.f32 %v2012_v58, 0.0  ;;  %v2016_v4 = vmax.f32 %v2013_v55, 0.0  ;;  %1783 = vst.msk [vmem:[%s3674_s18 + $0x10] sm:$0xff] %vm414_vm0, %v1778_v39 }
 0x64a   : > { %v2018_v49 = vsel %vm609_vm7, %v2015_v27, %v1975_v61  ;;  %v2019_v5 = vsel %vm609_vm7, %v2016_v4, %v1988_v6 }
 0x64b   : > { %2021 = vst [vmem:[%s389_s24] sm:$0x1f] %v2018_v49  ;;  %v1976_v11 = vpop.f32.mrf.mxu2  ;;  %v1989_v18 = vpop.f32.mrf.mxu3 }
 0x64c   : > { %2022 = vst [vmem:[%s389_s24 + $0x8] sm:$0x1f] %v2019_v5 }
 0x64d   : > { %v1779_v48 = vpop.f32.mrf.mxu1 }
 0x64e PF: > { %s21_s13 = sadd.s32 1, %s2412_s13  }
 0x64f   : > { %p18_p4 = scmp.ge.s32.totalorder %s21_s13, 4  }
 0x651   :  { %20 = sbr.rel (!%p18_p4) target bundleno = 1 (0x1), region = 109 }

</bundles_post_ra>
